<compile_context>
chip_gen: v7x
topology: tpu7x:2x2x1
jax: 0.10.0
libtpu: 0.0.40
codegen_flags: <defaults>
</compile_context>

<pallas_src>
import math

import numpy as np
import jax
import jax.numpy as jnp
from jax.experimental import pallas as pl
from jax.experimental.pallas import tpu as pltpu

# ----------------------------- configuration --------------------------------
N_SEGMENT = 4                                   # temporal segments T
N_DIV     = 4
C_IN      = 32                                  # net.in_channels
C_OUT     = 32                                  # net = nn.Conv2d(C_IN, C_OUT, 1)
H = W     = 8
HW        = H * W
N_VIDEOS  = 2                                   # frame batch N = N_VIDEOS * N_SEGMENT
FOLD      = math.ceil(C_IN // N_DIV / 4) * 4    # = 8  (fold_dim in the module)
HALF      = FOLD // 2
QUARTER   = FOLD // 4
BN_EPS    = 1e-5


def _tshift(a, delta):
    """out[:, t] = a[:, t+delta], zero padded. axis=1 (temporal, leading dim)."""
    if delta == 0:
        return a
    if delta > 0:
        pad = jnp.zeros_like(a[:, :delta])
        return jnp.concatenate([a[:, delta:], pad], axis=1)
    pad = jnp.zeros_like(a[:, :(-delta)])
    return jnp.concatenate([pad, a[:, :delta]], axis=1)


def _lane_roll(a, d):
    """Circular shift of the flattened H*W lane dim: out[..., l] = a[..., (l+d) % n].

    Lanes whose spatial neighbor is out of bounds are zeroed by the boundary mask
    that the wrapper folds into the conv-tap weights, so a circular shift suffices
    (no per-tap zero concatenation needed)."""
    n = a.shape[-1]
    k = d % n
    if k == 0:
        return a
    return jnp.concatenate([a[..., k:], a[..., :k]], axis=-1)


def gated_shift_kernel(x_ref, gp_ref, w3m_ref, wnet_ref, out_ref):
    # layout: (bs, T, C, H*W) — H*W=64 on lanes, channels on sublanes.
    bs, T, C, n_hw = x_ref.shape
    x = x_ref[...]
    gp = gp_ref[...]            # (3, FOLD, HW): BN scale, BN bias, conv-bias/HALF
    w3m = w3m_ref[...]          # (27, FOLD, HW): per-channel tap weight * boundary mask
    wnet = wnet_ref[...]        # (C_OUT, C+1): shuffled 1x1-conv weight | bias column

    xf = x[:, :, :FOLD, :]                                  # folded channels
    # ---- GSM gate: tanh(Conv3d_{3x3x3, groups=2}(ReLU(BN(x)))) -------------
    # inference BN + ReLU for both conv groups at once
    xbr = jnp.maximum(xf * gp[0] + gp[1], 0.0)

    # accumulate per-channel over all 27 taps, reduce across channels once per group
    acc = jnp.zeros(xbr.shape, jnp.float32)
    for kt in range(3):
        xt = _tshift(xbr, kt - 1)                           # temporal tap (leading dim)
        for kh in range(3):
            for kw in range(3):
                tap = kt * 9 + kh * 3 + kw
                s = _lane_roll(xt, (kh - 1) * W + (kw - 1)) # spatial tap (lane dim)
                acc = acc + s * w3m[tap]
    acc = acc + gp[2]                                       # conv bias (b3/HALF per chan)
    g0 = jnp.tanh(jnp.sum(acc[:, :, :HALF, :], axis=2, keepdims=True))
    g1 = jnp.tanh(jnp.sum(acc[:, :, HALF:, :], axis=2, keepdims=True))

    # ---- gated temporal shift + residual ------------------------------------
    x1 = xf[:, :, :HALF, :]
    x2 = xf[:, :, HALF:, :]
    y1 = g0 * x1
    y2 = g1 * x2
    yg1 = _tshift(y1, +1) + (x1 - y1)                       # group 1: forward in time
    yg2 = _tshift(y2, -1) + (x2 - y2)                       # group 2: backward in time

    # ---- net(y): 1x1 Conv2d == channel matmul on the MXU --------------------
    # channel shuffle + bias are folded into wnet (exact reindexing / ones channel)
    ones = jnp.ones((bs, T, 1, n_hw), jnp.float32)
    y = jnp.concatenate([yg1, yg2, x[:, :, FOLD:, :], ones], axis=2)  # (bs,T,C+1,HW)
    for b in range(bs):
        for t in range(T):
            out_ref[b, t] = jnp.dot(wnet, y[b, t],
                                    preferred_element_type=jnp.float32)


def gated_shift_forward(x_nchw, params):
    """GatedShift forward. x_nchw: (N, C, H, W) float32, N = bs * T."""
    N, C, Hh, Ww = x_nchw.shape
    T = N_SEGMENT
    bs = N // T
    hw = Hh * Ww
    cout = params['w2'].shape[0]

    # channel-major per-video layout: a pure reshape of NCHW (no transposes)
    x4 = x_nchw.reshape(bs, T, C, hw)

    # inference-mode BatchNorm3d folded into per-channel scale/bias; conv bias
    # spread as b3[g]/HALF per channel so it folds into the channel reduction.
    scale = params['bn_gamma'] / jnp.sqrt(params['bn_var'] + BN_EPS)
    shift = params['bn_beta'] - params['bn_mean'] * scale
    b3c = jnp.repeat(params['b3'], HALF) / HALF
    gp = jnp.stack([
        jnp.broadcast_to(scale[:, None], (FOLD, hw)),
        jnp.broadcast_to(shift[:, None], (FOLD, hw)),
        jnp.broadcast_to(b3c[:, None], (FOLD, hw)),
    ], axis=0)                                              # (3, FOLD, HW)

    # Conv3d weight (2, HALF, 3,3,3) -> per-input-channel packing (27, FOLD),
    # then multiplied by the spatial zero-padding mask -> (27, FOLD, HW).
    w3p = jnp.transpose(params['w3'].reshape(FOLD, 3, 3, 3), (1, 2, 3, 0)).reshape(27, FOLD)
    ll = np.arange(hw)
    row, col = ll // Ww, ll % Ww
    mask = np.zeros((27, hw), np.float32)
    for kt in range(3):
        for kh in range(3):
            for kw in range(3):
                ok = ((row + kh - 1 >= 0) & (row + kh - 1 < Hh)
                      & (col + kw - 1 >= 0) & (col + kw - 1 < Ww))
                mask[kt * 9 + kh * 3 + kw] = ok
    w3m = w3p[:, :, None] * jnp.asarray(mask)[:, None, :]   # (27, FOLD, HW)

    # fold GSM channel shuffle + conv bias into the 1x1-conv weight (exact)
    pg = np.array([(j % 2) * QUARTER + (j // 2) for j in range(HALF)])
    perm = np.concatenate([pg, HALF + pg])                  # y_final[j] = y_unshuf[perm[j]]
    inv = np.argsort(perm)
    col_perm = np.concatenate([inv, np.arange(FOLD, C)])
    w_eff = params['w2'][:, col_perm]                       # (cout, C)
    wnet = jnp.concatenate([w_eff, params['b2'][:, None]], axis=1)   # (cout, C+1)

    grid_spec = pltpu.PrefetchScalarGridSpec(
        num_scalar_prefetch=0,
        grid=(1,),                                          # whole batch in one step
        in_specs=[
            pl.BlockSpec((bs, T, C, hw), lambda i: (0, 0, 0, 0)),
            pl.BlockSpec((3, FOLD, hw), lambda i: (0, 0, 0)),
            pl.BlockSpec((27, FOLD, hw), lambda i: (0, 0, 0)),
            pl.BlockSpec((cout, C + 1), lambda i: (0, 0)),
        ],
        out_specs=pl.BlockSpec((bs, T, cout, hw), lambda i: (0, 0, 0, 0)),
    )
    out = pl.pallas_call(
        gated_shift_kernel,
        out_shape=jax.ShapeDtypeStruct((bs, T, cout, hw), jnp.float32),
        grid_spec=grid_spec,
        compiler_params=pltpu.CompilerParams(dimension_semantics=("arbitrary",)),
    )(x4, gp, w3m, wnet)

    # pure reshape back to PyTorch NCHW (no transpose needed)
    return out.reshape(N, cout, Hh, Ww)


def reference_forward(x_nchw, params):
    """Pure-JAX mirror of the PyTorch module (NCHW), for validation."""
    N, C, Hh, Ww = x_nchw.shape
    T = N_SEGMENT
    bs = N // T
    xf = x_nchw[:, :FOLD]
    xrest = x_nchw[:, FOLD:]
    xp = xf.reshape(bs, T, FOLD, Hh, Ww).transpose(0, 2, 1, 3, 4)        # (bs,FOLD,T,H,W)
    scale = params['bn_gamma'] / jnp.sqrt(params['bn_var'] + BN_EPS)
    shift = params['bn_beta'] - params['bn_mean'] * scale
    xbr = jnp.maximum(xp * scale[None, :, None, None, None]
                      + shift[None, :, None, None, None], 0.0)
    gate = jax.lax.conv_general_dilated(
        xbr, params['w3'], window_strides=(1, 1, 1), padding=[(1, 1)] * 3,
        dimension_numbers=('NCDHW', 'OIDHW', 'NCDHW'), feature_group_count=2)
    gate = jnp.tanh(gate + params['b3'][None, :, None, None, None])      # (bs,2,T,H,W)
    x1, x2 = xp[:, :HALF], xp[:, HALF:]
    y1 = gate[:, 0:1] * x1
    y2 = gate[:, 1:2] * x2
    r1, r2 = x1 - y1, x2 - y2
    y1 = jnp.concatenate([y1[:, :, 1:], jnp.zeros_like(y1[:, :, :1])], axis=2) + r1
    y2 = jnp.concatenate([jnp.zeros_like(y2[:, :, :1]), y2[:, :, :-1]], axis=2) + r2
    y1 = y1.reshape(bs, 2, QUARTER, T, Hh, Ww).transpose(0, 2, 1, 3, 4, 5).reshape(bs, HALF, T, Hh, Ww)
    y2 = y2.reshape(bs, 2, QUARTER, T, Hh, Ww).transpose(0, 2, 1, 3, 4, 5).reshape(bs, HALF, T, Hh, Ww)
    yf = jnp.concatenate([y1, y2], axis=1).transpose(0, 2, 1, 3, 4).reshape(N, FOLD, Hh, Ww)
    y = jnp.concatenate([yf, xrest], axis=1)
    out = jnp.einsum('nchw,oc->nohw', y, params['w2'], precision='highest')
    return out + params['b2'][None, :, None, None]


if __name__ == "__main__":
    key = jax.random.PRNGKey(0)
    keys = jax.random.split(key, 9)
    N = N_VIDEOS * N_SEGMENT
    x = jax.random.normal(keys[0], (N, C_IN, H, W), jnp.float32)

    # Deterministic parameters. NB: PyTorch zero-inits the GSM Conv3d (gate == 0);
    # we use small random weights so the gating path is actually exercised.
    params = {
        'bn_gamma': 1.0 + 0.1 * jax.random.normal(keys[1], (FOLD,), jnp.float32),
        'bn_beta':  0.1 * jax.random.normal(keys[2], (FOLD,), jnp.float32),
        'bn_mean':  0.1 * jax.random.normal(keys[3], (FOLD,), jnp.float32),
        'bn_var':   jax.random.uniform(keys[4], (FOLD,), jnp.float32, 0.5, 1.5),
        'w3': 0.2 * jax.random.normal(keys[5], (2, HALF, 3, 3, 3), jnp.float32),
        'b3': 0.1 * jax.random.normal(keys[6], (2,), jnp.float32),
        'w2': (1.0 / math.sqrt(C_IN)) * jax.random.normal(keys[7], (C_OUT, C_IN), jnp.float32),
        'b2': 0.1 * jax.random.normal(keys[8], (C_OUT,), jnp.float32),
    }
    # TODO(synk): BatchNorm3d is implemented in inference mode (running stats);
    # training-mode batch-statistic computation is not replicated.

    out = jax.block_until_ready(gated_shift_forward(x, params))
    ref = jax.block_until_ready(reference_forward(x, params))
    assert out.shape == ref.shape == (N, C_OUT, H, W)
    err = float(jnp.max(jnp.abs(out - ref)))
    assert err < 1e-3, f"kernel/reference mismatch: max abs err = {err}"
    print("KERNEL_OK")
</pallas_src>

<mosaic_0001>
module attributes {stable_mosaic.version = 11 : i64} {
  func.func @gated_shift_kernel(%arg0: i32, %arg1: memref<2x4x32x64xf32, #tpu.memory_space<vmem>>, %arg2: memref<3x8x64xf32, #tpu.memory_space<vmem>>, %arg3: memref<27x8x64xf32, #tpu.memory_space<vmem>>, %arg4: memref<32x33xf32, #tpu.memory_space<vmem>>, %arg5: memref<2x4x32x64xf32, #tpu.memory_space<vmem>>) attributes {dimension_semantics = [#tpu.dimension_semantics<arbitrary>], iteration_bounds = array<i64: 1>, scalar_prefetch = 0 : i64, scratch_operands = 0 : i64, tpu.core_type = #tpu.core_type<tc>, window_params = [{pipeline_mode = #tpu.pipeline_mode<synchronous>, transform_indices = @transform_0, window_bounds = array<i64: 2, 4, 32, 64>}, {pipeline_mode = #tpu.pipeline_mode<synchronous>, transform_indices = @transform_1, window_bounds = array<i64: 3, 8, 64>}, {pipeline_mode = #tpu.pipeline_mode<synchronous>, transform_indices = @transform_2, window_bounds = array<i64: 27, 8, 64>}, {pipeline_mode = #tpu.pipeline_mode<synchronous>, transform_indices = @transform_3, window_bounds = array<i64: 32, 33>}, {pipeline_mode = #tpu.pipeline_mode<synchronous>, transform_indices = @transform_4, window_bounds = array<i64: 2, 4, 32, 64>}]} {
    %c0 = arith.constant 0 : index
    %c0_0 = arith.constant 0 : index
    %c0_1 = arith.constant 0 : index
    %c0_2 = arith.constant 0 : index
    %0 = vector.load %arg1[%c0, %c0_0, %c0_1, %c0_2] : memref<2x4x32x64xf32, #tpu.memory_space<vmem>>, vector<2x4x32x64xf32>
    %c0_3 = arith.constant 0 : index
    %c0_4 = arith.constant 0 : index
    %c0_5 = arith.constant 0 : index
    %1 = vector.load %arg2[%c0_3, %c0_4, %c0_5] : memref<3x8x64xf32, #tpu.memory_space<vmem>>, vector<3x8x64xf32>
    %c0_6 = arith.constant 0 : index
    %c0_7 = arith.constant 0 : index
    %c0_8 = arith.constant 0 : index
    %2 = vector.load %arg3[%c0_6, %c0_7, %c0_8] : memref<27x8x64xf32, #tpu.memory_space<vmem>>, vector<27x8x64xf32>
    %c0_9 = arith.constant 0 : index
    %c0_10 = arith.constant 0 : index
    %3 = vector.load %arg4[%c0_9, %c0_10] : memref<32x33xf32, #tpu.memory_space<vmem>>, vector<32x33xf32>
    %4 = vector.extract_strided_slice %0 {offsets = [0, 0, 0, 0], sizes = [2, 4, 8, 64], strides = [1, 1, 1, 1]} : vector<2x4x32x64xf32> to vector<2x4x8x64xf32>
    %5 = vector.extract_strided_slice %1 {offsets = [0, 0, 0], sizes = [1, 8, 64], strides = [1, 1, 1]} : vector<3x8x64xf32> to vector<1x8x64xf32>
    %6 = vector.shape_cast %5 : vector<1x8x64xf32> to vector<8x64xf32>
    %7 = vector.shape_cast %6 : vector<8x64xf32> to vector<1x1x8x64xf32>
    %8 = vector.broadcast %7 : vector<1x1x8x64xf32> to vector<2x4x8x64xf32>
    %9 = arith.mulf %4, %8 : vector<2x4x8x64xf32>
    %10 = vector.extract_strided_slice %1 {offsets = [1, 0, 0], sizes = [1, 8, 64], strides = [1, 1, 1]} : vector<3x8x64xf32> to vector<1x8x64xf32>
    %11 = vector.shape_cast %10 : vector<1x8x64xf32> to vector<8x64xf32>
    %12 = vector.shape_cast %11 : vector<8x64xf32> to vector<1x1x8x64xf32>
    %13 = vector.broadcast %12 : vector<1x1x8x64xf32> to vector<2x4x8x64xf32>
    %14 = arith.addf %9, %13 : vector<2x4x8x64xf32>
    %cst = arith.constant 0.000000e+00 : f32
    %15 = vector.broadcast %cst : f32 to vector<2x4x8x64xf32>
    %16 = arith.maximumf %14, %15 : vector<2x4x8x64xf32>
    %cst_11 = arith.constant 0.000000e+00 : f32
    %17 = vector.broadcast %cst_11 : f32 to vector<2x4x8x64xf32>
    %cst_12 = arith.constant 0.000000e+00 : f32
    %18 = vector.broadcast %cst_12 : f32 to vector<2x1x8x64xf32>
    %19 = vector.extract_strided_slice %16 {offsets = [0, 0, 0, 0], sizes = [2, 3, 8, 64], strides = [1, 1, 1, 1]} : vector<2x4x8x64xf32> to vector<2x3x8x64xf32>
    %20 = tpu.concatenate %18, %19 in 1 : vector<2x1x8x64xf32>, vector<2x3x8x64xf32> -> vector<2x4x8x64xf32>
    %21 = vector.extract_strided_slice %20 {offsets = [0, 0, 0, 55], sizes = [2, 4, 8, 9], strides = [1, 1, 1, 1]} : vector<2x4x8x64xf32> to vector<2x4x8x9xf32>
    %22 = vector.extract_strided_slice %20 {offsets = [0, 0, 0, 0], sizes = [2, 4, 8, 55], strides = [1, 1, 1, 1]} : vector<2x4x8x64xf32> to vector<2x4x8x55xf32>
    %23 = tpu.concatenate %21, %22 in 3 : vector<2x4x8x9xf32>, vector<2x4x8x55xf32> -> vector<2x4x8x64xf32>
    %24 = vector.extract_strided_slice %2 {offsets = [0, 0, 0], sizes = [1, 8, 64], strides = [1, 1, 1]} : vector<27x8x64xf32> to vector<1x8x64xf32>
    %25 = vector.shape_cast %24 : vector<1x8x64xf32> to vector<8x64xf32>
    %26 = vector.shape_cast %25 : vector<8x64xf32> to vector<1x1x8x64xf32>
    %27 = vector.broadcast %26 : vector<1x1x8x64xf32> to vector<2x4x8x64xf32>
    %28 = arith.mulf %23, %27 : vector<2x4x8x64xf32>
    %29 = arith.addf %17, %28 : vector<2x4x8x64xf32>
    %30 = vector.extract_strided_slice %20 {offsets = [0, 0, 0, 56], sizes = [2, 4, 8, 8], strides = [1, 1, 1, 1]} : vector<2x4x8x64xf32> to vector<2x4x8x8xf32>
    %31 = vector.extract_strided_slice %20 {offsets = [0, 0, 0, 0], sizes = [2, 4, 8, 56], strides = [1, 1, 1, 1]} : vector<2x4x8x64xf32> to vector<2x4x8x56xf32>
    %32 = tpu.concatenate %30, %31 in 3 : vector<2x4x8x8xf32>, vector<2x4x8x56xf32> -> vector<2x4x8x64xf32>
    %33 = vector.extract_strided_slice %2 {offsets = [1, 0, 0], sizes = [1, 8, 64], strides = [1, 1, 1]} : vector<27x8x64xf32> to vector<1x8x64xf32>
    %34 = vector.shape_cast %33 : vector<1x8x64xf32> to vector<8x64xf32>
    %35 = vector.shape_cast %34 : vector<8x64xf32> to vector<1x1x8x64xf32>
    %36 = vector.broadcast %35 : vector<1x1x8x64xf32> to vector<2x4x8x64xf32>
    %37 = arith.mulf %32, %36 : vector<2x4x8x64xf32>
    %38 = arith.addf %29, %37 : vector<2x4x8x64xf32>
    %39 = vector.extract_strided_slice %20 {offsets = [0, 0, 0, 57], sizes = [2, 4, 8, 7], strides = [1, 1, 1, 1]} : vector<2x4x8x64xf32> to vector<2x4x8x7xf32>
    %40 = vector.extract_strided_slice %20 {offsets = [0, 0, 0, 0], sizes = [2, 4, 8, 57], strides = [1, 1, 1, 1]} : vector<2x4x8x64xf32> to vector<2x4x8x57xf32>
    %41 = tpu.concatenate %39, %40 in 3 : vector<2x4x8x7xf32>, vector<2x4x8x57xf32> -> vector<2x4x8x64xf32>
    %42 = vector.extract_strided_slice %2 {offsets = [2, 0, 0], sizes = [1, 8, 64], strides = [1, 1, 1]} : vector<27x8x64xf32> to vector<1x8x64xf32>
    %43 = vector.shape_cast %42 : vector<1x8x64xf32> to vector<8x64xf32>
    %44 = vector.shape_cast %43 : vector<8x64xf32> to vector<1x1x8x64xf32>
    %45 = vector.broadcast %44 : vector<1x1x8x64xf32> to vector<2x4x8x64xf32>
    %46 = arith.mulf %41, %45 : vector<2x4x8x64xf32>
    %47 = arith.addf %38, %46 : vector<2x4x8x64xf32>
    %48 = vector.extract_strided_slice %20 {offsets = [0, 0, 0, 63], sizes = [2, 4, 8, 1], strides = [1, 1, 1, 1]} : vector<2x4x8x64xf32> to vector<2x4x8x1xf32>
    %49 = vector.extract_strided_slice %20 {offsets = [0, 0, 0, 0], sizes = [2, 4, 8, 63], strides = [1, 1, 1, 1]} : vector<2x4x8x64xf32> to vector<2x4x8x63xf32>
    %50 = tpu.concatenate %48, %49 in 3 : vector<2x4x8x1xf32>, vector<2x4x8x63xf32> -> vector<2x4x8x64xf32>
    %51 = vector.extract_strided_slice %2 {offsets = [3, 0, 0], sizes = [1, 8, 64], strides = [1, 1, 1]} : vector<27x8x64xf32> to vector<1x8x64xf32>
    %52 = vector.shape_cast %51 : vector<1x8x64xf32> to vector<8x64xf32>
    %53 = vector.shape_cast %52 : vector<8x64xf32> to vector<1x1x8x64xf32>
    %54 = vector.broadcast %53 : vector<1x1x8x64xf32> to vector<2x4x8x64xf32>
    %55 = arith.mulf %50, %54 : vector<2x4x8x64xf32>
    %56 = arith.addf %47, %55 : vector<2x4x8x64xf32>
    %57 = vector.extract_strided_slice %2 {offsets = [4, 0, 0], sizes = [1, 8, 64], strides = [1, 1, 1]} : vector<27x8x64xf32> to vector<1x8x64xf32>
    %58 = vector.shape_cast %57 : vector<1x8x64xf32> to vector<8x64xf32>
    %59 = vector.shape_cast %58 : vector<8x64xf32> to vector<1x1x8x64xf32>
    %60 = vector.broadcast %59 : vector<1x1x8x64xf32> to vector<2x4x8x64xf32>
    %61 = arith.mulf %20, %60 : vector<2x4x8x64xf32>
    %62 = arith.addf %56, %61 : vector<2x4x8x64xf32>
    %63 = vector.extract_strided_slice %20 {offsets = [0, 0, 0, 1], sizes = [2, 4, 8, 63], strides = [1, 1, 1, 1]} : vector<2x4x8x64xf32> to vector<2x4x8x63xf32>
    %64 = vector.extract_strided_slice %20 {offsets = [0, 0, 0, 0], sizes = [2, 4, 8, 1], strides = [1, 1, 1, 1]} : vector<2x4x8x64xf32> to vector<2x4x8x1xf32>
    %65 = tpu.concatenate %63, %64 in 3 : vector<2x4x8x63xf32>, vector<2x4x8x1xf32> -> vector<2x4x8x64xf32>
    %66 = vector.extract_strided_slice %2 {offsets = [5, 0, 0], sizes = [1, 8, 64], strides = [1, 1, 1]} : vector<27x8x64xf32> to vector<1x8x64xf32>
    %67 = vector.shape_cast %66 : vector<1x8x64xf32> to vector<8x64xf32>
    %68 = vector.shape_cast %67 : vector<8x64xf32> to vector<1x1x8x64xf32>
    %69 = vector.broadcast %68 : vector<1x1x8x64xf32> to vector<2x4x8x64xf32>
    %70 = arith.mulf %65, %69 : vector<2x4x8x64xf32>
    %71 = arith.addf %62, %70 : vector<2x4x8x64xf32>
    %72 = vector.extract_strided_slice %20 {offsets = [0, 0, 0, 7], sizes = [2, 4, 8, 57], strides = [1, 1, 1, 1]} : vector<2x4x8x64xf32> to vector<2x4x8x57xf32>
    %73 = vector.extract_strided_slice %20 {offsets = [0, 0, 0, 0], sizes = [2, 4, 8, 7], strides = [1, 1, 1, 1]} : vector<2x4x8x64xf32> to vector<2x4x8x7xf32>
    %74 = tpu.concatenate %72, %73 in 3 : vector<2x4x8x57xf32>, vector<2x4x8x7xf32> -> vector<2x4x8x64xf32>
    %75 = vector.extract_strided_slice %2 {offsets = [6, 0, 0], sizes = [1, 8, 64], strides = [1, 1, 1]} : vector<27x8x64xf32> to vector<1x8x64xf32>
    %76 = vector.shape_cast %75 : vector<1x8x64xf32> to vector<8x64xf32>
    %77 = vector.shape_cast %76 : vector<8x64xf32> to vector<1x1x8x64xf32>
    %78 = vector.broadcast %77 : vector<1x1x8x64xf32> to vector<2x4x8x64xf32>
    %79 = arith.mulf %74, %78 : vector<2x4x8x64xf32>
    %80 = arith.addf %71, %79 : vector<2x4x8x64xf32>
    %81 = vector.extract_strided_slice %20 {offsets = [0, 0, 0, 8], sizes = [2, 4, 8, 56], strides = [1, 1, 1, 1]} : vector<2x4x8x64xf32> to vector<2x4x8x56xf32>
    %82 = vector.extract_strided_slice %20 {offsets = [0, 0, 0, 0], sizes = [2, 4, 8, 8], strides = [1, 1, 1, 1]} : vector<2x4x8x64xf32> to vector<2x4x8x8xf32>
    %83 = tpu.concatenate %81, %82 in 3 : vector<2x4x8x56xf32>, vector<2x4x8x8xf32> -> vector<2x4x8x64xf32>
    %84 = vector.extract_strided_slice %2 {offsets = [7, 0, 0], sizes = [1, 8, 64], strides = [1, 1, 1]} : vector<27x8x64xf32> to vector<1x8x64xf32>
    %85 = vector.shape_cast %84 : vector<1x8x64xf32> to vector<8x64xf32>
    %86 = vector.shape_cast %85 : vector<8x64xf32> to vector<1x1x8x64xf32>
    %87 = vector.broadcast %86 : vector<1x1x8x64xf32> to vector<2x4x8x64xf32>
    %88 = arith.mulf %83, %87 : vector<2x4x8x64xf32>
    %89 = arith.addf %80, %88 : vector<2x4x8x64xf32>
    %90 = vector.extract_strided_slice %20 {offsets = [0, 0, 0, 9], sizes = [2, 4, 8, 55], strides = [1, 1, 1, 1]} : vector<2x4x8x64xf32> to vector<2x4x8x55xf32>
    %91 = vector.extract_strided_slice %20 {offsets = [0, 0, 0, 0], sizes = [2, 4, 8, 9], strides = [1, 1, 1, 1]} : vector<2x4x8x64xf32> to vector<2x4x8x9xf32>
    %92 = tpu.concatenate %90, %91 in 3 : vector<2x4x8x55xf32>, vector<2x4x8x9xf32> -> vector<2x4x8x64xf32>
    %93 = vector.extract_strided_slice %2 {offsets = [8, 0, 0], sizes = [1, 8, 64], strides = [1, 1, 1]} : vector<27x8x64xf32> to vector<1x8x64xf32>
    %94 = vector.shape_cast %93 : vector<1x8x64xf32> to vector<8x64xf32>
    %95 = vector.shape_cast %94 : vector<8x64xf32> to vector<1x1x8x64xf32>
    %96 = vector.broadcast %95 : vector<1x1x8x64xf32> to vector<2x4x8x64xf32>
    %97 = arith.mulf %92, %96 : vector<2x4x8x64xf32>
    %98 = arith.addf %89, %97 : vector<2x4x8x64xf32>
    %99 = vector.extract_strided_slice %16 {offsets = [0, 0, 0, 55], sizes = [2, 4, 8, 9], strides = [1, 1, 1, 1]} : vector<2x4x8x64xf32> to vector<2x4x8x9xf32>
    %100 = vector.extract_strided_slice %16 {offsets = [0, 0, 0, 0], sizes = [2, 4, 8, 55], strides = [1, 1, 1, 1]} : vector<2x4x8x64xf32> to vector<2x4x8x55xf32>
    %101 = tpu.concatenate %99, %100 in 3 : vector<2x4x8x9xf32>, vector<2x4x8x55xf32> -> vector<2x4x8x64xf32>
    %102 = vector.extract_strided_slice %2 {offsets = [9, 0, 0], sizes = [1, 8, 64], strides = [1, 1, 1]} : vector<27x8x64xf32> to vector<1x8x64xf32>
    %103 = vector.shape_cast %102 : vector<1x8x64xf32> to vector<8x64xf32>
    %104 = vector.shape_cast %103 : vector<8x64xf32> to vector<1x1x8x64xf32>
    %105 = vector.broadcast %104 : vector<1x1x8x64xf32> to vector<2x4x8x64xf32>
    %106 = arith.mulf %101, %105 : vector<2x4x8x64xf32>
    %107 = arith.addf %98, %106 : vector<2x4x8x64xf32>
    %108 = vector.extract_strided_slice %16 {offsets = [0, 0, 0, 56], sizes = [2, 4, 8, 8], strides = [1, 1, 1, 1]} : vector<2x4x8x64xf32> to vector<2x4x8x8xf32>
    %109 = vector.extract_strided_slice %16 {offsets = [0, 0, 0, 0], sizes = [2, 4, 8, 56], strides = [1, 1, 1, 1]} : vector<2x4x8x64xf32> to vector<2x4x8x56xf32>
    %110 = tpu.concatenate %108, %109 in 3 : vector<2x4x8x8xf32>, vector<2x4x8x56xf32> -> vector<2x4x8x64xf32>
    %111 = vector.extract_strided_slice %2 {offsets = [10, 0, 0], sizes = [1, 8, 64], strides = [1, 1, 1]} : vector<27x8x64xf32> to vector<1x8x64xf32>
    %112 = vector.shape_cast %111 : vector<1x8x64xf32> to vector<8x64xf32>
    %113 = vector.shape_cast %112 : vector<8x64xf32> to vector<1x1x8x64xf32>
    %114 = vector.broadcast %113 : vector<1x1x8x64xf32> to vector<2x4x8x64xf32>
    %115 = arith.mulf %110, %114 : vector<2x4x8x64xf32>
    %116 = arith.addf %107, %115 : vector<2x4x8x64xf32>
    %117 = vector.extract_strided_slice %16 {offsets = [0, 0, 0, 57], sizes = [2, 4, 8, 7], strides = [1, 1, 1, 1]} : vector<2x4x8x64xf32> to vector<2x4x8x7xf32>
    %118 = vector.extract_strided_slice %16 {offsets = [0, 0, 0, 0], sizes = [2, 4, 8, 57], strides = [1, 1, 1, 1]} : vector<2x4x8x64xf32> to vector<2x4x8x57xf32>
    %119 = tpu.concatenate %117, %118 in 3 : vector<2x4x8x7xf32>, vector<2x4x8x57xf32> -> vector<2x4x8x64xf32>
    %120 = vector.extract_strided_slice %2 {offsets = [11, 0, 0], sizes = [1, 8, 64], strides = [1, 1, 1]} : vector<27x8x64xf32> to vector<1x8x64xf32>
    %121 = vector.shape_cast %120 : vector<1x8x64xf32> to vector<8x64xf32>
    %122 = vector.shape_cast %121 : vector<8x64xf32> to vector<1x1x8x64xf32>
    %123 = vector.broadcast %122 : vector<1x1x8x64xf32> to vector<2x4x8x64xf32>
    %124 = arith.mulf %119, %123 : vector<2x4x8x64xf32>
    %125 = arith.addf %116, %124 : vector<2x4x8x64xf32>
    %126 = vector.extract_strided_slice %16 {offsets = [0, 0, 0, 63], sizes = [2, 4, 8, 1], strides = [1, 1, 1, 1]} : vector<2x4x8x64xf32> to vector<2x4x8x1xf32>
    %127 = vector.extract_strided_slice %16 {offsets = [0, 0, 0, 0], sizes = [2, 4, 8, 63], strides = [1, 1, 1, 1]} : vector<2x4x8x64xf32> to vector<2x4x8x63xf32>
    %128 = tpu.concatenate %126, %127 in 3 : vector<2x4x8x1xf32>, vector<2x4x8x63xf32> -> vector<2x4x8x64xf32>
    %129 = vector.extract_strided_slice %2 {offsets = [12, 0, 0], sizes = [1, 8, 64], strides = [1, 1, 1]} : vector<27x8x64xf32> to vector<1x8x64xf32>
    %130 = vector.shape_cast %129 : vector<1x8x64xf32> to vector<8x64xf32>
    %131 = vector.shape_cast %130 : vector<8x64xf32> to vector<1x1x8x64xf32>
    %132 = vector.broadcast %131 : vector<1x1x8x64xf32> to vector<2x4x8x64xf32>
    %133 = arith.mulf %128, %132 : vector<2x4x8x64xf32>
    %134 = arith.addf %125, %133 : vector<2x4x8x64xf32>
    %135 = vector.extract_strided_slice %2 {offsets = [13, 0, 0], sizes = [1, 8, 64], strides = [1, 1, 1]} : vector<27x8x64xf32> to vector<1x8x64xf32>
    %136 = vector.shape_cast %135 : vector<1x8x64xf32> to vector<8x64xf32>
    %137 = vector.shape_cast %136 : vector<8x64xf32> to vector<1x1x8x64xf32>
    %138 = vector.broadcast %137 : vector<1x1x8x64xf32> to vector<2x4x8x64xf32>
    %139 = arith.mulf %16, %138 : vector<2x4x8x64xf32>
    %140 = arith.addf %134, %139 : vector<2x4x8x64xf32>
    %141 = vector.extract_strided_slice %16 {offsets = [0, 0, 0, 1], sizes = [2, 4, 8, 63], strides = [1, 1, 1, 1]} : vector<2x4x8x64xf32> to vector<2x4x8x63xf32>
    %142 = vector.extract_strided_slice %16 {offsets = [0, 0, 0, 0], sizes = [2, 4, 8, 1], strides = [1, 1, 1, 1]} : vector<2x4x8x64xf32> to vector<2x4x8x1xf32>
    %143 = tpu.concatenate %141, %142 in 3 : vector<2x4x8x63xf32>, vector<2x4x8x1xf32> -> vector<2x4x8x64xf32>
    %144 = vector.extract_strided_slice %2 {offsets = [14, 0, 0], sizes = [1, 8, 64], strides = [1, 1, 1]} : vector<27x8x64xf32> to vector<1x8x64xf32>
    %145 = vector.shape_cast %144 : vector<1x8x64xf32> to vector<8x64xf32>
    %146 = vector.shape_cast %145 : vector<8x64xf32> to vector<1x1x8x64xf32>
    %147 = vector.broadcast %146 : vector<1x1x8x64xf32> to vector<2x4x8x64xf32>
    %148 = arith.mulf %143, %147 : vector<2x4x8x64xf32>
    %149 = arith.addf %140, %148 : vector<2x4x8x64xf32>
    %150 = vector.extract_strided_slice %16 {offsets = [0, 0, 0, 7], sizes = [2, 4, 8, 57], strides = [1, 1, 1, 1]} : vector<2x4x8x64xf32> to vector<2x4x8x57xf32>
    %151 = vector.extract_strided_slice %16 {offsets = [0, 0, 0, 0], sizes = [2, 4, 8, 7], strides = [1, 1, 1, 1]} : vector<2x4x8x64xf32> to vector<2x4x8x7xf32>
    %152 = tpu.concatenate %150, %151 in 3 : vector<2x4x8x57xf32>, vector<2x4x8x7xf32> -> vector<2x4x8x64xf32>
    %153 = vector.extract_strided_slice %2 {offsets = [15, 0, 0], sizes = [1, 8, 64], strides = [1, 1, 1]} : vector<27x8x64xf32> to vector<1x8x64xf32>
    %154 = vector.shape_cast %153 : vector<1x8x64xf32> to vector<8x64xf32>
    %155 = vector.shape_cast %154 : vector<8x64xf32> to vector<1x1x8x64xf32>
    %156 = vector.broadcast %155 : vector<1x1x8x64xf32> to vector<2x4x8x64xf32>
    %157 = arith.mulf %152, %156 : vector<2x4x8x64xf32>
    %158 = arith.addf %149, %157 : vector<2x4x8x64xf32>
    %159 = vector.extract_strided_slice %16 {offsets = [0, 0, 0, 8], sizes = [2, 4, 8, 56], strides = [1, 1, 1, 1]} : vector<2x4x8x64xf32> to vector<2x4x8x56xf32>
    %160 = vector.extract_strided_slice %16 {offsets = [0, 0, 0, 0], sizes = [2, 4, 8, 8], strides = [1, 1, 1, 1]} : vector<2x4x8x64xf32> to vector<2x4x8x8xf32>
    %161 = tpu.concatenate %159, %160 in 3 : vector<2x4x8x56xf32>, vector<2x4x8x8xf32> -> vector<2x4x8x64xf32>
    %162 = vector.extract_strided_slice %2 {offsets = [16, 0, 0], sizes = [1, 8, 64], strides = [1, 1, 1]} : vector<27x8x64xf32> to vector<1x8x64xf32>
    %163 = vector.shape_cast %162 : vector<1x8x64xf32> to vector<8x64xf32>
    %164 = vector.shape_cast %163 : vector<8x64xf32> to vector<1x1x8x64xf32>
    %165 = vector.broadcast %164 : vector<1x1x8x64xf32> to vector<2x4x8x64xf32>
    %166 = arith.mulf %161, %165 : vector<2x4x8x64xf32>
    %167 = arith.addf %158, %166 : vector<2x4x8x64xf32>
    %168 = vector.extract_strided_slice %16 {offsets = [0, 0, 0, 9], sizes = [2, 4, 8, 55], strides = [1, 1, 1, 1]} : vector<2x4x8x64xf32> to vector<2x4x8x55xf32>
    %169 = vector.extract_strided_slice %16 {offsets = [0, 0, 0, 0], sizes = [2, 4, 8, 9], strides = [1, 1, 1, 1]} : vector<2x4x8x64xf32> to vector<2x4x8x9xf32>
    %170 = tpu.concatenate %168, %169 in 3 : vector<2x4x8x55xf32>, vector<2x4x8x9xf32> -> vector<2x4x8x64xf32>
    %171 = vector.extract_strided_slice %2 {offsets = [17, 0, 0], sizes = [1, 8, 64], strides = [1, 1, 1]} : vector<27x8x64xf32> to vector<1x8x64xf32>
    %172 = vector.shape_cast %171 : vector<1x8x64xf32> to vector<8x64xf32>
    %173 = vector.shape_cast %172 : vector<8x64xf32> to vector<1x1x8x64xf32>
    %174 = vector.broadcast %173 : vector<1x1x8x64xf32> to vector<2x4x8x64xf32>
    %175 = arith.mulf %170, %174 : vector<2x4x8x64xf32>
    %176 = arith.addf %167, %175 : vector<2x4x8x64xf32>
    %cst_13 = arith.constant 0.000000e+00 : f32
    %177 = vector.broadcast %cst_13 : f32 to vector<2x1x8x64xf32>
    %178 = vector.extract_strided_slice %16 {offsets = [0, 1, 0, 0], sizes = [2, 3, 8, 64], strides = [1, 1, 1, 1]} : vector<2x4x8x64xf32> to vector<2x3x8x64xf32>
    %179 = tpu.concatenate %178, %177 in 1 : vector<2x3x8x64xf32>, vector<2x1x8x64xf32> -> vector<2x4x8x64xf32>
    %180 = vector.extract_strided_slice %179 {offsets = [0, 0, 0, 55], sizes = [2, 4, 8, 9], strides = [1, 1, 1, 1]} : vector<2x4x8x64xf32> to vector<2x4x8x9xf32>
    %181 = vector.extract_strided_slice %179 {offsets = [0, 0, 0, 0], sizes = [2, 4, 8, 55], strides = [1, 1, 1, 1]} : vector<2x4x8x64xf32> to vector<2x4x8x55xf32>
    %182 = tpu.concatenate %180, %181 in 3 : vector<2x4x8x9xf32>, vector<2x4x8x55xf32> -> vector<2x4x8x64xf32>
    %183 = vector.extract_strided_slice %2 {offsets = [18, 0, 0], sizes = [1, 8, 64], strides = [1, 1, 1]} : vector<27x8x64xf32> to vector<1x8x64xf32>
    %184 = vector.shape_cast %183 : vector<1x8x64xf32> to vector<8x64xf32>
    %185 = vector.shape_cast %184 : vector<8x64xf32> to vector<1x1x8x64xf32>
    %186 = vector.broadcast %185 : vector<1x1x8x64xf32> to vector<2x4x8x64xf32>
    %187 = arith.mulf %182, %186 : vector<2x4x8x64xf32>
    %188 = arith.addf %176, %187 : vector<2x4x8x64xf32>
    %189 = vector.extract_strided_slice %179 {offsets = [0, 0, 0, 56], sizes = [2, 4, 8, 8], strides = [1, 1, 1, 1]} : vector<2x4x8x64xf32> to vector<2x4x8x8xf32>
    %190 = vector.extract_strided_slice %179 {offsets = [0, 0, 0, 0], sizes = [2, 4, 8, 56], strides = [1, 1, 1, 1]} : vector<2x4x8x64xf32> to vector<2x4x8x56xf32>
    %191 = tpu.concatenate %189, %190 in 3 : vector<2x4x8x8xf32>, vector<2x4x8x56xf32> -> vector<2x4x8x64xf32>
    %192 = vector.extract_strided_slice %2 {offsets = [19, 0, 0], sizes = [1, 8, 64], strides = [1, 1, 1]} : vector<27x8x64xf32> to vector<1x8x64xf32>
    %193 = vector.shape_cast %192 : vector<1x8x64xf32> to vector<8x64xf32>
    %194 = vector.shape_cast %193 : vector<8x64xf32> to vector<1x1x8x64xf32>
    %195 = vector.broadcast %194 : vector<1x1x8x64xf32> to vector<2x4x8x64xf32>
    %196 = arith.mulf %191, %195 : vector<2x4x8x64xf32>
    %197 = arith.addf %188, %196 : vector<2x4x8x64xf32>
    %198 = vector.extract_strided_slice %179 {offsets = [0, 0, 0, 57], sizes = [2, 4, 8, 7], strides = [1, 1, 1, 1]} : vector<2x4x8x64xf32> to vector<2x4x8x7xf32>
    %199 = vector.extract_strided_slice %179 {offsets = [0, 0, 0, 0], sizes = [2, 4, 8, 57], strides = [1, 1, 1, 1]} : vector<2x4x8x64xf32> to vector<2x4x8x57xf32>
    %200 = tpu.concatenate %198, %199 in 3 : vector<2x4x8x7xf32>, vector<2x4x8x57xf32> -> vector<2x4x8x64xf32>
    %201 = vector.extract_strided_slice %2 {offsets = [20, 0, 0], sizes = [1, 8, 64], strides = [1, 1, 1]} : vector<27x8x64xf32> to vector<1x8x64xf32>
    %202 = vector.shape_cast %201 : vector<1x8x64xf32> to vector<8x64xf32>
    %203 = vector.shape_cast %202 : vector<8x64xf32> to vector<1x1x8x64xf32>
    %204 = vector.broadcast %203 : vector<1x1x8x64xf32> to vector<2x4x8x64xf32>
    %205 = arith.mulf %200, %204 : vector<2x4x8x64xf32>
    %206 = arith.addf %197, %205 : vector<2x4x8x64xf32>
    %207 = vector.extract_strided_slice %179 {offsets = [0, 0, 0, 63], sizes = [2, 4, 8, 1], strides = [1, 1, 1, 1]} : vector<2x4x8x64xf32> to vector<2x4x8x1xf32>
    %208 = vector.extract_strided_slice %179 {offsets = [0, 0, 0, 0], sizes = [2, 4, 8, 63], strides = [1, 1, 1, 1]} : vector<2x4x8x64xf32> to vector<2x4x8x63xf32>
    %209 = tpu.concatenate %207, %208 in 3 : vector<2x4x8x1xf32>, vector<2x4x8x63xf32> -> vector<2x4x8x64xf32>
    %210 = vector.extract_strided_slice %2 {offsets = [21, 0, 0], sizes = [1, 8, 64], strides = [1, 1, 1]} : vector<27x8x64xf32> to vector<1x8x64xf32>
    %211 = vector.shape_cast %210 : vector<1x8x64xf32> to vector<8x64xf32>
    %212 = vector.shape_cast %211 : vector<8x64xf32> to vector<1x1x8x64xf32>
    %213 = vector.broadcast %212 : vector<1x1x8x64xf32> to vector<2x4x8x64xf32>
    %214 = arith.mulf %209, %213 : vector<2x4x8x64xf32>
    %215 = arith.addf %206, %214 : vector<2x4x8x64xf32>
    %216 = vector.extract_strided_slice %2 {offsets = [22, 0, 0], sizes = [1, 8, 64], strides = [1, 1, 1]} : vector<27x8x64xf32> to vector<1x8x64xf32>
    %217 = vector.shape_cast %216 : vector<1x8x64xf32> to vector<8x64xf32>
    %218 = vector.shape_cast %217 : vector<8x64xf32> to vector<1x1x8x64xf32>
    %219 = vector.broadcast %218 : vector<1x1x8x64xf32> to vector<2x4x8x64xf32>
    %220 = arith.mulf %179, %219 : vector<2x4x8x64xf32>
    %221 = arith.addf %215, %220 : vector<2x4x8x64xf32>
    %222 = vector.extract_strided_slice %179 {offsets = [0, 0, 0, 1], sizes = [2, 4, 8, 63], strides = [1, 1, 1, 1]} : vector<2x4x8x64xf32> to vector<2x4x8x63xf32>
    %223 = vector.extract_strided_slice %179 {offsets = [0, 0, 0, 0], sizes = [2, 4, 8, 1], strides = [1, 1, 1, 1]} : vector<2x4x8x64xf32> to vector<2x4x8x1xf32>
    %224 = tpu.concatenate %222, %223 in 3 : vector<2x4x8x63xf32>, vector<2x4x8x1xf32> -> vector<2x4x8x64xf32>
    %225 = vector.extract_strided_slice %2 {offsets = [23, 0, 0], sizes = [1, 8, 64], strides = [1, 1, 1]} : vector<27x8x64xf32> to vector<1x8x64xf32>
    %226 = vector.shape_cast %225 : vector<1x8x64xf32> to vector<8x64xf32>
    %227 = vector.shape_cast %226 : vector<8x64xf32> to vector<1x1x8x64xf32>
    %228 = vector.broadcast %227 : vector<1x1x8x64xf32> to vector<2x4x8x64xf32>
    %229 = arith.mulf %224, %228 : vector<2x4x8x64xf32>
    %230 = arith.addf %221, %229 : vector<2x4x8x64xf32>
    %231 = vector.extract_strided_slice %179 {offsets = [0, 0, 0, 7], sizes = [2, 4, 8, 57], strides = [1, 1, 1, 1]} : vector<2x4x8x64xf32> to vector<2x4x8x57xf32>
    %232 = vector.extract_strided_slice %179 {offsets = [0, 0, 0, 0], sizes = [2, 4, 8, 7], strides = [1, 1, 1, 1]} : vector<2x4x8x64xf32> to vector<2x4x8x7xf32>
    %233 = tpu.concatenate %231, %232 in 3 : vector<2x4x8x57xf32>, vector<2x4x8x7xf32> -> vector<2x4x8x64xf32>
    %234 = vector.extract_strided_slice %2 {offsets = [24, 0, 0], sizes = [1, 8, 64], strides = [1, 1, 1]} : vector<27x8x64xf32> to vector<1x8x64xf32>
    %235 = vector.shape_cast %234 : vector<1x8x64xf32> to vector<8x64xf32>
    %236 = vector.shape_cast %235 : vector<8x64xf32> to vector<1x1x8x64xf32>
    %237 = vector.broadcast %236 : vector<1x1x8x64xf32> to vector<2x4x8x64xf32>
    %238 = arith.mulf %233, %237 : vector<2x4x8x64xf32>
    %239 = arith.addf %230, %238 : vector<2x4x8x64xf32>
    %240 = vector.extract_strided_slice %179 {offsets = [0, 0, 0, 8], sizes = [2, 4, 8, 56], strides = [1, 1, 1, 1]} : vector<2x4x8x64xf32> to vector<2x4x8x56xf32>
    %241 = vector.extract_strided_slice %179 {offsets = [0, 0, 0, 0], sizes = [2, 4, 8, 8], strides = [1, 1, 1, 1]} : vector<2x4x8x64xf32> to vector<2x4x8x8xf32>
    %242 = tpu.concatenate %240, %241 in 3 : vector<2x4x8x56xf32>, vector<2x4x8x8xf32> -> vector<2x4x8x64xf32>
    %243 = vector.extract_strided_slice %2 {offsets = [25, 0, 0], sizes = [1, 8, 64], strides = [1, 1, 1]} : vector<27x8x64xf32> to vector<1x8x64xf32>
    %244 = vector.shape_cast %243 : vector<1x8x64xf32> to vector<8x64xf32>
    %245 = vector.shape_cast %244 : vector<8x64xf32> to vector<1x1x8x64xf32>
    %246 = vector.broadcast %245 : vector<1x1x8x64xf32> to vector<2x4x8x64xf32>
    %247 = arith.mulf %242, %246 : vector<2x4x8x64xf32>
    %248 = arith.addf %239, %247 : vector<2x4x8x64xf32>
    %249 = vector.extract_strided_slice %179 {offsets = [0, 0, 0, 9], sizes = [2, 4, 8, 55], strides = [1, 1, 1, 1]} : vector<2x4x8x64xf32> to vector<2x4x8x55xf32>
    %250 = vector.extract_strided_slice %179 {offsets = [0, 0, 0, 0], sizes = [2, 4, 8, 9], strides = [1, 1, 1, 1]} : vector<2x4x8x64xf32> to vector<2x4x8x9xf32>
    %251 = tpu.concatenate %249, %250 in 3 : vector<2x4x8x55xf32>, vector<2x4x8x9xf32> -> vector<2x4x8x64xf32>
    %252 = vector.extract_strided_slice %2 {offsets = [26, 0, 0], sizes = [1, 8, 64], strides = [1, 1, 1]} : vector<27x8x64xf32> to vector<1x8x64xf32>
    %253 = vector.shape_cast %252 : vector<1x8x64xf32> to vector<8x64xf32>
    %254 = vector.shape_cast %253 : vector<8x64xf32> to vector<1x1x8x64xf32>
    %255 = vector.broadcast %254 : vector<1x1x8x64xf32> to vector<2x4x8x64xf32>
    %256 = arith.mulf %251, %255 : vector<2x4x8x64xf32>
    %257 = arith.addf %248, %256 : vector<2x4x8x64xf32>
    %258 = vector.extract_strided_slice %1 {offsets = [2, 0, 0], sizes = [1, 8, 64], strides = [1, 1, 1]} : vector<3x8x64xf32> to vector<1x8x64xf32>
    %259 = vector.shape_cast %258 : vector<1x8x64xf32> to vector<8x64xf32>
    %260 = vector.shape_cast %259 : vector<8x64xf32> to vector<1x1x8x64xf32>
    %261 = vector.broadcast %260 : vector<1x1x8x64xf32> to vector<2x4x8x64xf32>
    %262 = arith.addf %257, %261 : vector<2x4x8x64xf32>
    %263 = vector.extract_strided_slice %262 {offsets = [0, 0, 0, 0], sizes = [2, 4, 4, 64], strides = [1, 1, 1, 1]} : vector<2x4x8x64xf32> to vector<2x4x4x64xf32>
    %cst_14 = arith.constant dense<0.000000e+00> : vector<2x4x64xf32>
    %264 = vector.multi_reduction <add>, %263, %cst_14 [2] : vector<2x4x4x64xf32> to vector<2x4x64xf32>
    %265 = vector.shape_cast %264 : vector<2x4x64xf32> to vector<2x4x1x64xf32>
    %266 = math.tanh %265 : vector<2x4x1x64xf32>
    %267 = vector.extract_strided_slice %262 {offsets = [0, 0, 4, 0], sizes = [2, 4, 4, 64], strides = [1, 1, 1, 1]} : vector<2x4x8x64xf32> to vector<2x4x4x64xf32>
    %cst_15 = arith.constant dense<0.000000e+00> : vector<2x4x64xf32>
    %268 = vector.multi_reduction <add>, %267, %cst_15 [2] : vector<2x4x4x64xf32> to vector<2x4x64xf32>
    %269 = vector.shape_cast %268 : vector<2x4x64xf32> to vector<2x4x1x64xf32>
    %270 = math.tanh %269 : vector<2x4x1x64xf32>
    %271 = vector.extract_strided_slice %4 {offsets = [0, 0, 0, 0], sizes = [2, 4, 4, 64], strides = [1, 1, 1, 1]} : vector<2x4x8x64xf32> to vector<2x4x4x64xf32>
    %272 = vector.extract_strided_slice %4 {offsets = [0, 0, 4, 0], sizes = [2, 4, 4, 64], strides = [1, 1, 1, 1]} : vector<2x4x8x64xf32> to vector<2x4x4x64xf32>
    %273 = vector.broadcast %266 : vector<2x4x1x64xf32> to vector<2x4x4x64xf32>
    %274 = arith.mulf %273, %271 : vector<2x4x4x64xf32>
    %275 = vector.broadcast %270 : vector<2x4x1x64xf32> to vector<2x4x4x64xf32>
    %276 = arith.mulf %275, %272 : vector<2x4x4x64xf32>
    %cst_16 = arith.constant 0.000000e+00 : f32
    %277 = vector.broadcast %cst_16 : f32 to vector<2x1x4x64xf32>
    %278 = vector.extract_strided_slice %274 {offsets = [0, 1, 0, 0], sizes = [2, 3, 4, 64], strides = [1, 1, 1, 1]} : vector<2x4x4x64xf32> to vector<2x3x4x64xf32>
    %279 = tpu.concatenate %278, %277 in 1 : vector<2x3x4x64xf32>, vector<2x1x4x64xf32> -> vector<2x4x4x64xf32>
    %280 = arith.subf %271, %274 : vector<2x4x4x64xf32>
    %281 = arith.addf %279, %280 : vector<2x4x4x64xf32>
    %cst_17 = arith.constant 0.000000e+00 : f32
    %282 = vector.broadcast %cst_17 : f32 to vector<2x1x4x64xf32>
    %283 = vector.extract_strided_slice %276 {offsets = [0, 0, 0, 0], sizes = [2, 3, 4, 64], strides = [1, 1, 1, 1]} : vector<2x4x4x64xf32> to vector<2x3x4x64xf32>
    %284 = tpu.concatenate %282, %283 in 1 : vector<2x1x4x64xf32>, vector<2x3x4x64xf32> -> vector<2x4x4x64xf32>
    %285 = arith.subf %272, %276 : vector<2x4x4x64xf32>
    %286 = arith.addf %284, %285 : vector<2x4x4x64xf32>
    %cst_18 = arith.constant 1.000000e+00 : f32
    %287 = vector.broadcast %cst_18 : f32 to vector<2x4x1x64xf32>
    %288 = vector.extract_strided_slice %0 {offsets = [0, 0, 8, 0], sizes = [2, 4, 24, 64], strides = [1, 1, 1, 1]} : vector<2x4x32x64xf32> to vector<2x4x24x64xf32>
    %289 = tpu.concatenate %281, %286, %288, %287 in 2 : vector<2x4x4x64xf32>, vector<2x4x4x64xf32>, vector<2x4x24x64xf32>, vector<2x4x1x64xf32> -> vector<2x4x33x64xf32>
    %290 = vector.extract_strided_slice %289 {offsets = [0, 0, 0, 0], sizes = [1, 1, 33, 64], strides = [1, 1, 1, 1]} : vector<2x4x33x64xf32> to vector<1x1x33x64xf32>
    %291 = vector.shape_cast %290 : vector<1x1x33x64xf32> to vector<33x64xf32>
    %cst_19 = arith.constant dense<0.000000e+00> : vector<32x64xf32>
    %292 = tpu.matmul %3, %291, %cst_19 {dimension_numbers = #tpu.dot_dimension_numbers<[1], [0], [0], [1], [0, 0, 1, 1], [], []>} : vector<32x33xf32>, vector<33x64xf32>, vector<32x64xf32> -> vector<32x64xf32>
    %c0_20 = arith.constant 0 : index
    %c0_21 = arith.constant 0 : index
    %c0_22 = arith.constant 0 : index
    %c0_23 = arith.constant 0 : index
    %293 = vector.load %arg5[%c0_20, %c0_21, %c0_22, %c0_23] : memref<2x4x32x64xf32, #tpu.memory_space<vmem>>, vector<1x1x32x64xf32>
    %294 = vector.shape_cast %293 : vector<1x1x32x64xf32> to vector<32x64xf32>
    %295 = vector.shape_cast %292 : vector<32x64xf32> to vector<1x1x32x64xf32>
    tpu.vector_store %arg5[%c0_20, %c0_21, %c0_22, %c0_23], %295 {strides = array<i32>} : memref<2x4x32x64xf32, #tpu.memory_space<vmem>>, vector<1x1x32x64xf32>,
    %296 = vector.extract_strided_slice %289 {offsets = [0, 1, 0, 0], sizes = [1, 1, 33, 64], strides = [1, 1, 1, 1]} : vector<2x4x33x64xf32> to vector<1x1x33x64xf32>
    %297 = vector.shape_cast %296 : vector<1x1x33x64xf32> to vector<33x64xf32>
    %cst_24 = arith.constant dense<0.000000e+00> : vector<32x64xf32>
    %298 = tpu.matmul %3, %297, %cst_24 {dimension_numbers = #tpu.dot_dimension_numbers<[1], [0], [0], [1], [0, 0, 1, 1], [], []>} : vector<32x33xf32>, vector<33x64xf32>, vector<32x64xf32> -> vector<32x64xf32>
    %c0_25 = arith.constant 0 : index
    %c1 = arith.constant 1 : index
    %c0_26 = arith.constant 0 : index
    %c0_27 = arith.constant 0 : index
    %299 = vector.load %arg5[%c0_25, %c1, %c0_26, %c0_27] : memref<2x4x32x64xf32, #tpu.memory_space<vmem>>, vector<1x1x32x64xf32>
    %300 = vector.shape_cast %299 : vector<1x1x32x64xf32> to vector<32x64xf32>
    %301 = vector.shape_cast %298 : vector<32x64xf32> to vector<1x1x32x64xf32>
    tpu.vector_store %arg5[%c0_25, %c1, %c0_26, %c0_27], %301 {strides = array<i32>} : memref<2x4x32x64xf32, #tpu.memory_space<vmem>>, vector<1x1x32x64xf32>,
    %302 = vector.extract_strided_slice %289 {offsets = [0, 2, 0, 0], sizes = [1, 1, 33, 64], strides = [1, 1, 1, 1]} : vector<2x4x33x64xf32> to vector<1x1x33x64xf32>
    %303 = vector.shape_cast %302 : vector<1x1x33x64xf32> to vector<33x64xf32>
    %cst_28 = arith.constant dense<0.000000e+00> : vector<32x64xf32>
    %304 = tpu.matmul %3, %303, %cst_28 {dimension_numbers = #tpu.dot_dimension_numbers<[1], [0], [0], [1], [0, 0, 1, 1], [], []>} : vector<32x33xf32>, vector<33x64xf32>, vector<32x64xf32> -> vector<32x64xf32>
    %c0_29 = arith.constant 0 : index
    %c2 = arith.constant 2 : index
    %c0_30 = arith.constant 0 : index
    %c0_31 = arith.constant 0 : index
    %305 = vector.load %arg5[%c0_29, %c2, %c0_30, %c0_31] : memref<2x4x32x64xf32, #tpu.memory_space<vmem>>, vector<1x1x32x64xf32>
    %306 = vector.shape_cast %305 : vector<1x1x32x64xf32> to vector<32x64xf32>
    %307 = vector.shape_cast %304 : vector<32x64xf32> to vector<1x1x32x64xf32>
    tpu.vector_store %arg5[%c0_29, %c2, %c0_30, %c0_31], %307 {strides = array<i32>} : memref<2x4x32x64xf32, #tpu.memory_space<vmem>>, vector<1x1x32x64xf32>,
    %308 = vector.extract_strided_slice %289 {offsets = [0, 3, 0, 0], sizes = [1, 1, 33, 64], strides = [1, 1, 1, 1]} : vector<2x4x33x64xf32> to vector<1x1x33x64xf32>
    %309 = vector.shape_cast %308 : vector<1x1x33x64xf32> to vector<33x64xf32>
    %cst_32 = arith.constant dense<0.000000e+00> : vector<32x64xf32>
    %310 = tpu.matmul %3, %309, %cst_32 {dimension_numbers = #tpu.dot_dimension_numbers<[1], [0], [0], [1], [0, 0, 1, 1], [], []>} : vector<32x33xf32>, vector<33x64xf32>, vector<32x64xf32> -> vector<32x64xf32>
    %c0_33 = arith.constant 0 : index
    %c3 = arith.constant 3 : index
    %c0_34 = arith.constant 0 : index
    %c0_35 = arith.constant 0 : index
    %311 = vector.load %arg5[%c0_33, %c3, %c0_34, %c0_35] : memref<2x4x32x64xf32, #tpu.memory_space<vmem>>, vector<1x1x32x64xf32>
    %312 = vector.shape_cast %311 : vector<1x1x32x64xf32> to vector<32x64xf32>
    %313 = vector.shape_cast %310 : vector<32x64xf32> to vector<1x1x32x64xf32>
    tpu.vector_store %arg5[%c0_33, %c3, %c0_34, %c0_35], %313 {strides = array<i32>} : memref<2x4x32x64xf32, #tpu.memory_space<vmem>>, vector<1x1x32x64xf32>,
    %314 = vector.extract_strided_slice %289 {offsets = [1, 0, 0, 0], sizes = [1, 1, 33, 64], strides = [1, 1, 1, 1]} : vector<2x4x33x64xf32> to vector<1x1x33x64xf32>
    %315 = vector.shape_cast %314 : vector<1x1x33x64xf32> to vector<33x64xf32>
    %cst_36 = arith.constant dense<0.000000e+00> : vector<32x64xf32>
    %316 = tpu.matmul %3, %315, %cst_36 {dimension_numbers = #tpu.dot_dimension_numbers<[1], [0], [0], [1], [0, 0, 1, 1], [], []>} : vector<32x33xf32>, vector<33x64xf32>, vector<32x64xf32> -> vector<32x64xf32>
    %c1_37 = arith.constant 1 : index
    %c0_38 = arith.constant 0 : index
    %c0_39 = arith.constant 0 : index
    %c0_40 = arith.constant 0 : index
    %317 = vector.load %arg5[%c1_37, %c0_38, %c0_39, %c0_40] : memref<2x4x32x64xf32, #tpu.memory_space<vmem>>, vector<1x1x32x64xf32>
    %318 = vector.shape_cast %317 : vector<1x1x32x64xf32> to vector<32x64xf32>
    %319 = vector.shape_cast %316 : vector<32x64xf32> to vector<1x1x32x64xf32>
    tpu.vector_store %arg5[%c1_37, %c0_38, %c0_39, %c0_40], %319 {strides = array<i32>} : memref<2x4x32x64xf32, #tpu.memory_space<vmem>>, vector<1x1x32x64xf32>,
    %320 = vector.extract_strided_slice %289 {offsets = [1, 1, 0, 0], sizes = [1, 1, 33, 64], strides = [1, 1, 1, 1]} : vector<2x4x33x64xf32> to vector<1x1x33x64xf32>
    %321 = vector.shape_cast %320 : vector<1x1x33x64xf32> to vector<33x64xf32>
    %cst_41 = arith.constant dense<0.000000e+00> : vector<32x64xf32>
    %322 = tpu.matmul %3, %321, %cst_41 {dimension_numbers = #tpu.dot_dimension_numbers<[1], [0], [0], [1], [0, 0, 1, 1], [], []>} : vector<32x33xf32>, vector<33x64xf32>, vector<32x64xf32> -> vector<32x64xf32>
    %c1_42 = arith.constant 1 : index
    %c1_43 = arith.constant 1 : index
    %c0_44 = arith.constant 0 : index
    %c0_45 = arith.constant 0 : index
    %323 = vector.load %arg5[%c1_42, %c1_43, %c0_44, %c0_45] : memref<2x4x32x64xf32, #tpu.memory_space<vmem>>, vector<1x1x32x64xf32>
    %324 = vector.shape_cast %323 : vector<1x1x32x64xf32> to vector<32x64xf32>
    %325 = vector.shape_cast %322 : vector<32x64xf32> to vector<1x1x32x64xf32>
    tpu.vector_store %arg5[%c1_42, %c1_43, %c0_44, %c0_45], %325 {strides = array<i32>} : memref<2x4x32x64xf32, #tpu.memory_space<vmem>>, vector<1x1x32x64xf32>,
    %326 = vector.extract_strided_slice %289 {offsets = [1, 2, 0, 0], sizes = [1, 1, 33, 64], strides = [1, 1, 1, 1]} : vector<2x4x33x64xf32> to vector<1x1x33x64xf32>
    %327 = vector.shape_cast %326 : vector<1x1x33x64xf32> to vector<33x64xf32>
    %cst_46 = arith.constant dense<0.000000e+00> : vector<32x64xf32>
    %328 = tpu.matmul %3, %327, %cst_46 {dimension_numbers = #tpu.dot_dimension_numbers<[1], [0], [0], [1], [0, 0, 1, 1], [], []>} : vector<32x33xf32>, vector<33x64xf32>, vector<32x64xf32> -> vector<32x64xf32>
    %c1_47 = arith.constant 1 : index
    %c2_48 = arith.constant 2 : index
    %c0_49 = arith.constant 0 : index
    %c0_50 = arith.constant 0 : index
    %329 = vector.load %arg5[%c1_47, %c2_48, %c0_49, %c0_50] : memref<2x4x32x64xf32, #tpu.memory_space<vmem>>, vector<1x1x32x64xf32>
    %330 = vector.shape_cast %329 : vector<1x1x32x64xf32> to vector<32x64xf32>
    %331 = vector.shape_cast %328 : vector<32x64xf32> to vector<1x1x32x64xf32>
    tpu.vector_store %arg5[%c1_47, %c2_48, %c0_49, %c0_50], %331 {strides = array<i32>} : memref<2x4x32x64xf32, #tpu.memory_space<vmem>>, vector<1x1x32x64xf32>,
    %332 = vector.extract_strided_slice %289 {offsets = [1, 3, 0, 0], sizes = [1, 1, 33, 64], strides = [1, 1, 1, 1]} : vector<2x4x33x64xf32> to vector<1x1x33x64xf32>
    %333 = vector.shape_cast %332 : vector<1x1x33x64xf32> to vector<33x64xf32>
    %cst_51 = arith.constant dense<0.000000e+00> : vector<32x64xf32>
    %334 = tpu.matmul %3, %333, %cst_51 {dimension_numbers = #tpu.dot_dimension_numbers<[1], [0], [0], [1], [0, 0, 1, 1], [], []>} : vector<32x33xf32>, vector<33x64xf32>, vector<32x64xf32> -> vector<32x64xf32>
    %c1_52 = arith.constant 1 : index
    %c3_53 = arith.constant 3 : index
    %c0_54 = arith.constant 0 : index
    %c0_55 = arith.constant 0 : index
    %335 = vector.load %arg5[%c1_52, %c3_53, %c0_54, %c0_55] : memref<2x4x32x64xf32, #tpu.memory_space<vmem>>, vector<1x1x32x64xf32>
    %336 = vector.shape_cast %335 : vector<1x1x32x64xf32> to vector<32x64xf32>
    %337 = vector.shape_cast %334 : vector<32x64xf32> to vector<1x1x32x64xf32>
    tpu.vector_store %arg5[%c1_52, %c3_53, %c0_54, %c0_55], %337 {strides = array<i32>} : memref<2x4x32x64xf32, #tpu.memory_space<vmem>>, vector<1x1x32x64xf32>,
    return
  }
  func.func @transform_0(%arg0: i32) -> (i32, i32, i32, i32) {
    %c0_i32 = arith.constant 0 : i32
    %c0_i32_0 = arith.constant 0 : i32
    %c0_i32_1 = arith.constant 0 : i32
    %c0_i32_2 = arith.constant 0 : i32
    %c0_i32_3 = arith.constant 0 : i32
    return %c0_i32, %c0_i32_0, %c0_i32_1, %c0_i32_2 : i32, i32, i32, i32
  }
  func.func @transform_1(%arg0: i32) -> (i32, i32, i32) {
    %c0_i32 = arith.constant 0 : i32
    %c0_i32_0 = arith.constant 0 : i32
    %c0_i32_1 = arith.constant 0 : i32
    %c0_i32_2 = arith.constant 0 : i32
    return %c0_i32, %c0_i32_0, %c0_i32_1 : i32, i32, i32
  }
  func.func @transform_2(%arg0: i32) -> (i32, i32, i32) {
    %c0_i32 = arith.constant 0 : i32
    %c0_i32_0 = arith.constant 0 : i32
    %c0_i32_1 = arith.constant 0 : i32
    %c0_i32_2 = arith.constant 0 : i32
    return %c0_i32, %c0_i32_0, %c0_i32_1 : i32, i32, i32
  }
  func.func @transform_3(%arg0: i32) -> (i32, i32) {
    %c0_i32 = arith.constant 0 : i32
    %c0_i32_0 = arith.constant 0 : i32
    %c0_i32_1 = arith.constant 0 : i32
    return %c0_i32, %c0_i32_0 : i32, i32
  }
  func.func @transform_4(%arg0: i32) -> (i32, i32, i32, i32) {
    %c0_i32 = arith.constant 0 : i32
    %c0_i32_0 = arith.constant 0 : i32
    %c0_i32_1 = arith.constant 0 : i32
    %c0_i32_2 = arith.constant 0 : i32
    %c0_i32_3 = arith.constant 0 : i32
    return %c0_i32, %c0_i32_0, %c0_i32_1, %c0_i32_2 : i32, i32, i32, i32
  }
}

</mosaic_0001>

<bundles_post_ra>
// kernel: tpu_custom_call.1
= control target key start
LH: loop header
LB: loop body
LE: loop exit
PB: predicated region body
PF: predicated region fallthrough
CT: control target
= control target key end

     0   :  { %9 = vsyncpa [#allocation3], 0  ;;  %s4051_s0 = inlined_call_operand.hbm [shape: f32[2,4,32,64], index: 0, kind: input, shape index: {}]   ;;  %s4052_s1 = inlined_call_operand.hbm [shape: f32[3,8,64], index: 1, kind: input, shape index: {}]   ;;  %s4053_s2 = inlined_call_operand.hbm [shape: f32[27,8,64], index: 2, kind: input, shape index: {}]   ;;  %s4054_s3 = inlined_call_operand.hbm [shape: f32[32,33], index: 3, kind: input, shape index: {}]   ;;  %s4055_s4 = inlined_call_operand.hbm [shape: f32[2,4,32,64], index: 4, kind: output, shape index: {}]  }
   0x1   :  { %10 = vsyncpa [#allocation6], 0 }
   0x2   :  { %11 = vsyncpa [#allocation9], 0 }
   0x3   :  { %12 = vsyncpa [#allocation4], 0  ;;  %s2643_s15 = smov [#allocation5]   ;;  %s2644_s17 = smov [#allocation2]  }
   0x4   :  { %s30_s16 = sshll.u32 %s2643_s15, 4  ;;  %s18_s18 = sshll.u32 %s2644_s17, 4  ;;  %s31_s16 = int_to_ptr.vmem [resolvable:$true] %s30_s16  ;;  %s2692_s18 = int_to_ptr.vmem [resolvable:$true] %s18_s18 }
   0x5   :  { %s2525_s21 = scalar_lea.hbm %s4052_s1, 384 }
   0x6   :  { %p2526_p0 = scmp.ne.s32.totalorder %s4052_s1, %s2525_s21  ;;  %p2529_p1 = scmp.lt.u32.totalorder %s2525_s21, %s4052_s1 }
   0x8   :  { %p2531_p2 = pnand %p2529_p1, %p2526_p0 }
   0xa   :  { %2534 = shalt.err (!%p2531_p2)
}
   0xb   :  { %s2535_s26 = scalar_lea.vmem %s31_s16, 384  ;;  %p2540_p4 = scmp.lt.s32.totalorder %s31_s16, %s31_s16 }
   0xc   :  { %p2536_p3 = scmp.ne.s32.totalorder %s31_s16, %s2535_s26  ;;  %p2541_p5 = scmp.lt.s32.totalorder %s2535_s26, %s2535_s26 }
   0xe   :  { %p2542_p6 = por %p2541_p5, %p2540_p4 }
  0x10   :  { %p2543_p7 = pnand %p2542_p6, %p2536_p3 }
  0x12   :  { %2546 = shalt.err (!%p2543_p7)
}
  0x13   :  { %s2645_s27 = smov 128   ;;  %s2646_s28 = smov 8  }
  0x14   :  { %36 = dma.hbm_to_vmem [thread:$0]  %s4052_s1, 384, %s31_s16, [#allocation6], %s2645_s27, %s2645_s27, %s2646_s28  }
  0x15   :  { %s2547_s7 = scalar_lea.hbm %s4051_s0, 4096 }
  0x16   :  { %p2548_p8 = scmp.ne.s32.totalorder %s4051_s0, %s2547_s7  ;;  %p2551_p9 = scmp.lt.u32.totalorder %s2547_s7, %s4051_s0 }
  0x18   :  { %p2553_p10 = pnand %p2551_p9, %p2548_p8 }
  0x1a   :  { %2556 = shalt.err (!%p2553_p10)
}
  0x1b   :  { %s2557_s12 = scalar_lea.vmem %s2692_s18, 4096  ;;  %p2562_p12 = scmp.lt.s32.totalorder %s2692_s18, %s2692_s18 }
  0x1c   :  { %p2558_p11 = scmp.ne.s32.totalorder %s2692_s18, %s2557_s12  ;;  %p2563_p13 = scmp.lt.s32.totalorder %s2557_s12, %s2557_s12 }
  0x1e   :  { %p2564_p0 = por %p2563_p13, %p2562_p12 }
  0x20   :  { %p2565_p1 = pnand %p2564_p0, %p2558_p11 }
  0x22   :  { %2568 = shalt.err (!%p2565_p1)
}
  0x23   :  { %24 = dma.hbm_to_vmem [thread:$0]  %s4051_s0, 4096, %s2692_s18, [#allocation3], %s2645_s27, %s2645_s27, %s2646_s28  }
  0x24   :  { %s2647_s14 = smov [#allocation7]   ;;  %s2648_s16 = smov [#allocation8]  }
  0x25   :  { %s42_s15 = sshll.u32 %s2647_s14, 4  ;;  %s54_s17 = sshll.u32 %s2648_s16, 4  ;;  %s43_s15 = int_to_ptr.vmem [resolvable:$true] %s42_s15  ;;  %s2729_s17 = int_to_ptr.vmem [resolvable:$true] %s54_s17 }
  0x26   :  { %s2569_s21 = scalar_lea.hbm %s4053_s2, 3456 }
  0x27   :  { %p2570_p2 = scmp.ne.s32.totalorder %s4053_s2, %s2569_s21  ;;  %p2573_p3 = scmp.lt.u32.totalorder %s2569_s21, %s4053_s2 }
  0x29   :  { %p2575_p4 = pnand %p2573_p3, %p2570_p2 }
  0x2b   :  { %2578 = shalt.err (!%p2575_p4)
}
  0x2c   :  { %s2579_s0 = scalar_lea.vmem %s43_s15, 3456  ;;  %p2584_p6 = scmp.lt.s32.totalorder %s43_s15, %s43_s15 }
  0x2d   :  { %p2580_p5 = scmp.ne.s32.totalorder %s43_s15, %s2579_s0  ;;  %p2585_p7 = scmp.lt.s32.totalorder %s2579_s0, %s2579_s0 }
  0x2f   :  { %p2586_p8 = por %p2585_p7, %p2584_p6 }
  0x31   :  { %p2587_p9 = pnand %p2586_p8, %p2580_p5 }
  0x33   :  { %2590 = shalt.err (!%p2587_p9)
}
  0x34   :  { %48 = dma.hbm_to_vmem [thread:$0]  %s4053_s2, 3456, %s43_s15, [#allocation6], %s2645_s27, %s2645_s27, %s2646_s28  }
  0x35   :  { %s2591_s5 = scalar_lea.hbm %s4054_s3, 512 }
  0x36   :  { %p2592_p10 = scmp.ne.s32.totalorder %s4054_s3, %s2591_s5  ;;  %p2595_p11 = scmp.lt.u32.totalorder %s2591_s5, %s4054_s3 }
  0x38   :  { %p2597_p12 = pnand %p2595_p11, %p2592_p10 }
  0x3a   :  { %2600 = shalt.err (!%p2597_p12)
}
  0x3b   :  { %s2601_s10 = scalar_lea.vmem %s2729_s17, 512  ;;  %p2606_p0 = scmp.lt.s32.totalorder %s2729_s17, %s2729_s17 }
  0x3c   :  { %p2602_p13 = scmp.ne.s32.totalorder %s2729_s17, %s2601_s10  ;;  %p2607_p1 = scmp.lt.s32.totalorder %s2601_s10, %s2601_s10 }
  0x3e   :  { %p2608_p2 = por %p2607_p1, %p2606_p0 }
  0x40   :  { %p2609_p3 = pnand %p2608_p2, %p2602_p13 }
  0x42   :  { %2612 = shalt.err (!%p2609_p3)
}
  0x43   :  { %60 = dma.hbm_to_vmem [thread:$0]  %s4054_s3, 512, %s2729_s17, [#allocation9], %s2645_s27, %s2645_s27, %s2646_s28  }
  0x44   :  { %2635 = dma.done.wait [#allocation3], 4096  }
  0x45   :  { %2636 = vsyncadd [#allocation3], 4294963200 }
  0x46   :  { %2637 = dma.done.wait [#allocation6], 3840  }
  0x47   :  { %2638 = vsyncadd [#allocation6], 4294963456 }
  0x48   :  { %2639 = dma.done.wait [#allocation9], 512  }
  0x49   :  { %2640 = vsyncadd [#allocation9], 4294966784  ;;  %v2649_v0 = vmov 0.0   ;;  %s2650_s12 = smov 9   ;;  %s2651_s1 = smov 73   ;;  %v73_v1 = vld [vmem:[#allocation2] sm:$0xff] }
  0x4a   :  { %191 = vrot.lane.b32.xlu1 %v2649_v0, %s2650_s12  ;;  %170 = vrot.lane.b32.xlu0 %v2649_v0, %s2651_s1  ;;  %s2652_s13 = smov 72   ;;  %v2774_v2 = vld [vmem:[#allocation5] sm:$0xff]  ;;  %v2776_v3 = vld [vmem:[#allocation5 + $0x8] sm:$0xff]  ;;  %s2653_s3 = smov 7   ;;  %vm212_vm0 = vcmask 72704   ;;  %vm276_vm1 = vcmask 64512  }
  0x4b   :  { %v139_v4 = vmul.f32 %v2774_v2, %v73_v1  ;;  %s2654_s14 = smov 71   ;;  %v77_v7 = vld [vmem:[#allocation2 + $0x20] sm:$0xff]  ;;  %s2655_s15 = smov 1   ;;  %v2981_v49 = vld [vmem:[#allocation7] sm:$0xff]  ;;  %vm340_vm2 = vcmask 56320   ;;  %vm404_vm3 = vcmask 7168  }
  0x4c   :  { %v140_v8 = vmul.f32 %v2774_v2, %v77_v7  ;;  %s2656_s16 = smov 65   ;;  %v81_v11 = vld [vmem:[#allocation2 + $0x40] sm:$0xff]  ;;  %s2657_s17 = smov 63   ;;  %vm482_vm4 = vcmask 515072   ;;  %vm546_vm5 = vcmask 465920   ;;  %vm610_vm6 = vcmask 457728  }
  0x4d   :  { %v147_v5 = vadd.f32 %v139_v4, %v2776_v3  ;;  %v141_v12 = vmul.f32 %v2774_v2, %v81_v11  ;;  %s2658_s19 = smov 127   ;;  %s2659_s20 = smov 57   ;;  %v89_v15 = vld [vmem:[#allocation2 + $0x80] sm:$0xff]  ;;  %v3026_v11 = vld [vmem:[#allocation7 + $0x10] sm:$0xff]  ;;  %vm674_vm7 = vcmask 449536   ;;  %vm1097_vm8 = vcmask 519168  }
  0x4e   :  { %255 = vrot.lane.b32.xlu1 %v2649_v0, %s2646_s28  ;;  %234 = vrot.lane.b32.xlu0 %v2649_v0, %s2652_s13  ;;  %v148_v9 = vadd.f32 %v140_v8, %v2776_v3  ;;  %s2660_s21 = smov 121   ;;  %s2661_s22 = smov 56   ;;  %v143_v16 = vmul.f32 %v2774_v2, %v89_v15  ;;  %v85_v27 = vld [vmem:[#allocation2 + $0x60] sm:$0xff]  ;;  %vm1364_vm9 = vcmask 1043456   ;;  %vm1373_vm10 = vcmask 269312  }
  0x4f   :  { %v2780_v6 = vmax.f32 %v147_v5, 0.0  ;;  %v149_v13 = vadd.f32 %v141_v12, %v2776_v3  ;;  %s2662_s23 = smov 120   ;;  %s2663_s24 = smov 55   ;;  %v142_v30 = vmul.f32 %v2774_v2, %v85_v27  ;;  %v93_v31 = vld [vmem:[#allocation2 + $0xa0] sm:$0xff]  ;;  %vm1386_vm11 = vcmask 1040384  }
  0x50   :  { %v2808_v10 = vmax.f32 %v148_v9, 0.0  ;;  %s2664_s25 = smov 119   ;;  %v151_v17 = vadd.f32 %v143_v16, %v2776_v3  ;;  %v144_v35 = vmul.f32 %v2774_v2, %v93_v31  ;;  %v97_v46 = vld [vmem:[#allocation2 + $0xc0] sm:$0xff]  ;;  %vm1475_vm12 = vcmask 523264   ;;  %s2666_s0 = smov [#allocation10]  }
  0x51   :  { %v2824_v14 = vmax.f32 %v149_v13, 0.0  ;;  %v150_v34 = vadd.f32 %v142_v30, %v2776_v3  ;;  %v2983_v50 = vld [vmem:[#allocation7 + $0x8] sm:$0xff]  ;;  %v145_v54 = vmul.f32 %v2774_v2, %v97_v46  ;;  %s2115_s18 = sshll.u32 %s2666_s0, 4  ;;  %s2116_s18 = int_to_ptr.vmem [resolvable:$true] %s2115_s18 }
  0x52   :  { %236 = vrot.lane.b32.xlu1 %v2780_v6, %s2652_s13  ;;  %172 = vrot.lane.b32.xlu0 %v2780_v6, %s2651_s1  ;;  %v2892_v18 = vmax.f32 %v151_v17, 0.0  ;;  %v152_v39 = vadd.f32 %v144_v35, %v2776_v3  ;;  %s2613_s26 = scalar_lea.vmem %s2116_s18, 4096  ;;  %p2618_p5 = scmp.lt.s32.totalorder %s2116_s18, %s2116_s18 }
  0x53   :  { %v2959_v38 = vmax.f32 %v150_v34, 0.0  ;;  %v153_v58 = vadd.f32 %v145_v54, %v2776_v3  ;;  %p2614_p4 = scmp.ne.s32.totalorder %s2116_s18, %s2613_s26  ;;  %p2619_p6 = scmp.lt.s32.totalorder %s2613_s26, %s2613_s26 }
  0x54   :  { %v2970_v42 = vmax.f32 %v152_v39, 0.0 }
  0x55   :  { %4085 = vst [vmem:[#allocation15_spill] sm:$0xff] %v2959_v38  ;;  %v3008_v61 = vmax.f32 %v153_v58, 0.0  ;;  %p2620_p7 = por %p2619_p6, %p2618_p5 }
  0x56   :  { %257 = vrot.lane.b32.xlu1 %v2780_v6, %s2646_s28  ;;  %193 = vrot.lane.b32.xlu0 %v2780_v6, %s2650_s12 }
  0x57   :  { %p2621_p8 = pnand %p2620_p7, %p2614_p4 }
  0x5a   :  { %321 = vrot.lane.b32.xlu1 %v2780_v6, %s2653_s3  ;;  %300 = vrot.lane.b32.xlu0 %v2780_v6, %s2654_s14 }
  0x5e   :  { %319 = vrot.lane.b32.xlu1 %v2649_v0, %s2653_s3  ;;  %298 = vrot.lane.b32.xlu0 %v2649_v0, %s2654_s14 }
  0x62   :  { %385 = vrot.lane.b32.xlu1 %v2780_v6, %s2655_s15  ;;  %364 = vrot.lane.b32.xlu0 %v2780_v6, %s2656_s16 }
  0x66   :  { %383 = vrot.lane.b32.xlu1 %v2649_v0, %s2655_s15  ;;  %362 = vrot.lane.b32.xlu0 %v2649_v0, %s2656_s16 }
  0x6a   :  { %195 = vrot.lane.b32.xlu1 %v2808_v10, %s2650_s12  ;;  %174 = vrot.lane.b32.xlu0 %v2808_v10, %s2651_s1 }
  0x6e   :  { %259 = vrot.lane.b32.xlu1 %v2808_v10, %s2646_s28  ;;  %238 = vrot.lane.b32.xlu0 %v2808_v10, %s2652_s13 }
  0x72   :  { %463 = vrot.lane.b32.xlu1 %v2780_v6, %s2657_s17  ;;  %442 = vrot.lane.b32.xlu0 %v2780_v6, %s2658_s19 }
  0x76   :  { %197 = vrot.lane.b32.xlu1 %v2824_v14, %s2650_s12  ;;  %176 = vrot.lane.b32.xlu0 %v2824_v14, %s2651_s1 }
  0x7a   :  { %261 = vrot.lane.b32.xlu1 %v2824_v14, %s2646_s28  ;;  %240 = vrot.lane.b32.xlu0 %v2824_v14, %s2652_s13 }
  0x7e   :  { %323 = vrot.lane.b32.xlu1 %v2808_v10, %s2653_s3  ;;  %302 = vrot.lane.b32.xlu0 %v2808_v10, %s2654_s14 }
  0x82   :  { %461 = vrot.lane.b32.xlu1 %v2649_v0, %s2657_s17  ;;  %440 = vrot.lane.b32.xlu0 %v2649_v0, %s2658_s19 }
  0x86   :  { %527 = vrot.lane.b32.xlu1 %v2780_v6, %s2659_s20  ;;  %506 = vrot.lane.b32.xlu0 %v2780_v6, %s2660_s21 }
  0x8a   :  { %325 = vrot.lane.b32.xlu1 %v2824_v14, %s2653_s3  ;;  %304 = vrot.lane.b32.xlu0 %v2824_v14, %s2654_s14 }
  0x8e   :  { %387 = vrot.lane.b32.xlu1 %v2808_v10, %s2655_s15  ;;  %366 = vrot.lane.b32.xlu0 %v2808_v10, %s2656_s16 }
  0x92   :  { %525 = vrot.lane.b32.xlu1 %v2649_v0, %s2659_s20  ;;  %504 = vrot.lane.b32.xlu0 %v2649_v0, %s2660_s21 }
  0x96   :  { %591 = vrot.lane.b32.xlu1 %v2780_v6, %s2661_s22  ;;  %570 = vrot.lane.b32.xlu0 %v2780_v6, %s2662_s23 }
  0x9a   :  { %389 = vrot.lane.b32.xlu1 %v2824_v14, %s2655_s15  ;;  %368 = vrot.lane.b32.xlu0 %v2824_v14, %s2656_s16 }
  0x9e   :  { %589 = vrot.lane.b32.xlu1 %v2649_v0, %s2661_s22  ;;  %568 = vrot.lane.b32.xlu0 %v2649_v0, %s2662_s23 }
  0xa2   :  { %655 = vrot.lane.b32.xlu1 %v2780_v6, %s2663_s24  ;;  %634 = vrot.lane.b32.xlu0 %v2780_v6, %s2664_s25 }
  0xa6   :  { %465 = vrot.lane.b32.xlu1 %v2808_v10, %s2657_s17  ;;  %444 = vrot.lane.b32.xlu0 %v2808_v10, %s2658_s19 }
  0xaa   :  { %653 = vrot.lane.b32.xlu1 %v2649_v0, %s2663_s24  ;;  %632 = vrot.lane.b32.xlu0 %v2649_v0, %s2664_s25 }
  0xae   :  { %467 = vrot.lane.b32.xlu1 %v2824_v14, %s2657_s17  ;;  %446 = vrot.lane.b32.xlu0 %v2824_v14, %s2658_s19 }
  0xb2   :  { %529 = vrot.lane.b32.xlu1 %v2808_v10, %s2659_s20  ;;  %508 = vrot.lane.b32.xlu0 %v2808_v10, %s2660_s21 }
  0xb6   :  { %199 = vrot.lane.b32.xlu1 %v2892_v18, %s2650_s12  ;;  %178 = vrot.lane.b32.xlu0 %v2892_v18, %s2651_s1 }
  0xba   :  { %263 = vrot.lane.b32.xlu1 %v2892_v18, %s2646_s28  ;;  %242 = vrot.lane.b32.xlu0 %v2892_v18, %s2652_s13 }
  0xbc   :  { %v2898_v19 = vpop.permute.xlu1 %191  ;;  %v2900_v20 = vpop.permute.xlu0 %170 }
  0xbd   :  { %v3078_v58 = vsel %vm212_vm0, %v2900_v20, %v2898_v19 }
  0xbe   :  { %531 = vrot.lane.b32.xlu1 %v2824_v14, %s2659_s20  ;;  %510 = vrot.lane.b32.xlu0 %v2824_v14, %s2660_s21 }
  0xc0   :  { %v2910_v21 = vpop.permute.xlu1 %255  ;;  %v2912_v22 = vpop.permute.xlu0 %234 }
  0xc2   :  { %593 = vrot.lane.b32.xlu1 %v2808_v10, %s2661_s22  ;;  %572 = vrot.lane.b32.xlu0 %v2808_v10, %s2662_s23 }
  0xc4   :  { %v2918_v23 = vpop.permute.xlu1 %236  ;;  %v2920_v24 = vpop.permute.xlu0 %172 }
  0xc6   :  { %327 = vrot.lane.b32.xlu1 %v2892_v18, %s2653_s3  ;;  %306 = vrot.lane.b32.xlu0 %v2892_v18, %s2654_s14 }
  0xc8   :  { %v2926_v25 = vpop.permute.xlu1 %257  ;;  %v2928_v26 = vpop.permute.xlu0 %193 }
  0xca   :  { %595 = vrot.lane.b32.xlu1 %v2824_v14, %s2661_s22  ;;  %574 = vrot.lane.b32.xlu0 %v2824_v14, %s2662_s23 }
  0xcc   :  { %v2934_v28 = vpop.permute.xlu1 %321  ;;  %v2936_v29 = vpop.permute.xlu0 %300 }
  0xce   :  { %657 = vrot.lane.b32.xlu1 %v2808_v10, %s2663_s24  ;;  %636 = vrot.lane.b32.xlu0 %v2808_v10, %s2664_s25 }
  0xd0   :  { %v2943_v32 = vpop.permute.xlu1 %319  ;;  %v2945_v33 = vpop.permute.xlu0 %298 }
  0xd1   :  { %v3098_v19 = vsel %vm340_vm2, %v2945_v33, %v2943_v32 }
  0xd2   :  { %391 = vrot.lane.b32.xlu1 %v2892_v18, %s2655_s15  ;;  %370 = vrot.lane.b32.xlu0 %v2892_v18, %s2656_s16  ;;  %4086 = vst [vmem:[#allocation16_spill] sm:$0xff] %v3098_v19 }
  0xd4   :  { %v2953_v36 = vpop.permute.xlu1 %385  ;;  %v2955_v37 = vpop.permute.xlu0 %364 }
  0xd6   :  { %659 = vrot.lane.b32.xlu1 %v2824_v14, %s2663_s24  ;;  %638 = vrot.lane.b32.xlu0 %v2824_v14, %s2664_s25 }
  0xd8   :  { %v2964_v40 = vpop.permute.xlu1 %383  ;;  %v2966_v41 = vpop.permute.xlu0 %362 }
  0xda   :  { %704 = vrot.lane.b32.xlu1 %v2959_v38, %s2650_s12  ;;  %698 = vrot.lane.b32.xlu0 %v2959_v38, %s2651_s1 }
  0xdc   :  { %v196_v43 = vpop.permute.xlu1 %195  ;;  %v175_v44 = vpop.permute.xlu0 %174 }
  0xdd   :  { %v2977_v45 = vsel %vm212_vm0, %v175_v44, %v196_v43 }
  0xde   :  { %201 = vrot.lane.b32.xlu1 %v2970_v42, %s2650_s12  ;;  %180 = vrot.lane.b32.xlu0 %v2970_v42, %s2651_s1  ;;  %v222_v52 = vmul.f32 %v2977_v45, %v2981_v49 }
  0xe0   :  { %v260_v47 = vpop.permute.xlu1 %259  ;;  %v239_v48 = vpop.permute.xlu0 %238 }
  0xe1   :  { %v2986_v51 = vsel %vm276_vm1, %v239_v48, %v260_v47  ;;  %v3058_v47 = vld [vmem:[#allocation7 + $0x18] sm:$0xff] }
  0xe2   :  { %v286_v53 = vmul.f32 %v2986_v51, %v2983_v50  ;;  %265 = vrot.lane.b32.xlu1 %v2970_v42, %s2646_s28  ;;  %244 = vrot.lane.b32.xlu0 %v2970_v42, %s2652_s13 }
  0xe4   :  { %v293_v55 = vadd.f32 %v286_v53, %v222_v52  ;;  %v2997_v56 = vpop.permute.xlu1 %463  ;;  %v2999_v57 = vpop.permute.xlu0 %442 }
  0xe6   :  { %469 = vrot.lane.b32.xlu1 %v2892_v18, %s2657_s17  ;;  %448 = vrot.lane.b32.xlu0 %v2892_v18, %s2658_s19 }
  0xe8   :  { %v198_v59 = vpop.permute.xlu1 %197  ;;  %v177_v60 = vpop.permute.xlu0 %176 }
  0xe9   :  { %v3011_v62 = vsel %vm212_vm0, %v177_v60, %v198_v59  ;;  %v3083_v59 = vsel %vm276_vm1, %v2912_v22, %v2910_v21  ;;  %v3105_v22 = vsel %vm404_vm3, %v2966_v41, %v2964_v40  ;;  %v3121_v40 = vsel %vm276_vm1, %v2918_v23, %v2926_v25  ;;  %v3143_v25 = vld [vmem:[#allocation7 + $0x20] sm:$0xff] }
  0xea   :  { %734 = vrot.lane.b32.xlu1 %v2959_v38, %s2646_s28  ;;  %728 = vrot.lane.b32.xlu0 %v2959_v38, %s2652_s13  ;;  %v223_v4 = vmul.f32 %v3011_v62, %v2981_v49  ;;  %4087 = vst [vmem:[#allocation17_spill] sm:$0xff] %v3105_v22  ;;  %v3126_v41 = vsel %vm212_vm0, %v2920_v24, %v2928_v26 }
  0xeb   :  { %v285_v23 = vmul.f32 %v3121_v40, %v2983_v50  ;;  %v221_v24 = vmul.f32 %v3126_v41, %v2981_v49 }
  0xec   :  { %v262_v63 = vpop.permute.xlu1 %261  ;;  %v241_v0 = vpop.permute.xlu0 %240 }
  0xed   :  { %v3016_v1 = vsel %vm276_vm1, %v241_v0, %v262_v63  ;;  %v220_v0 = vmul.f32 %v3078_v58, %v2981_v49 }
  0xee   :  { %v287_v5 = vmul.f32 %v3016_v1, %v2983_v50  ;;  %203 = vrot.lane.b32.xlu1 %v3008_v61, %s2650_s12  ;;  %182 = vrot.lane.b32.xlu0 %v3008_v61, %s2651_s1 }
  0xf0   :  { %v294_v7 = vadd.f32 %v287_v5, %v223_v4  ;;  %v324_v8 = vpop.permute.xlu1 %323  ;;  %v303_v9 = vpop.permute.xlu0 %302  ;;  %v284_v4 = vmul.f32 %v3083_v59, %v2983_v50 }
  0xf1   :  { %v3029_v12 = vsel %vm340_vm2, %v303_v9, %v324_v8  ;;  %v412_v8 = vmul.f32 %v3105_v22, %v3058_v47 }
  0xf2   :  { %v350_v13 = vmul.f32 %v3029_v12, %v3026_v11  ;;  %267 = vrot.lane.b32.xlu1 %v3008_v61, %s2646_s28  ;;  %246 = vrot.lane.b32.xlu0 %v3008_v61, %s2652_s13  ;;  %v291_v33 = vadd.f32 %v284_v4, %v220_v0  ;;  %v3171_v4 = vld [vmem:[#allocation7 + $0x30] sm:$0xff] }
  0xf4   :  { %v357_v15 = vadd.f32 %v350_v13, %v293_v55  ;;  %v462_v16 = vpop.permute.xlu1 %461  ;;  %v441_v17 = vpop.permute.xlu0 %440 }
  0xf5   :  { %v3146_v26 = vsel %vm482_vm4, %v441_v17, %v462_v16 }
  0xf6   :  { %329 = vrot.lane.b32.xlu1 %v2970_v42, %s2653_s3  ;;  %308 = vrot.lane.b32.xlu0 %v2970_v42, %s2654_s14  ;;  %4088 = vst [vmem:[#allocation18_spill] sm:$0xff] %v3146_v26 }
  0xf8   :  { %v3041_v27 = vpop.permute.xlu1 %527  ;;  %v3043_v30 = vpop.permute.xlu0 %506 }
  0xfa   :  { %533 = vrot.lane.b32.xlu1 %v2892_v18, %s2659_s20  ;;  %512 = vrot.lane.b32.xlu0 %v2892_v18, %s2660_s21 }
  0xfc   :  { %v326_v31 = vpop.permute.xlu1 %325  ;;  %v305_v34 = vpop.permute.xlu0 %304 }
  0xfd   :  { %v3050_v35 = vsel %vm340_vm2, %v305_v34, %v326_v31  ;;  %v3135_v31 = vsel %vm340_vm2, %v2936_v29, %v2934_v28  ;;  %v3153_v28 = vsel %vm404_vm3, %v2955_v37, %v2953_v36  ;;  %v428_v36 = vmul.f32 %v2808_v10, %v3143_v25 }
  0xfe   :  { %v351_v39 = vmul.f32 %v3050_v35, %v3026_v11  ;;  %764 = vrot.lane.b32.xlu1 %v2959_v38, %s2653_s3  ;;  %758 = vrot.lane.b32.xlu0 %v2959_v38, %s2654_s14  ;;  %v292_v37 = vadd.f32 %v285_v23, %v221_v24  ;;  %v413_v0 = vmul.f32 %v3153_v28, %v3058_v47 }
 0x100   :  { %v358_v43 = vadd.f32 %v351_v39, %v294_v7  ;;  %v388_v44 = vpop.permute.xlu1 %387  ;;  %v367_v46 = vpop.permute.xlu0 %366  ;;  %v348_v7 = vmul.f32 %v3098_v19, %v3026_v11  ;;  %v426_v39 = vmul.f32 0.0, %v3143_v25 }
 0x101   :  { %v3061_v48 = vsel %vm404_vm3, %v367_v46, %v388_v44  ;;  %v349_v46 = vmul.f32 %v3135_v31, %v3026_v11 }
 0x102   :  { %v414_v52 = vmul.f32 %v3061_v48, %v3058_v47  ;;  %331 = vrot.lane.b32.xlu1 %v3008_v61, %s2653_s3  ;;  %310 = vrot.lane.b32.xlu0 %v3008_v61, %s2654_s14  ;;  %v355_v34 = vadd.f32 %v348_v7, %v291_v33  ;;  %v3183_v33 = vsel %vm482_vm4, %v2999_v57, %v2997_v56 }
 0x103   :  { %v427_v56 = vmul.f32 %v2780_v6, %v3143_v25  ;;  %v3204_v57 = vsel %vm546_vm5, %v3043_v30, %v3041_v27 }
 0x104   :  { %v3069_v53 = vadd.f32 %v414_v52, %v357_v15  ;;  %v526_v54 = vpop.permute.xlu1 %525  ;;  %v505_v55 = vpop.permute.xlu0 %504  ;;  %v419_v29 = vadd.f32 %v412_v8, %v355_v34  ;;  %v3158_v52 = vld [vmem:[#allocation7 + $0x28] sm:$0xff]  ;;  %v3185_v8 = vld [vmem:[#allocation7 + $0x38] sm:$0xff] }
 0x105   :  { %v3161_v16 = vsel %vm546_vm5, %v505_v55, %v526_v54  ;;  %v490_v17 = vmul.f32 %v3146_v26, %v3158_v52 }
 0x106   :  { %393 = vrot.lane.b32.xlu1 %v2970_v42, %s2655_s15  ;;  %372 = vrot.lane.b32.xlu0 %v2970_v42, %s2656_s16  ;;  %4089 = vst [vmem:[#allocation19_spill] sm:$0xff] %v3161_v16  ;;  %v433_v54 = vadd.f32 %v426_v39, %v419_v29  ;;  %v554_v55 = vmul.f32 %v3161_v16, %v3171_v4 }
 0x107   :  { %v435_v23 = vadd.f32 %v428_v36, %v3069_v53  ;;  %v3206_v36 = vld [vmem:[#allocation7 + $0x48] sm:$0xff] }
 0x108   :  { %v3085_v60 = vpop.permute.xlu1 %591  ;;  %v3087_v63 = vpop.permute.xlu0 %570 }
 0x109   :  { %v3218_v27 = vsel %vm610_vm6, %v3087_v63, %v3085_v60  ;;  %v712_v60 = vmul.f32 %v3126_v41, %v3206_v36 }
 0x10a   :  { %597 = vrot.lane.b32.xlu1 %v2892_v18, %s2661_s22  ;;  %576 = vrot.lane.b32.xlu0 %v2892_v18, %s2662_s23 }
 0x10c   :  { %v390_v20 = vpop.permute.xlu1 %389  ;;  %v369_v21 = vpop.permute.xlu0 %368 }
 0x10d   :  { %v3108_v5 = vsel %vm404_vm3, %v369_v21, %v390_v20 }
 0x10e   :  { %v415_v32 = vmul.f32 %v3108_v5, %v3058_v47  ;;  %794 = vrot.lane.b32.xlu1 %v2959_v38, %s2655_s15  ;;  %788 = vrot.lane.b32.xlu0 %v2959_v38, %s2656_s16 }
 0x110   :  { %v3130_v9 = vadd.f32 %v415_v32, %v358_v43  ;;  %v590_v13 = vpop.permute.xlu1 %589  ;;  %v569_v15 = vpop.permute.xlu0 %568  ;;  %v356_v32 = vadd.f32 %v349_v46, %v292_v37  ;;  %v491_v37 = vmul.f32 %v3183_v33, %v3158_v52 }
 0x111   :  { %v3174_v20 = vsel %vm610_vm6, %v569_v15, %v590_v13  ;;  %v497_v15 = vadd.f32 %v490_v17, %v433_v54 }
 0x112   :  { %395 = vrot.lane.b32.xlu1 %v3008_v61, %s2655_s15  ;;  %374 = vrot.lane.b32.xlu0 %v3008_v61, %s2656_s16  ;;  %4090 = vst [vmem:[#allocation20_spill] sm:$0xff] %v3174_v20  ;;  %v618_v34 = vmul.f32 %v3174_v20, %v3185_v8  ;;  %v420_v29 = vadd.f32 %v413_v0, %v356_v32  ;;  %v3210_v0 = vld [vmem:[#allocation7 + $0x40] sm:$0xff] }
 0x113   :  { %v561_v39 = vadd.f32 %v554_v55, %v497_v15  ;;  %v555_v15 = vmul.f32 %v3204_v57, %v3171_v4 }
 0x114   :  { %v656_v43 = vpop.permute.xlu1 %655  ;;  %v635_v44 = vpop.permute.xlu0 %634  ;;  %v434_v32 = vadd.f32 %v427_v56, %v420_v29  ;;  %v619_v29 = vmul.f32 %v3218_v27, %v3185_v8 }
 0x115   :  { %v625_v30 = vadd.f32 %v618_v34, %v561_v39  ;;  %v3235_v63 = vsel %vm674_vm7, %v635_v44, %v656_v43  ;;  %v3237_v39 = vld [vmem:[#allocation7 + $0x58] sm:$0xff]  ;;  %v3251_v44 = vld [vmem:[#allocation7 + $0x60] sm:$0xff] }
 0x116   :  { %661 = vrot.lane.b32.xlu1 %v2892_v18, %s2663_s24  ;;  %640 = vrot.lane.b32.xlu0 %v2892_v18, %s2664_s25 }
 0x118   :  { %v466_v21 = vpop.permute.xlu1 %465  ;;  %v445_v7 = vpop.permute.xlu0 %444 }
 0x119   :  { %v3188_v13 = vsel %vm482_vm4, %v445_v7, %v466_v21  ;;  %v429_v21 = vmul.f32 %v2824_v14, %v3143_v25  ;;  %v3226_v7 = vld [vmem:[#allocation7 + $0x50] sm:$0xff] }
 0x11a   :  { %v492_v24 = vmul.f32 %v3188_v13, %v3158_v52  ;;  %471 = vrot.lane.b32.xlu1 %v2970_v42, %s2657_s17  ;;  %450 = vrot.lane.b32.xlu0 %v2970_v42, %s2658_s19 }
 0x11b   :  { %v436_v41 = vadd.f32 %v429_v21, %v3130_v9 }
 0x11c   :  { %v499_v53 = vadd.f32 %v492_v24, %v435_v23  ;;  %v654_v46 = vpop.permute.xlu1 %653  ;;  %v633_v17 = vpop.permute.xlu0 %632 }
 0x11d   :  { %v3213_v54 = vsel %vm674_vm7, %v633_v17, %v654_v46  ;;  %v498_v46 = vadd.f32 %v491_v37, %v434_v32  ;;  %v742_v17 = vmul.f32 %v3121_v40, %v3226_v7  ;;  %v772_v40 = vmul.f32 %v3135_v31, %v3237_v39 }
 0x11e   :  { %4091 = vst [vmem:[#allocation21_spill] sm:$0xff] %v3213_v54  ;;  %v682_v55 = vmul.f32 %v3213_v54, %v3210_v0  ;;  %840 = vrot.lane.b32.xlu1 %v2959_v38, %s2657_s17  ;;  %834 = vrot.lane.b32.xlu0 %v2959_v38, %s2658_s19 }
 0x11f   :  { %v562_v37 = vadd.f32 %v555_v15, %v498_v46  ;;  %v802_v15 = vmul.f32 %v3153_v28, %v3251_v44 }
 0x120   :  { %v689_v34 = vadd.f32 %v682_v55, %v625_v30  ;;  %v468_v23 = vpop.permute.xlu1 %467  ;;  %v447_v24 = vpop.permute.xlu0 %446  ;;  %v683_v30 = vmul.f32 %v3235_v63, %v3210_v0 }
 0x121   :  { %v3242_v56 = vsel %vm482_vm4, %v447_v24, %v468_v23  ;;  %v3259_v23 = vld [vmem:[#allocation7 + $0x68] sm:$0xff] }
 0x122   :  { %v720_v54 = vadd.f32 %v712_v60, %v689_v34  ;;  %v493_v43 = vmul.f32 %v3242_v56, %v3158_v52  ;;  %473 = vrot.lane.b32.xlu1 %v3008_v61, %s2657_s17  ;;  %452 = vrot.lane.b32.xlu0 %v3008_v61, %s2658_s19  ;;  %v626_v60 = vadd.f32 %v619_v29, %v562_v37  ;;  %v3280_v37 = vld [vmem:[#allocation7 + $0x78] sm:$0xff] }
 0x123   :  { %v818_v20 = vmul.f32 %v2780_v6, %v3259_v23  ;;  %v713_v6 = vmul.f32 %v2977_v45, %v3206_v36 }
 0x124   :  { %v750_v55 = vadd.f32 %v742_v17, %v720_v54  ;;  %v500_v9 = vadd.f32 %v493_v43, %v436_v41  ;;  %v530_v21 = vpop.permute.xlu1 %529  ;;  %v509_v32 = vpop.permute.xlu0 %508  ;;  %v3272_v54 = vld [vmem:[#allocation7 + $0x70] sm:$0xff]  ;;  %v690_v29 = vadd.f32 %v683_v30, %v626_v60  ;;  %v878_v60 = vmul.f32 %v3204_v57, %v3280_v37 }
 0x125   :  { %v3262_v24 = vsel %vm546_vm5, %v509_v32, %v530_v21  ;;  %v3285_v21 = vld [vmem:[#allocation7 + $0x80] sm:$0xff] }
 0x126   :  { %v780_v46 = vadd.f32 %v772_v40, %v750_v55  ;;  %v556_v31 = vmul.f32 %v3262_v24, %v3171_v4  ;;  %535 = vrot.lane.b32.xlu1 %v2970_v42, %s2659_s20  ;;  %514 = vrot.lane.b32.xlu0 %v2970_v42, %s2660_s21  ;;  %v848_v55 = vmul.f32 %v3183_v33, %v3272_v54 }
 0x127   :  { %v743_v33 = vmul.f32 %v2986_v51, %v3226_v7 }
 0x128   :  { %v810_v17 = vadd.f32 %v802_v15, %v780_v46  ;;  %v3276_v41 = vadd.f32 %v556_v31, %v499_v53  ;;  %v200_v28 = vpop.permute.xlu1 %199  ;;  %v179_v43 = vpop.permute.xlu0 %178  ;;  %v721_v53 = vadd.f32 %v713_v6, %v690_v29 }
 0x129   :  { %v217_v40 = vsel %vm212_vm0, %v179_v43, %v200_v28 }
 0x12a   :  { %v826_v30 = vadd.f32 %v818_v20, %v810_v17  ;;  %v716_v32 = vmul.f32 %v217_v40, %v3206_v36  ;;  %870 = vrot.lane.b32.xlu1 %v2959_v38, %s2659_s20  ;;  %864 = vrot.lane.b32.xlu0 %v2959_v38, %s2660_s21  ;;  %v908_v20 = vmul.f32 %v3218_v27, %v3285_v21  ;;  %v3298_v17 = vld [vmem:[#allocation7 + $0x88] sm:$0xff] }
 0x12b   :  { %v224_v6 = vmul.f32 %v217_v40, %v2981_v49  ;;  %v938_v27 = vmul.f32 %v3235_v63, %v3298_v17  ;;  %v3310_v40 = vld [vmem:[#allocation7 + $0x90] sm:$0xff] }
 0x12c   :  { %v856_v15 = vadd.f32 %v848_v55, %v826_v30  ;;  %v724_v46 = vadd.f32 %v716_v32, %v689_v34  ;;  %v264_v31 = vpop.permute.xlu1 %263  ;;  %v243_v28 = vpop.permute.xlu0 %242  ;;  %v751_v34 = vadd.f32 %v743_v33, %v721_v53  ;;  %v954_v53 = vmul.f32 %v2977_v45, %v3310_v40 }
 0x12d   :  { %v281_v29 = vsel %vm276_vm1, %v243_v28, %v264_v31  ;;  %v773_v31 = vmul.f32 %v3029_v12, %v3237_v39 }
 0x12e   :  { %v886_v43 = vadd.f32 %v878_v60, %v856_v15  ;;  %v288_v16 = vmul.f32 %v281_v29, %v2983_v50  ;;  %v746_v57 = vmul.f32 %v281_v29, %v3226_v7  ;;  %537 = vrot.lane.b32.xlu1 %v3008_v61, %s2659_s20  ;;  %516 = vrot.lane.b32.xlu0 %v3008_v61, %s2660_s21 }
 0x130   :  { %v916_v55 = vadd.f32 %v908_v20, %v886_v43  ;;  %v295_v30 = vadd.f32 %v288_v16, %v224_v6  ;;  %v754_v32 = vadd.f32 %v746_v57, %v724_v46  ;;  %v532_v60 = vpop.permute.xlu1 %531  ;;  %v511_v15 = vpop.permute.xlu0 %510  ;;  %v3323_v16 = vld [vmem:[#allocation7 + $0x98] sm:$0xff]  ;;  %v781_v46 = vadd.f32 %v773_v31, %v751_v34  ;;  %v3329_v57 = vld [vmem:[#allocation7 + $0xa0] sm:$0xff] }
 0x131   :  { %v3315_v28 = vsel %vm546_vm5, %v511_v15, %v532_v60  ;;  %v969_v20 = vmul.f32 %v2986_v51, %v3323_v16  ;;  %v984_v34 = vmul.f32 %v3029_v12, %v3329_v57  ;;  %v3341_v51 = vld [vmem:[#allocation7 + $0xa8] sm:$0xff] }
 0x132   :  { %v946_v33 = vadd.f32 %v938_v27, %v916_v55  ;;  %v557_v63 = vmul.f32 %v3315_v28, %v3171_v4  ;;  %599 = vrot.lane.b32.xlu1 %v2970_v42, %s2661_s22  ;;  %578 = vrot.lane.b32.xlu0 %v2970_v42, %s2662_s23  ;;  %v803_v27 = vmul.f32 %v3061_v48, %v3251_v44  ;;  %v3333_v55 = vld [vmem:[#allocation7 + $0xb0] sm:$0xff] }
 0x133   :  { %v1014_v12 = vmul.f32 %v2808_v10, %v3333_v55 }
 0x134   :  { %v961_v29 = vadd.f32 %v954_v53, %v946_v33  ;;  %v564_v43 = vadd.f32 %v557_v63, %v500_v9  ;;  %v594_v6 = vpop.permute.xlu1 %593  ;;  %v573_v45 = vpop.permute.xlu0 %572  ;;  %v819_v9 = vmul.f32 %v2808_v10, %v3259_v23  ;;  %v811_v53 = vadd.f32 %v803_v27, %v781_v46 }
 0x135   :  { %v613_v60 = vsel %vm610_vm6, %v573_v45, %v594_v6  ;;  %v999_v33 = vmul.f32 %v3061_v48, %v3341_v51  ;;  %v101_v45 = vld [vmem:[#allocation2 + $0xe0] sm:$0xff]  ;;  %v3357_v48 = vld [vmem:[#allocation7 + $0xb8] sm:$0xff] }
 0x136   :  { %v976_v15 = vadd.f32 %v969_v20, %v961_v29  ;;  %v620_v31 = vmul.f32 %v613_v60, %v3185_v8  ;;  %900 = vrot.lane.b32.xlu1 %v2959_v38, %s2661_s22  ;;  %894 = vrot.lane.b32.xlu0 %v2959_v38, %s2662_s23  ;;  %v827_v19 = vadd.f32 %v819_v9, %v811_v53 }
 0x137   :  { %v146_v10 = vmul.f32 %v2774_v2, %v101_v45  ;;  %v879_v9 = vmul.f32 %v3262_v24, %v3280_v37 }
 0x138   :  { %v991_v63 = vadd.f32 %v984_v34, %v976_v15  ;;  %v627_v20 = vadd.f32 %v620_v31, %v3276_v41  ;;  %v328_v29 = vpop.permute.xlu1 %327  ;;  %v307_v6 = vpop.permute.xlu0 %306  ;;  %v1029_v41 = vmul.f32 %v3188_v13, %v3357_v48 }
 0x139   :  { %v345_v26 = vsel %vm340_vm2, %v307_v6, %v328_v29 }
 0x13a   :  { %v1006_v22 = vadd.f32 %v999_v33, %v991_v63  ;;  %v352_v46 = vmul.f32 %v345_v26, %v3026_v11  ;;  %v776_v27 = vmul.f32 %v345_v26, %v3237_v39  ;;  %601 = vrot.lane.b32.xlu1 %v3008_v61, %s2661_s22  ;;  %580 = vrot.lane.b32.xlu0 %v3008_v61, %s2662_s23  ;;  %v3368_v33 = vld [vmem:[#allocation7 + $0xc0] sm:$0xff] }
 0x13b   :  { %v849_v63 = vmul.f32 %v3188_v13, %v3272_v54  ;;  %v1044_v2 = vmul.f32 %v3262_v24, %v3368_v33 }
 0x13c   :  { %v1021_v34 = vadd.f32 %v1014_v12, %v1006_v22  ;;  %v3364_v15 = vadd.f32 %v352_v46, %v295_v30  ;;  %v3366_v31 = vadd.f32 %v776_v27, %v754_v32  ;;  %v596_v26 = vpop.permute.xlu1 %595  ;;  %v575_v53 = vpop.permute.xlu0 %574  ;;  %v3381_v30 = vld [vmem:[#allocation7 + $0xc8] sm:$0xff]  ;;  %v909_v12 = vmul.f32 %v613_v60, %v3285_v21 }
 0x13d   :  { %v3377_v22 = vsel %vm610_vm6, %v575_v53, %v596_v26  ;;  %v857_v32 = vadd.f32 %v849_v63, %v827_v19  ;;  %v1059_v24 = vmul.f32 %v613_v60, %v3381_v30  ;;  %v154_v46 = vadd.f32 %v146_v10, %v2776_v3  ;;  %v3390_v26 = vld [vmem:[#allocation7 + $0xd0] sm:$0xff] }
 0x13e   :  { %v1036_v29 = vadd.f32 %v1029_v41, %v1021_v34  ;;  %663 = vrot.lane.b32.xlu1 %v2970_v42, %s2663_s24  ;;  %v621_v13 = vmul.f32 %v3377_v22, %v3185_v8  ;;  %642 = vrot.lane.b32.xlu0 %v2970_v42, %s2664_s25  ;;  %v714_v3 = vmul.f32 %v3011_v62, %v3206_v36 }
 0x13f   :  { %v887_v27 = vadd.f32 %v879_v9, %v857_v32  ;;  %v820_v9 = vmul.f32 %v2824_v14, %v3259_v23  ;;  %v1015_v32 = vmul.f32 %v2824_v14, %v3333_v55 }
 0x140   :  { %v1051_v6 = vadd.f32 %v1044_v2, %v1036_v29  ;;  %v658_v45 = vpop.permute.xlu1 %657  ;;  %v628_v41 = vadd.f32 %v621_v13, %v564_v43  ;;  %v637_v34 = vpop.permute.xlu0 %636  ;;  %v3402_v43 = vld [vmem:[#allocation5 + $0x10] sm:$0xff]  ;;  %v955_v13 = vmul.f32 %v3011_v62, %v3310_v40 }
 0x141   :  { %v677_v63 = vsel %vm674_vm7, %v637_v34, %v658_v45  ;;  %v917_v53 = vadd.f32 %v909_v12, %v887_v27  ;;  %4092 = vst [vmem:[#allocation22_spill] sm:$0xff] %v3402_v43  ;;  %v3408_v12 = vmax.f32 %v154_v46, 0.0  ;;  %v744_v34 = vmul.f32 %v3016_v1, %v3226_v7 }
 0x142   :  { %v1066_v19 = vadd.f32 %v1059_v24, %v1051_v6  ;;  %930 = vrot.lane.b32.xlu1 %v2959_v38, %s2663_s24  ;;  %v684_v29 = vmul.f32 %v677_v63, %v3210_v0  ;;  %v939_v60 = vmul.f32 %v677_v63, %v3298_v17  ;;  %v1074_v2 = vmul.f32 %v677_v63, %v3390_v26 }
 0x143   :  { %924 = vrot.lane.b32.xlu0 %v2959_v38, %s2664_s25  ;;  %v970_v63 = vmul.f32 %v3016_v1, %v3323_v16  ;;  %v774_v38 = vmul.f32 %v3050_v35, %v3237_v39  ;;  %v985_v1 = vmul.f32 %v3050_v35, %v3329_v57 }
 0x144   :  { %v392_v10 = vpop.permute.xlu1 %391  ;;  %v691_v6 = vadd.f32 %v684_v29, %v627_v20  ;;  %v947_v24 = vadd.f32 %v939_v60, %v917_v53  ;;  %v1081_v45 = vadd.f32 %v1074_v2, %v1066_v19  ;;  %v371_v27 = vpop.permute.xlu0 %370  ;;  %v804_v53 = vmul.f32 %v3108_v5, %v3251_v44 }
 0x145   :  { %v409_v14 = vsel %vm404_vm3, %v371_v27, %v392_v10  ;;  %v1000_v29 = vmul.f32 %v3108_v5, %v3341_v51 }
 0x146   :  { %665 = vrot.lane.b32.xlu1 %v3008_v61, %s2663_s24  ;;  %v722_v46 = vadd.f32 %v714_v3, %v691_v6  ;;  %v962_v62 = vadd.f32 %v955_v13, %v947_v24  ;;  %v1089_v20 = vadd.f32 %v1081_v45, %v3402_v43  ;;  %v416_v19 = vmul.f32 %v409_v14, %v3058_v47 }
 0x147   :  { %644 = vrot.lane.b32.xlu0 %v3008_v61, %s2664_s25  ;;  %v806_v60 = vmul.f32 %v409_v14, %v3251_v44 }
 0x148   :  { %v660_v2 = vpop.permute.xlu1 %659  ;;  %v752_v3 = vadd.f32 %v744_v34, %v722_v46  ;;  %v977_v10 = vadd.f32 %v970_v63, %v962_v62  ;;  %v1098_v13 = vsel %vm1097_vm8, %v1089_v20, 0.0  ;;  %v1170_v47 = vrot.slane %v1089_v20, 4  ;;  %v639_v6 = vpop.permute.xlu0 %638 }
 0x149   :  { %v1099_v24 = vrot.slane %v1098_v13, 4  ;;  %v3434_v45 = vadd.f32 %v416_v19, %v3364_v15  ;;  %v3437_v35 = vadd.f32 %v806_v60, %v3366_v31  ;;  %v678_v27 = vsel %vm674_vm7, %v639_v6, %v660_v2 }
 0x14a   :  { %706 = vrot.lane.b32.xlu1 %v3408_v12, %s2650_s12  ;;  %v782_v5 = vadd.f32 %v774_v38, %v752_v3  ;;  %v992_v14 = vadd.f32 %v985_v1, %v977_v10  ;;  %v1186_v34 = vsel %vm1097_vm8, %v1170_v47, 0.0  ;;  %v685_v63 = vmul.f32 %v678_v27, %v3210_v0 }
 0x14b   :  { %700 = vrot.lane.b32.xlu0 %v3408_v12, %s2651_s1  ;;  %v1187_v46 = vrot.slane %v1186_v34, 4  ;;  %v850_v60 = vmul.f32 %v3242_v56, %v3272_v54  ;;  %v1100_v2 = vadd.f32 %v1099_v24, %v1098_v13  ;;  %v1030_v1 = vmul.f32 %v3242_v56, %v3357_v48 }
 0x14c   :  { %v705_v15 = vpop.permute.xlu1 %704  ;;  %v812_v62 = vadd.f32 %v804_v53, %v782_v5  ;;  %v1007_v20 = vadd.f32 %v1000_v29, %v992_v14  ;;  %v692_v31 = vadd.f32 %v685_v63, %v628_v41  ;;  %v699_v19 = vpop.permute.xlu0 %698  ;;  %v880_v41 = vmul.f32 %v3315_v28, %v3280_v37 }
 0x14d   :  { %v710_v38 = vsel %vm212_vm0, %v699_v19, %v705_v15  ;;  %v1188_v53 = vadd.f32 %v1187_v46, %v1186_v34  ;;  %v1045_v13 = vmul.f32 %v3315_v28, %v3368_v33  ;;  %v910_v14 = vmul.f32 %v3377_v22, %v3285_v21 }
 0x14e   :  { %736 = vrot.lane.b32.xlu1 %v3408_v12, %s2646_s28  ;;  %v828_v3 = vadd.f32 %v820_v9, %v812_v62  ;;  %v1022_v10 = vadd.f32 %v1015_v32, %v1007_v20  ;;  %v715_v47 = vmul.f32 %v710_v38, %v3206_v36  ;;  %v1101_v9 = vrot.slane %v1100_v2, 2 }
 0x14f   :  { %730 = vrot.lane.b32.xlu0 %v3408_v12, %s2652_s13  ;;  %v1060_v34 = vmul.f32 %v3377_v22, %v3381_v30  ;;  %v1189_v46 = vrot.slane %v1188_v53, 2  ;;  %v430_v62 = vmul.f32 %v2892_v18, %v3143_v25  ;;  %v956_v22 = vmul.f32 %v710_v38, %v3310_v40 }
 0x150   :  { %v202_v29 = vpop.permute.xlu1 %201  ;;  %v858_v6 = vadd.f32 %v850_v60, %v828_v3  ;;  %v1037_v24 = vadd.f32 %v1030_v1, %v1022_v10  ;;  %v3460_v5 = vadd.f32 %v715_v47, %v692_v31  ;;  %v181_v56 = vpop.permute.xlu0 %180  ;;  %v940_v31 = vmul.f32 %v678_v27, %v3298_v17 }
 0x151   :  { %v3463_v32 = vsel %vm212_vm0, %v181_v56, %v202_v29  ;;  %v1075_v60 = vmul.f32 %v678_v27, %v3390_v26  ;;  %v1102_v3 = vadd.f32 %v1101_v9, %v1100_v2  ;;  %v822_v47 = vmul.f32 %v2892_v18, %v3259_v23 }
 0x152   :  { %766 = vrot.lane.b32.xlu1 %v3408_v12, %s2653_s3  ;;  %v888_v63 = vadd.f32 %v880_v41, %v858_v6  ;;  %v1052_v28 = vadd.f32 %v1045_v13, %v1037_v24  ;;  %v225_v13 = vmul.f32 %v3463_v32, %v2981_v49  ;;  %v1190_v2 = vadd.f32 %v1189_v46, %v1188_v53 }
 0x153   :  { %760 = vrot.lane.b32.xlu0 %v3408_v12, %s2654_s14  ;;  %v437_v18 = vadd.f32 %v430_v62, %v3434_v45 }
 0x154   :  { %v266_v15 = vpop.permute.xlu1 %265  ;;  %v918_v20 = vadd.f32 %v910_v14, %v888_v63  ;;  %v1067_v19 = vadd.f32 %v1060_v34, %v1052_v28  ;;  %v245_v1 = vpop.permute.xlu0 %244  ;;  %v1103_v14 = vrot.slane %v1102_v3, 1  ;;  %v830_v34 = vadd.f32 %v822_v47, %v3437_v35 }
 0x155   :  { %v3479_v10 = vsel %vm276_vm1, %v245_v1, %v266_v15 }
 0x156   :  { %796 = vrot.lane.b32.xlu1 %v3408_v12, %s2655_s15  ;;  %v948_v41 = vadd.f32 %v940_v31, %v918_v20  ;;  %v1082_v29 = vadd.f32 %v1075_v60, %v1067_v19  ;;  %v289_v27 = vmul.f32 %v3479_v10, %v2983_v50  ;;  %v1191_v20 = vrot.slane %v1190_v2, 1 }
 0x157   :  { %790 = vrot.lane.b32.xlu0 %v3408_v12, %s2656_s16  ;;  %v1104_v1 = vadd.f32 %v1103_v14, %v1102_v3 }
 0x158   :  { %v470_v38 = vpop.permute.xlu1 %469  ;;  %v1090_v6 = vadd.f32 %v1082_v29, %v3402_v43  ;;  %v963_v24 = vadd.f32 %v956_v22, %v948_v41  ;;  %v296_v56 = vadd.f32 %v289_v27, %v225_v13  ;;  %v449_v9 = vpop.permute.xlu0 %448  ;;  %v1192_v27 = vadd.f32 %v1191_v20, %v1190_v2 }
 0x159   :  { %v487_v63 = vsel %vm482_vm4, %v449_v9, %v470_v38  ;;  %2459 = vtanh.f32 %v1104_v1 }
 0x15a   :  { %842 = vrot.lane.b32.xlu1 %v3408_v12, %s2657_s17  ;;  %v1105_v28 = vsel %vm1097_vm8, %v1090_v6, 0.0  ;;  %v1171_v15 = vrot.slane %v1090_v6, 4  ;;  %v494_v53 = vmul.f32 %v487_v63, %v3158_v52  ;;  %v852_v46 = vmul.f32 %v487_v63, %v3272_v54 }
 0x15b   :  { %836 = vrot.lane.b32.xlu0 %v3408_v12, %s2658_s19  ;;  %v1106_v31 = vrot.slane %v1105_v28, 4  ;;  %2461 = vtanh.f32 %v1192_v27 }
 0x15c   :  { %v735_v45 = vpop.permute.xlu1 %734  ;;  %v1193_v35 = vsel %vm1097_vm8, %v1171_v15, 0.0  ;;  %v501_v62 = vadd.f32 %v494_v53, %v437_v18  ;;  %v860_v19 = vadd.f32 %v852_v46, %v830_v34  ;;  %v729_v60 = vpop.permute.xlu0 %728 }
 0x15d   :  { %v1107_v22 = vadd.f32 %v1106_v31, %v1105_v28  ;;  %v1194_v47 = vrot.slane %v1193_v35, 4  ;;  %v740_v41 = vsel %vm276_vm1, %v729_v60, %v735_v45 }
 0x15e   :  { %872 = vrot.lane.b32.xlu1 %v3408_v12, %s2659_s20  ;;  %v745_v29 = vmul.f32 %v740_v41, %v3226_v7  ;;  %v971_v13 = vmul.f32 %v740_v41, %v3323_v16 }
 0x15f   :  { %866 = vrot.lane.b32.xlu0 %v3408_v12, %s2660_s21  ;;  %v1108_v38 = vrot.slane %v1107_v22, 2  ;;  %v1195_v6 = vadd.f32 %v1194_v47, %v1193_v35 }
 0x160   :  { %v204_v9 = vpop.permute.xlu1 %203  ;;  %v3511_v3 = vadd.f32 %v745_v29, %v3460_v5  ;;  %v3513_v14 = vadd.f32 %v971_v13, %v963_v24  ;;  %v183_v18 = vpop.permute.xlu0 %182 }
 0x161   :  { %v1109_v34 = vadd.f32 %v1108_v38, %v1107_v22  ;;  %v1196_v63 = vrot.slane %v1195_v6, 2  ;;  %v3516_v28 = vsel %vm212_vm0, %v183_v18, %v204_v9  ;;  %v2491_v18 = vld [vmem:[#allocation2] sm:$0xff] }
 0x162   :  { %902 = vrot.lane.b32.xlu1 %v3408_v12, %s2661_s22  ;;  %v226_v31 = vmul.f32 %v3516_v28, %v2981_v49 }
 0x163   :  { %896 = vrot.lane.b32.xlu0 %v3408_v12, %s2662_s23  ;;  %v1110_v2 = vrot.slane %v1109_v34, 1  ;;  %v1197_v15 = vadd.f32 %v1196_v63, %v1195_v6  ;;  %v2460_v29 = vpop.eup %2459 }
 0x164   :  { %v268_v5 = vpop.permute.xlu1 %267  ;;  %v247_v53 = vpop.permute.xlu0 %246 }
 0x165   :  { %v1111_v24 = vadd.f32 %v1110_v2, %v1109_v34  ;;  %v1198_v46 = vrot.slane %v1197_v15, 1  ;;  %v3523_v20 = vsel %vm276_vm1, %v247_v53, %v268_v5  ;;  %v2462_v27 = vpop.eup %2461  ;;  %v1250_v34 = vmul.f32 %v2491_v18, %v2460_v29  ;;  %v76_v29 = vld [vmem:[#allocation2 + $0x18] sm:$0xff] }
 0x166   :  { %932 = vrot.lane.b32.xlu1 %v3408_v12, %s2663_s24  ;;  %v290_v45 = vmul.f32 %v3523_v20, %v2983_v50  ;;  %v1258_v53 = vmul.f32 %v2491_v18, %v2462_v27 }
 0x167   :  { %926 = vrot.lane.b32.xlu0 %v3408_v12, %s2664_s25  ;;  %2463 = vtanh.f32 %v1111_v24  ;;  %v1199_v35 = vadd.f32 %v1198_v46, %v1197_v15 }
 0x168   :  { %v330_v60 = vpop.permute.xlu1 %329  ;;  %v297_v1 = vadd.f32 %v290_v45, %v226_v31  ;;  %v309_v22 = vpop.permute.xlu0 %308  ;;  %v1266_v31 = vsub.f32 %v2491_v18, %v1250_v34 }
 0x169   :  { %2465 = vtanh.f32 %v1199_v35  ;;  %v3534_v47 = vsel %vm340_vm2, %v309_v22, %v330_v60  ;;  %v74_v60 = vld [vmem:[#allocation2 + $0x8] sm:$0xff] }
 0x16a   :  { %v353_v41 = vmul.f32 %v3534_v47, %v3026_v11 }
 0x16c   :  { %v534_v49 = vpop.permute.xlu1 %533  ;;  %v3538_v13 = vadd.f32 %v353_v41, %v296_v56  ;;  %v513_v50 = vpop.permute.xlu0 %512  ;;  %v3547_v56 = vld [vmem:[#allocation2 + $0x20] sm:$0xff]  ;;  %v1300_v41 = vsub.f32 %v2491_v18, %v1258_v53 }
 0x16d   :  { %v551_v38 = vsel %vm546_vm5, %v513_v50, %v534_v49  ;;  %v3559_v50 = vld [vmem:[#allocation8] sm:$0xff] }
 0x16e   :  { %v558_v6 = vmul.f32 %v551_v38, %v3171_v4  ;;  %v882_v9 = vmul.f32 %v551_v38, %v3280_v37  ;;  %4094 = vst [vmem:[#allocation24_spill] sm:$0xff] %v3559_v50  ;;  %2253 = vmatprep.mubr.msk.f32.mxu0 %vm1373_vm10, %v3559_v50  ;;  %2269 = vmatprep.mubr.msk.f32.mxu1 %vm1373_vm10, %v3559_v50 }
 0x170   :  { %v3543_v63 = vpop.permute.xlu1 %764  ;;  %v565_v2 = vadd.f32 %v558_v6, %v501_v62  ;;  %v890_v15 = vadd.f32 %v882_v9, %v860_v19  ;;  %v3545_v5 = vpop.permute.xlu0 %758  ;;  %v75_v19 = vld [vmem:[#allocation2 + $0x10] sm:$0xff] }
 0x171   :  { %v2464_v24 = vpop.eup %2463  ;;  %v2375_v34 = vpack.c.bf16 %v76_v29, %v75_v19  ;;  %v3580_v19 = vld [vmem:[#allocation8 + $0x8] sm:$0xff]  ;;  %v3582_v29 = vld [vmem:[#allocation8 + $0x10] sm:$0xff] }
 0x172   :  { %v3550_v46 = vmul.f32 %v3547_v56, %v2464_v24  ;;  %4096 = vst [vmem:[#allocation26_spill] sm:$0xff] %v3580_v19  ;;  %4097 = vst [vmem:[#allocation27_spill] sm:$0xff] %v3582_v29 }
 0x173   :  { %v2466_v45 = vpop.eup %2465 }
 0x174   :  { %v332_v4 = vpop.permute.xlu1 %331  ;;  %v311_v35 = vpop.permute.xlu0 %310  ;;  %v1274_v22 = vadd.f32 %v1266_v31, %v3550_v46  ;;  %v3554_v62 = vmul.f32 %v3547_v56, %v2466_v45 }
 0x175   :  { %v3557_v49 = vsel %vm340_vm2, %v311_v35, %v332_v4 }
 0x176   :  { %4093 = vst [vmem:[#allocation23_spill] sm:$0xff] %v3554_v62  ;;  %v354_v27 = vmul.f32 %v3557_v49, %v3026_v11  ;;  %v1365_v38 = vsel %vm1364_vm9, %v1274_v22, %v1300_v41  ;;  %v1301_v18 = vsub.f32 %v3547_v56, %v3554_v62  ;;  %v1288_v11 = vrot.slane %v1258_v53, 4 }
 0x177   :  { %v2371_v9 = vpack.c.bf16 %v74_v60, %v1365_v38  ;;  %v4064_v41 = vmov 1.0  }
 0x178   :  { %v3566_v6 = vpop.permute.xlu1 %393  ;;  %v3572_v24 = vadd.f32 %v354_v27, %v297_v1  ;;  %v3574_v31 = vpop.permute.xlu0 %372  ;;  %v1317_v45 = vrot.slane %v1301_v18, 4 }
 0x179   :  { %2372 = vmatprep.subr.bf16.mxu0 %v2371_v9 }
 0x17a   :  { %2374 = vmatpush3.bf16.msra.mxu0 %v2371_v9  ;;  %v3576_v35 = vadd.f32 %v1317_v45, %v1288_v11  ;;  %v3591_v9 = vld [vmem:[#allocation8 + $0x18] sm:$0xff] }
 0x17b   :  { %2376 = vmatprep.subr.bf16.mxu0 %v2375_v34  ;;  %4098 = vst [vmem:[#allocation28_spill] sm:$0xff] %v3591_v9 }
 0x17c   :  { %v598_v4 = vpop.permute.xlu1 %597  ;;  %4095 = vst [vmem:[#allocation25_spill] sm:$0xff] %v3576_v35  ;;  %v577_v60 = vpop.permute.xlu0 %576 }
 0x17d   :  { %v615_v53 = vsel %vm610_vm6, %v577_v60, %v598_v4 }
 0x17e   :  { %2378 = vmatpush3.bf16.msra.mxu0 %v2375_v34  ;;  %v622_v18 = vmul.f32 %v615_v53, %v3185_v8  ;;  %v912_v34 = vmul.f32 %v615_v53, %v3285_v21  ;;  %v717_v8 = vmul.f32 %v3463_v32, %v3206_v36  ;;  %v958_v53 = vmul.f32 %v3463_v32, %v3310_v40 }
 0x17f   :  { %2251 = vmatprep.subr.msk.mxu0 %vm1386_vm11, %v4064_v41 }
 0x180   :  { %v795_v22 = vpop.permute.xlu1 %794  ;;  %v789_v1 = vpop.permute.xlu0 %788  ;;  %v629_v60 = vadd.f32 %v622_v18, %v565_v2  ;;  %v973_v2 = vmul.f32 %v3479_v10, %v3323_v16 }
 0x182   :  { %2252 = vmatpush3.msk.msra.mxu0 %vm1386_vm11, %v4064_v41  ;;  %v920_v41 = vadd.f32 %v912_v34, %v890_v15  ;;  %v777_v34 = vmul.f32 %v3534_v47, %v3237_v39 }
 0x183   :  { %2254 = vmatmul.mubr.msk.f32.vlgmr.msra.gmra.mrb[0].mxu0 %vm1373_vm10, %v3580_v19 }
 0x184   :  { %v396_v27 = vpop.permute.xlu1 %395  ;;  %v375_v38 = vpop.permute.xlu0 %374  ;;  %2256 = vmatprep.mubr.msk.f32.mxu0 %vm1373_vm10, %v3582_v29 }
 0x187   :  { %2257 = vmatmul.mubr.msk.f32.gmra.mrb[2].mxu0 %vm1373_vm10, %v3591_v9 }
 0x188   :  { %v662_v11 = vpop.permute.xlu1 %661  ;;  %v641_v45 = vpop.permute.xlu0 %640  ;;  %2285 = vmatprep.mubr.msk.f32.mxu0 %vm1373_vm10, %v3559_v50 }
 0x189   :  { %v679_v4 = vsel %vm674_vm7, %v641_v45, %v662_v11  ;;  %v747_v11 = vmul.f32 %v3479_v10, %v3226_v7  ;;  %v988_v45 = vmul.f32 %v3534_v47, %v3329_v57  ;;  %v3632_v47 = vmul.f32 %v3083_v59, %v3323_v16 }
 0x18a   :  { %v686_v29 = vmul.f32 %v679_v4, %v3210_v0  ;;  %v942_v19 = vmul.f32 %v679_v4, %v3298_v17  ;;  %v410_v59 = vsel %vm404_vm3, %v3574_v31, %v3566_v6  ;;  %v800_v31 = vsel %vm404_vm3, %v789_v1, %v795_v22 }
 0x18b   :  { %4100 = vst [vmem:[#allocation30_spill] sm:$0xff] %v3632_v47  ;;  %v411_v47 = vsel %vm404_vm3, %v375_v38, %v396_v27  ;;  %v1018_v22 = vmul.f32 %v2970_v42, %v3333_v55  ;;  %v1001_v27 = vmul.f32 %v800_v31, %v3341_v51 }
 0x18c   :  { %v3602_v62 = vpop.permute.xlu1 %471  ;;  %v693_v9 = vadd.f32 %v686_v29, %v629_v60  ;;  %v950_v35 = vadd.f32 %v942_v19, %v920_v41  ;;  %v451_v43 = vpop.permute.xlu0 %450 }
 0x18e   :  { %v725_v0 = vadd.f32 %v717_v8, %v693_v9  ;;  %v965_v15 = vadd.f32 %v958_v53, %v950_v35  ;;  %v3628_v9 = vmul.f32 %v3078_v58, %v3310_v40  ;;  %v4101_v8 = vld [vmem:[#allocation16_spill] sm:$0xff]  ;;  %v770_v58 = vsel %vm340_vm2, %v3545_v5, %v3543_v63 }
 0x18f   :  { %v3636_v53 = vmul.f32 %v4101_v8, %v3329_v57  ;;  %v4109_v8 = vld [vmem:[#allocation15_spill] sm:$0xff]  ;;  %v4110_v5 = vld [vmem:[#allocation20_spill] sm:$0xff] }
 0x190   :  { %v3612_v18 = vpop.permute.xlu1 %840  ;;  %v755_v32 = vadd.f32 %v747_v11, %v725_v0  ;;  %v980_v29 = vadd.f32 %v973_v2, %v965_v15  ;;  %v835_v41 = vpop.permute.xlu0 %834  ;;  %4099 = vst [vmem:[#allocation29_spill] sm:$0xff] %v3628_v9  ;;  %v4103_v11 = vld [vmem:[#allocation17_spill] sm:$0xff]  ;;  %v4105_v0 = vld [vmem:[#allocation18_spill] sm:$0xff]  ;;  %v3668_v6 = vmul.f32 %v4110_v5, %v3381_v30 }
 0x191   :  { %4102 = vst [vmem:[#allocation16_spill] sm:$0xff] %v3636_v53  ;;  %v3640_v2 = vmul.f32 %v4103_v11, %v3341_v51  ;;  %v3644_v15 = vmul.f32 %v4105_v0, %v3357_v48  ;;  %v821_v11 = vmul.f32 %v4109_v8, %v3259_v23  ;;  %v1016_v0 = vmul.f32 %v4109_v8, %v3333_v55  ;;  %v2493_v53 = vld [vmem:[#allocation7 + $0x18] sm:$0xff]  ;;  %v4112_v9 = vld [vmem:[#allocation21_spill] sm:$0xff] }
 0x192   :  { %v785_v19 = vadd.f32 %v777_v34, %v755_v32  ;;  %v995_v4 = vadd.f32 %v988_v45, %v980_v29  ;;  %v4107_v45 = vld [vmem:[#allocation19_spill] sm:$0xff]  ;;  %v431_v29 = vmul.f32 %v2970_v42, %v3143_v25  ;;  %4111 = vst [vmem:[#allocation15_spill] sm:$0xff] %v3668_v6  ;;  %v417_v8 = vmul.f32 %v2493_v53, %v410_v59 }
 0x193   :  { %4104 = vst [vmem:[#allocation17_spill] sm:$0xff] %v3640_v2  ;;  %4106 = vst [vmem:[#allocation18_spill] sm:$0xff] %v3644_v15  ;;  %v3656_v32 = vmul.f32 %v4107_v45, %v3368_v33  ;;  %v823_v45 = vmul.f32 %v2970_v42, %v3259_v23  ;;  %v775_v15 = vmul.f32 %v770_v58, %v3237_v39 }
 0x194   :  { %v3618_v60 = vpop.permute.xlu1 %473  ;;  %v3620_v50 = vpop.permute.xlu0 %452  ;;  %v986_v2 = vmul.f32 %v770_v58, %v3329_v57  ;;  %v3680_v5 = vmul.f32 %v4112_v9, %v3390_v26  ;;  %v3692_v58 = vmul.f32 %v3008_v61, %v3333_v55  ;;  %v805_v6 = vmul.f32 %v800_v31, %v3251_v44 }
 0x195   :  { %4108 = vst [vmem:[#allocation19_spill] sm:$0xff] %v3656_v32  ;;  %v432_v32 = vmul.f32 %v3008_v61, %v3143_v25  ;;  %v3688_v25 = vmul.f32 %v3008_v61, %v3259_v23  ;;  %v3699_v9 = vmul.f32 0.0, %v3333_v55  ;;  %v3703_v42 = vmul.f32 %v3408_v12, %v3259_v23 }
 0x196   :  { %4113 = vst [vmem:[#allocation20_spill] sm:$0xff] %v3680_v5  ;;  %4115 = vst [vmem:[#allocation31_spill] sm:$0xff] %v3692_v58  ;;  %v3707_v5 = vmul.f32 %v3516_v28, %v3206_v36  ;;  %v3711_v61 = vmul.f32 %v3516_v28, %v3310_v40  ;;  %v418_v58 = vmul.f32 %v2493_v53, %v411_v47  ;;  %v79_v28 = vld [vmem:[#allocation2 + $0x30] sm:$0xff]  ;;  %v80_v53 = vld [vmem:[#allocation2 + $0x38] sm:$0xff] }
 0x197   :  { %4114 = vst [vmem:[#allocation21_spill] sm:$0xff] %v3688_v25  ;;  %4116 = vst [vmem:[#allocation32_spill] sm:$0xff] %v3699_v9  ;;  %v3715_v31 = vmul.f32 %v3408_v12, %v3333_v55  ;;  %v3719_v9 = vmul.f32 %v3523_v20, %v3226_v7  ;;  %v783_v23 = vadd.f32 %v775_v15, %v3511_v3 }
 0x198   :  { %v3622_v10 = vpop.permute.xlu1 %535  ;;  %v3624_v35 = vpop.permute.xlu0 %514  ;;  %4117 = vst [vmem:[#allocation33_spill] sm:$0xff] %v3703_v42  ;;  %v993_v42 = vadd.f32 %v986_v2, %v3513_v14  ;;  %v424_v36 = vadd.f32 %v417_v8, %v3538_v13  ;;  %v3726_v25 = vmul.f32 %v3523_v20, %v3323_v16  ;;  %v807_v40 = vmul.f32 %v410_v59, %v3251_v44 }
 0x199   :  { %v488_v55 = vsel %vm482_vm4, %v451_v43, %v3602_v62  ;;  %v1003_v3 = vmul.f32 %v410_v59, %v3341_v51  ;;  %v813_v14 = vadd.f32 %v805_v6, %v783_v23  ;;  %v846_v13 = vsel %vm482_vm4, %v835_v41, %v3612_v18 }
 0x19a   :  { %v1008_v2 = vadd.f32 %v1001_v27, %v993_v42  ;;  %v3738_v20 = vmul.f32 %v3557_v49, %v3237_v39  ;;  %v3742_v43 = vmul.f32 %v3557_v49, %v3329_v57  ;;  %v425_v62 = vadd.f32 %v418_v58, %v3572_v24 }
 0x19b   :  { %v815_v15 = vadd.f32 %v807_v40, %v785_v19  ;;  %v438_v8 = vadd.f32 %v431_v29, %v424_v36  ;;  %v1010_v7 = vadd.f32 %v1003_v3, %v995_v4  ;;  %v495_v59 = vmul.f32 %v488_v55, %v3158_v52 }
 0x19c   :  { %v3652_v34 = vpop.permute.xlu1 %870  ;;  %v3664_v63 = vpop.permute.xlu0 %864  ;;  %v3746_v6 = vpack.c.bf16 %v80_v53, %v79_v28  ;;  %v3749_v18 = vmul.f32 %v411_v47, %v3251_v44  ;;  %v851_v41 = vmul.f32 %v846_v13, %v3272_v54  ;;  %v1031_v39 = vmul.f32 %v846_v13, %v3357_v48 }
 0x19d   :  { %v552_v57 = vsel %vm546_vm5, %v3624_v35, %v3622_v10  ;;  %v3757_v24 = vmul.f32 %v411_v47, %v3341_v51  ;;  %v829_v19 = vadd.f32 %v821_v11, %v813_v14  ;;  %v1023_v4 = vadd.f32 %v1016_v0, %v1008_v2  ;;  %v2494_v35 = vld [vmem:[#allocation7 + $0x30] sm:$0xff]  ;;  %v2495_v0 = vld [vmem:[#allocation7 + $0x28] sm:$0xff] }
 0x19e   :  { %v489_v52 = vsel %vm482_vm4, %v3620_v50, %v3618_v60  ;;  %v831_v29 = vadd.f32 %v823_v45, %v815_v15  ;;  %v853_v58 = vmul.f32 %v488_v55, %v3272_v54  ;;  %v439_v27 = vadd.f32 %v432_v32, %v425_v62 }
 0x19f   :  { %v1025_v23 = vadd.f32 %v1018_v22, %v1010_v7  ;;  %v502_v36 = vadd.f32 %v495_v59, %v438_v8  ;;  %v1033_v10 = vmul.f32 %v488_v55, %v3357_v48  ;;  %v559_v51 = vmul.f32 %v2494_v35, %v552_v57  ;;  %v2496_v22 = vld [vmem:[#allocation7 + $0x38] sm:$0xff] }
 0x1a0   :  { %v3684_v1 = vpop.permute.xlu1 %537  ;;  %v3696_v38 = vpop.permute.xlu0 %516  ;;  %v859_v47 = vadd.f32 %v851_v41, %v829_v19  ;;  %v1038_v11 = vadd.f32 %v1031_v39, %v1023_v4  ;;  %v496_v40 = vmul.f32 %v2495_v0, %v489_v52  ;;  %v883_v28 = vmul.f32 %v552_v57, %v3280_v37 }
 0x1a1   :  { %v3767_v60 = vmul.f32 %v489_v52, %v3272_v54  ;;  %v1048_v32 = vmul.f32 %v552_v57, %v3368_v33  ;;  %v876_v45 = vsel %vm546_vm5, %v3664_v63, %v3652_v34  ;;  %v861_v7 = vadd.f32 %v853_v58, %v831_v29 }
 0x1a2   :  { %v3774_v53 = vmul.f32 %v489_v52, %v3357_v48  ;;  %v553_v3 = vsel %vm546_vm5, %v3696_v38, %v3684_v1  ;;  %v1040_v14 = vadd.f32 %v1033_v10, %v1025_v23  ;;  %v566_v2 = vadd.f32 %v559_v51, %v502_v36  ;;  %v2497_v52 = vld [vmem:[#allocation7 + $0x40] sm:$0xff] }
 0x1a3   :  { %v503_v34 = vadd.f32 %v496_v40, %v439_v27  ;;  %v891_v63 = vadd.f32 %v883_v28, %v861_v7  ;;  %v881_v62 = vmul.f32 %v876_v45, %v3280_v37  ;;  %v1046_v15 = vmul.f32 %v876_v45, %v3368_v33 }
 0x1a4   :  { %v600_v12 = vpop.permute.xlu1 %599  ;;  %v579_v16 = vpop.permute.xlu0 %578  ;;  %v1055_v8 = vadd.f32 %v1048_v32, %v1040_v14  ;;  %v560_v59 = vmul.f32 %v2494_v35, %v553_v3  ;;  %v3791_v23 = vmul.f32 %v553_v3, %v3280_v37  ;;  %v3794_v35 = vmul.f32 %v553_v3, %v3368_v33  ;;  %v4118_v37 = vld [vmem:[#allocation22_spill] sm:$0xff] }
 0x1a5   :  { %v616_v42 = vsel %vm610_vm6, %v579_v16, %v600_v12  ;;  %v889_v27 = vadd.f32 %v881_v62, %v859_v47 }
 0x1a6   :  { %v623_v55 = vmul.f32 %v2496_v22, %v616_v42  ;;  %v913_v54 = vmul.f32 %v616_v42, %v3285_v21  ;;  %v1063_v13 = vmul.f32 %v616_v42, %v3381_v30  ;;  %v1053_v42 = vadd.f32 %v1046_v15, %v1038_v11 }
 0x1a8   :  { %v901_v49 = vpop.permute.xlu1 %900  ;;  %v895_v44 = vpop.permute.xlu0 %894  ;;  %v630_v41 = vadd.f32 %v623_v55, %v566_v2  ;;  %v921_v39 = vadd.f32 %v913_v54, %v891_v63  ;;  %v1070_v4 = vadd.f32 %v1063_v13, %v1055_v8 }
 0x1a9   :  { %v906_v16 = vsel %vm610_vm6, %v895_v44, %v901_v49 }
 0x1aa   :  { %v911_v57 = vmul.f32 %v906_v16, %v3285_v21  ;;  %v1061_v19 = vmul.f32 %v906_v16, %v3381_v30 }
 0x1ac   :  { %v602_v50 = vpop.permute.xlu1 %601  ;;  %v581_v12 = vpop.permute.xlu0 %580  ;;  %v919_v32 = vadd.f32 %v911_v57, %v889_v27  ;;  %v1068_v45 = vadd.f32 %v1061_v19, %v1053_v42  ;;  %v4121_v42 = vld [vmem:[#allocation21_spill] sm:$0xff] }
 0x1ad   :  { %v617_v1 = vsel %vm610_vm6, %v581_v12, %v602_v50  ;;  %v567_v50 = vadd.f32 %v560_v59, %v503_v34 }
 0x1ae   :  { %v624_v36 = vmul.f32 %v2496_v22, %v617_v1  ;;  %v914_v33 = vmul.f32 %v617_v1, %v3285_v21  ;;  %v1064_v3 = vmul.f32 %v617_v1, %v3381_v30 }
 0x1b0   :  { %v664_v48 = vpop.permute.xlu1 %663  ;;  %v643_v38 = vpop.permute.xlu0 %642  ;;  %v631_v7 = vadd.f32 %v624_v36, %v567_v50 }
 0x1b1   :  { %v680_v49 = vsel %vm674_vm7, %v643_v38, %v664_v48 }
 0x1b2   :  { %v687_v44 = vmul.f32 %v2497_v52, %v680_v49  ;;  %v943_v29 = vmul.f32 %v680_v49, %v3298_v17  ;;  %v1078_v58 = vmul.f32 %v680_v49, %v3390_v26 }
 0x1b4   :  { %v931_v10 = vpop.permute.xlu1 %930  ;;  %v694_v51 = vadd.f32 %v687_v44, %v630_v41  ;;  %v951_v0 = vadd.f32 %v943_v29, %v921_v39  ;;  %v1085_v40 = vadd.f32 %v1078_v58, %v1070_v4  ;;  %v4119_v41 = vld [vmem:[#allocation29_spill] sm:$0xff]  ;;  %v4120_v44 = vld [vmem:[#allocation30_spill] sm:$0xff] }
 0x1b5   :  { %v925_v28 = vpop.permute.xlu0 %924 }
 0x1b6   :  { %v936_v55 = vsel %vm674_vm7, %v925_v28, %v931_v10  ;;  %v726_v47 = vadd.f32 %v3707_v5, %v694_v51  ;;  %v966_v11 = vadd.f32 %v3711_v61, %v951_v0  ;;  %v1093_v12 = vadd.f32 %v1085_v40, %v4118_v37  ;;  %v4122_v10 = vld [vmem:[#allocation31_spill] sm:$0xff]  ;;  %v4123_v40 = vld [vmem:[#allocation16_spill] sm:$0xff] }
 0x1b7   :  { %v941_v22 = vmul.f32 %v936_v55, %v3298_v17  ;;  %v1076_v54 = vmul.f32 %v936_v55, %v3390_v26 }
 0x1b8   :  { %v666_v14 = vpop.permute.xlu1 %665  ;;  %v756_v2 = vadd.f32 %v3719_v9, %v726_v47  ;;  %v981_v13 = vadd.f32 %v3726_v25, %v966_v11  ;;  %v1126_v5 = vsel %vm1097_vm8, %v1093_v12, 0.0  ;;  %v1174_v16 = vrot.slane %v1093_v12, 4 }
 0x1b9   :  { %v645_v61 = vpop.permute.xlu0 %644  ;;  %v1127_v34 = vrot.slane %v1126_v5, 4  ;;  %v949_v63 = vadd.f32 %v941_v22, %v919_v32  ;;  %v1083_v62 = vadd.f32 %v1076_v54, %v1068_v45  ;;  %v4124_v22 = vld [vmem:[#allocation17_spill] sm:$0xff] }
 0x1ba   :  { %v681_v15 = vsel %vm674_vm7, %v645_v61, %v666_v14  ;;  %v786_v21 = vadd.f32 %v3738_v20, %v756_v2  ;;  %v996_v30 = vadd.f32 %v3742_v43, %v981_v13  ;;  %v1214_v48 = vsel %vm1097_vm8, %v1174_v16, 0.0  ;;  %v4125_v61 = vld [vmem:[#allocation32_spill] sm:$0xff] }
 0x1bb   :  { %v688_v8 = vmul.f32 %v2497_v52, %v681_v15  ;;  %v1128_v59 = vadd.f32 %v1127_v34, %v1126_v5  ;;  %v1215_v9 = vrot.slane %v1214_v48, 4  ;;  %v964_v25 = vadd.f32 %v4119_v41, %v949_v63 }
 0x1bc   :  { %v1091_v1 = vadd.f32 %v1083_v62, %v4118_v37  ;;  %v707_v38 = vpop.permute.xlu1 %706  ;;  %v816_v39 = vadd.f32 %v3749_v18, %v786_v21  ;;  %v1011_v57 = vadd.f32 %v3757_v24, %v996_v30  ;;  %v944_v49 = vmul.f32 %v681_v15, %v3298_v17  ;;  %v2498_v21 = vld [vmem:[#allocation7 + $0x48] sm:$0xff] }
 0x1bd   :  { %v695_v19 = vadd.f32 %v688_v8, %v631_v7  ;;  %v701_v20 = vpop.permute.xlu0 %700  ;;  %v1129_v4 = vrot.slane %v1128_v59, 2  ;;  %v1216_v43 = vadd.f32 %v1215_v9, %v1214_v48  ;;  %v979_v29 = vadd.f32 %v4120_v44, %v964_v25 }
 0x1be   :  { %v1112_v52 = vsel %vm1097_vm8, %v1091_v1, 0.0  ;;  %v1172_v27 = vrot.slane %v1091_v1, 4  ;;  %v832_v36 = vadd.f32 %v4121_v42, %v816_v39  ;;  %v1026_v51 = vadd.f32 %v4122_v10, %v1011_v57  ;;  %v4127_v39 = vld [vmem:[#allocation19_spill] sm:$0xff] }
 0x1bf   :  { %v1113_v58 = vrot.slane %v1112_v52, 4  ;;  %v1130_v0 = vadd.f32 %v1129_v4, %v1128_v59  ;;  %v1217_v18 = vrot.slane %v1216_v43, 2  ;;  %v994_v24 = vadd.f32 %v4123_v40, %v979_v29  ;;  %v4126_v59 = vld [vmem:[#allocation18_spill] sm:$0xff]  ;;  %v4128_v42 = vld [vmem:[#allocation15_spill] sm:$0xff] }
 0x1c0   :  { %v1079_v28 = vmul.f32 %v681_v15, %v3390_v26  ;;  %v737_v17 = vpop.permute.xlu1 %736  ;;  %v1200_v32 = vsel %vm1097_vm8, %v1172_v27, 0.0  ;;  %v862_v45 = vadd.f32 %v3767_v60, %v832_v36  ;;  %v1041_v55 = vadd.f32 %v3774_v53, %v1026_v51  ;;  %v2499_v4 = vld [vmem:[#allocation7 + $0x90] sm:$0xff] }
 0x1c1   :  { %v1114_v50 = vadd.f32 %v1113_v58, %v1112_v52  ;;  %v731_v47 = vpop.permute.xlu0 %730  ;;  %v1131_v11 = vrot.slane %v1130_v0, 1  ;;  %v1218_v12 = vadd.f32 %v1217_v18, %v1216_v43  ;;  %v1009_v7 = vadd.f32 %v4124_v22, %v994_v24  ;;  %v2501_v24 = vld [vmem:[#allocation7 + $0x98] sm:$0xff] }
 0x1c2   :  { %v1201_v54 = vrot.slane %v1200_v32, 4  ;;  %v892_v2 = vadd.f32 %v3791_v23, %v862_v45  ;;  %v1056_v13 = vadd.f32 %v3794_v35, %v1041_v55  ;;  %v711_v26 = vsel %vm212_vm0, %v701_v20, %v707_v38 }
 0x1c3   :  { %v1115_v14 = vrot.slane %v1114_v50, 2  ;;  %v1132_v5 = vadd.f32 %v1131_v11, %v1130_v0  ;;  %v1219_v16 = vrot.slane %v1218_v12, 1  ;;  %v1024_v34 = vadd.f32 %v4125_v61, %v1009_v7  ;;  %v2502_v7 = vld [vmem:[#allocation7 + $0x58] sm:$0xff] }
 0x1c4   :  { %v1202_v60 = vadd.f32 %v1201_v54, %v1200_v32  ;;  %v767_v63 = vpop.permute.xlu1 %766  ;;  %v922_v62 = vadd.f32 %v914_v33, %v892_v2  ;;  %v1071_v15 = vadd.f32 %v1064_v3, %v1056_v13  ;;  %v719_v30 = vmul.f32 %v2498_v21, %v711_v26 }
 0x1c5   :  { %v1116_v53 = vadd.f32 %v1115_v14, %v1114_v50  ;;  %v761_v48 = vpop.permute.xlu0 %760  ;;  %2467 = vtanh.f32 %v1132_v5  ;;  %v1220_v8 = vadd.f32 %v1219_v16, %v1218_v12  ;;  %v1039_v23 = vadd.f32 %v4126_v59, %v1024_v34  ;;  %v4129_v50 = vld [vmem:[#allocation20_spill] sm:$0xff] }
 0x1c6   :  { %v1203_v9 = vrot.slane %v1202_v60, 2  ;;  %v952_v25 = vadd.f32 %v944_v49, %v922_v62  ;;  %v1086_v1 = vadd.f32 %v1079_v28, %v1071_v15  ;;  %v727_v38 = vadd.f32 %v719_v30, %v695_v19  ;;  %v2500_v19 = vld [vmem:[#allocation7 + $0x50] sm:$0xff]  ;;  %v2503_v14 = vld [vmem:[#allocation7 + $0xa0] sm:$0xff] }
 0x1c7   :  { %v1117_v35 = vrot.slane %v1116_v53, 1  ;;  %2469 = vtanh.f32 %v1220_v8  ;;  %v1054_v57 = vadd.f32 %v4127_v39, %v1039_v23  ;;  %v960_v43 = vmul.f32 %v2499_v4, %v711_v26 }
 0x1c8   :  { %v1204_v20 = vadd.f32 %v1203_v9, %v1202_v60  ;;  %v797_v33 = vpop.permute.xlu1 %796  ;;  %v1094_v29 = vadd.f32 %v1086_v1, %v4118_v37  ;;  %v741_v52 = vsel %vm276_vm1, %v731_v47, %v737_v17  ;;  %v771_v58 = vsel %vm340_vm2, %v761_v48, %v767_v63  ;;  %v2504_v9 = vld [vmem:[#allocation7 + $0x60] sm:$0xff]  ;;  %v2506_v1 = vld [vmem:[#allocation7 + $0x70] sm:$0xff] }
 0x1c9   :  { %v1118_v3 = vadd.f32 %v1117_v35, %v1116_v53  ;;  %v791_v27 = vpop.permute.xlu0 %790  ;;  %v1069_v36 = vadd.f32 %v4128_v42, %v1054_v57  ;;  %v967_v10 = vadd.f32 %v960_v43, %v952_v25  ;;  %v749_v51 = vmul.f32 %v2500_v19, %v741_v52  ;;  %v2505_v35 = vld [vmem:[#allocation7 + $0xa8] sm:$0xff]  ;;  %v2508_v19 = vld [vmem:[#allocation7 + $0x78] sm:$0xff] }
 0x1ca   :  { %v1205_v49 = vrot.slane %v1204_v20, 1  ;;  %v1133_v0 = vsel %vm1097_vm8, %v1094_v29, 0.0  ;;  %v1175_v18 = vrot.slane %v1094_v29, 4  ;;  %v975_v28 = vmul.f32 %v2501_v24, %v741_v52 }
 0x1cb   :  { %2471 = vtanh.f32 %v1118_v3  ;;  %v1084_v32 = vadd.f32 %v4129_v50, %v1069_v36  ;;  %v1134_v55 = vrot.slane %v1133_v0, 4  ;;  %v757_v17 = vadd.f32 %v749_v51, %v727_v38  ;;  %v2507_v3 = vld [vmem:[#allocation7 + $0xb8] sm:$0xff] }
 0x1cc   :  { %v1206_v45 = vadd.f32 %v1205_v49, %v1204_v20  ;;  %v843_v47 = vpop.permute.xlu1 %842  ;;  %v1221_v11 = vsel %vm1097_vm8, %v1175_v18, 0.0  ;;  %v982_v12 = vadd.f32 %v975_v28, %v967_v10  ;;  %v779_v54 = vmul.f32 %v2502_v7, %v771_v58 }
 0x1cd   :  { %v990_v2 = vmul.f32 %v2503_v14, %v771_v58  ;;  %v837_v13 = vpop.permute.xlu0 %836  ;;  %v1092_v26 = vadd.f32 %v1084_v32, %v4118_v37  ;;  %v1135_v5 = vadd.f32 %v1134_v55, %v1133_v0  ;;  %v1222_v16 = vrot.slane %v1221_v11, 4  ;;  %v2509_v0 = vld [vmem:[#allocation7 + $0xc0] sm:$0xff]  ;;  %v3852_v14 = vld [vmem:[#allocation2 + $0x40] sm:$0xff] }
 0x1ce   :  { %2473 = vtanh.f32 %v1206_v45  ;;  %v787_v34 = vadd.f32 %v779_v54, %v757_v17  ;;  %v801_v63 = vsel %vm404_vm3, %v791_v27, %v797_v33  ;;  %v847_v53 = vsel %vm482_vm4, %v837_v13, %v843_v47  ;;  %v4130_v45 = vld [vmem:[#allocation33_spill] sm:$0xff] }
 0x1cf   :  { %v997_v60 = vadd.f32 %v990_v2, %v982_v12  ;;  %v3842_v62 = vpop.eup %2467  ;;  %v1119_v15 = vsel %vm1097_vm8, %v1092_v26, 0.0  ;;  %v1173_v21 = vrot.slane %v1092_v26, 4  ;;  %v1136_v30 = vrot.slane %v1135_v5, 2 }
 0x1d0   :  { %v1223_v48 = vadd.f32 %v1222_v16, %v1221_v11  ;;  %v873_v8 = vpop.permute.xlu1 %872  ;;  %v1120_v23 = vrot.slane %v1119_v15, 4  ;;  %v809_v37 = vmul.f32 %v2504_v9, %v801_v63  ;;  %v1005_v25 = vmul.f32 %v2505_v35, %v801_v63 }
 0x1d1   :  { %v855_v38 = vmul.f32 %v2506_v1, %v847_v53  ;;  %v867_v57 = vpop.permute.xlu0 %866  ;;  %v3845_v20 = vpop.eup %2469  ;;  %v1207_v4 = vsel %vm1097_vm8, %v1173_v21, 0.0  ;;  %v1137_v43 = vadd.f32 %v1136_v30, %v1135_v5  ;;  %v1035_v29 = vmul.f32 %v2507_v3, %v847_v53  ;;  %v2511_v5 = vld [vmem:[#allocation7 + $0x80] sm:$0xff]  ;;  %v4132_v30 = vld [vmem:[#allocation25_spill] sm:$0xff] }
 0x1d2   :  { %v1224_v33 = vrot.slane %v1223_v48, 2  ;;  %v1208_v52 = vrot.slane %v1207_v4, 4  ;;  %v817_v58 = vadd.f32 %v809_v37, %v787_v34  ;;  %v1012_v27 = vadd.f32 %v1005_v25, %v997_v60  ;;  %v2512_v34 = vld [vmem:[#allocation7 + $0xc8] sm:$0xff]  ;;  %v78_v37 = vld [vmem:[#allocation2 + $0x28] sm:$0xff] }
 0x1d3   :  { %v877_v36 = vsel %vm546_vm5, %v867_v57, %v873_v8  ;;  %v1138_v49 = vrot.slane %v1137_v43, 1  ;;  %v1121_v11 = vadd.f32 %v1120_v23, %v1119_v15  ;;  %v4131_v15 = vsub.f32 %v3547_v56, %v3550_v46  ;;  %v2513_v56 = vld [vmem:[#allocation7 + $0x88] sm:$0xff] }
 0x1d4   :  { %v1225_v10 = vadd.f32 %v1224_v33, %v1223_v48  ;;  %v885_v51 = vmul.f32 %v2508_v19, %v877_v36  ;;  %v1050_v18 = vmul.f32 %v2509_v0, %v877_v36  ;;  %v903_v24 = vpop.permute.xlu1 %902  ;;  %v1209_v32 = vadd.f32 %v1208_v52, %v1207_v4  ;;  %v2514_v33 = vld [vmem:[#allocation7 + $0xd0] sm:$0xff] }
 0x1d5   :  { %v2472_v28 = vpop.eup %2471  ;;  %v833_v55 = vadd.f32 %v4130_v45, %v817_v58  ;;  %v1027_v17 = vadd.f32 %v3715_v31, %v1012_v27  ;;  %v897_v47 = vpop.permute.xlu0 %896  ;;  %v1139_v12 = vadd.f32 %v1138_v49, %v1137_v43  ;;  %v1349_v48 = vrot.slane %v4132_v30, 4 }
 0x1d6   :  { %v1226_v7 = vrot.slane %v1225_v10, 1  ;;  %v907_v54 = vsel %vm610_vm6, %v897_v47, %v903_v24  ;;  %v3855_v2 = vmul.f32 %v3852_v14, %v2472_v28  ;;  %v1122_v35 = vrot.slane %v1121_v11, 2  ;;  %v2515_v24 = vld [vmem:[#allocation2 + $0x80] sm:$0xff] }
 0x1d7   :  { %v863_v13 = vadd.f32 %v855_v38, %v833_v55  ;;  %v1042_v26 = vadd.f32 %v1035_v29, %v1027_v17  ;;  %v915_v16 = vmul.f32 %v2511_v5, %v907_v54  ;;  %v1065_v60 = vmul.f32 %v2512_v34, %v907_v54  ;;  %v3872_v55 = vld [vmem:[#allocation5 + $0x10] sm:$0xff]  ;;  %v3884_v34 = vld [vmem:[#allocation2 + $0xa0] sm:$0xff] }
 0x1d8   :  { %v2474_v63 = vpop.eup %2473  ;;  %2475 = vtanh.f32 %v1139_v12  ;;  %v1227_v31 = vadd.f32 %v1226_v7, %v1225_v10  ;;  %v933_v53 = vpop.permute.xlu1 %932  ;;  %v1275_v21 = vadd.f32 %v4131_v15, %v3855_v2  ;;  %v1210_v57 = vrot.slane %v1209_v32, 2  ;;  %v4133_v10 = vld [vmem:[#allocation23_spill] sm:$0xff] }
 0x1d9   :  { %v893_v8 = vadd.f32 %v885_v51, %v863_v13  ;;  %v1057_v23 = vadd.f32 %v1050_v18, %v1042_v26  ;;  %v927_v9 = vpop.permute.xlu0 %926  ;;  %v3863_v25 = vmul.f32 %v3852_v14, %v2474_v63  ;;  %v1123_v52 = vadd.f32 %v1122_v35, %v1121_v11 }
 0x1da   :  { %2477 = vtanh.f32 %v1227_v31  ;;  %v937_v1 = vsel %vm674_vm7, %v927_v9, %v933_v53  ;;  %v1366_v38 = vsel %vm1364_vm9, %v1275_v21, %v1349_v48  ;;  %v1211_v27 = vadd.f32 %v1210_v57, %v1209_v32 }
 0x1db   :  { %v923_v4 = vadd.f32 %v915_v16, %v893_v8  ;;  %v1072_v43 = vadd.f32 %v1065_v60, %v1057_v23  ;;  %v945_v46 = vmul.f32 %v2513_v56, %v937_v1  ;;  %v1080_v3 = vmul.f32 %v2514_v33, %v937_v1  ;;  %v4136_v1 = vld [vmem:[#allocation27_spill] sm:$0xff] }
 0x1dc   :  { %v2379_v29 = vpack.c.bf16 %v78_v37, %v1366_v38  ;;  %v1302_v58 = vsub.f32 %v3852_v14, %v3863_v25  ;;  %v1289_v19 = vrot.slane %v4133_v10, 4  ;;  %v1124_v51 = vrot.slane %v1123_v52, 1  ;;  %v4135_v37 = vld [vmem:[#allocation26_spill] sm:$0xff] }
 0x1dd   :  { %v953_v36 = vadd.f32 %v945_v46, %v923_v4  ;;  %v1087_v49 = vadd.f32 %v1080_v3, %v1072_v43  ;;  %v1212_v18 = vrot.slane %v1211_v27, 1  ;;  %v1254_v28 = vmul.f32 %v2515_v24, %v3842_v62 }
 0x1de   :  { %2380 = vmatprep.subr.bf16.mxu1 %v2379_v29  ;;  %v1318_v0 = vrot.slane %v1302_v58, 4  ;;  %v1125_v47 = vadd.f32 %v1124_v51, %v1123_v52  ;;  %v1262_v62 = vmul.f32 %v2515_v24, %v3845_v20  ;;  %v4134_v20 = vmov 1.0   ;;  %v82_v51 = vld [vmem:[#allocation2 + $0x48] sm:$0xff] }
 0x1df   :  { %v968_v45 = vadd.f32 %v4119_v41, %v953_v36  ;;  %v1095_v17 = vadd.f32 %v3872_v55, %v1087_v49  ;;  %2382 = vmatpush3.bf16.msra.mxu1 %v2379_v29  ;;  %v1213_v11 = vadd.f32 %v1212_v18, %v1211_v27  ;;  %v1270_v26 = vsub.f32 %v2515_v24, %v1254_v28  ;;  %v4137_v29 = vld [vmem:[#allocation28_spill] sm:$0xff]  ;;  %v2518_v27 = vld [vmem:[#allocation2 + $0x60] sm:$0xff] }
 0x1e0   :  { %v3875_v32 = vadd.f32 %v1318_v0, %v1289_v19  ;;  %2384 = vmatprep.subr.bf16.mxu1 %v3746_v6  ;;  %2479 = vtanh.f32 %v1125_v47  ;;  %v1304_v15 = vsub.f32 %v2515_v24, %v1262_v62  ;;  %v1268_v58 = vsub.f32 %v3852_v14, %v3855_v2  ;;  %v4138_v49 = vld [vmem:[#allocation24_spill] sm:$0xff]  ;;  %v83_v24 = vld [vmem:[#allocation2 + $0x50] sm:$0xff] }
 0x1e1   :  { %v983_v12 = vadd.f32 %v4120_v44, %v968_v45  ;;  %v1140_v7 = vsel %vm1097_vm8, %v1095_v17, 0.0  ;;  %v1176_v54 = vrot.slane %v1095_v17, 4  ;;  %2481 = vtanh.f32 %v1213_v11  ;;  %v84_v28 = vld [vmem:[#allocation2 + $0x58] sm:$0xff] }
 0x1e2   :  { %v2476_v13 = vpop.eup %2475  ;;  %v1141_v41 = vrot.slane %v1140_v7, 4  ;;  %v1350_v18 = vrot.slane %v3875_v32, 4  ;;  %v2391_v17 = vpack.c.bf16 %v84_v28, %v83_v24  ;;  %v1290_v47 = vrot.slane %v3863_v25, 4 }
 0x1e3   :  { %v998_v5 = vadd.f32 %v4123_v40, %v983_v12  ;;  %v1228_v16 = vsel %vm1097_vm8, %v1176_v54, 0.0  ;;  %2386 = vmatpush3.bf16.msra.mxu1 %v3746_v6  ;;  %v3887_v44 = vmul.f32 %v3884_v34, %v2476_v13  ;;  %v86_v13 = vld [vmem:[#allocation2 + $0x68] sm:$0xff] }
 0x1e4   :  { %v2478_v60 = vpop.eup %2477  ;;  %v1142_v63 = vadd.f32 %v1141_v41, %v1140_v7  ;;  %v1229_v31 = vrot.slane %v1228_v16, 4  ;;  %2267 = vmatprep.subr.msk.mxu1 %vm1386_vm11, %v4134_v20 }
 0x1e5   :  { %v1013_v53 = vadd.f32 %v4124_v22, %v998_v5  ;;  %v1278_v40 = vadd.f32 %v1270_v26, %v3887_v44  ;;  %v3894_v21 = vmul.f32 %v3884_v34, %v2478_v60  ;;  %v87_v26 = vld [vmem:[#allocation2 + $0x70] sm:$0xff]  ;;  %v88_v5 = vld [vmem:[#allocation2 + $0x78] sm:$0xff] }
 0x1e6   :  { %v1143_v6 = vrot.slane %v1142_v63, 2  ;;  %v1230_v30 = vadd.f32 %v1229_v31, %v1228_v16 }
 0x1e7   :  { %v1028_v48 = vadd.f32 %v4125_v61, %v1013_v53  ;;  %2268 = vmatpush3.msk.msra.mxu1 %vm1386_vm11, %v4134_v20  ;;  %v3900_v8 = vsel %vm1364_vm9, %v1278_v40, %v1304_v15  ;;  %v1305_v23 = vsub.f32 %v3884_v34, %v3894_v21  ;;  %v1291_v61 = vrot.slane %v1262_v62, 4  ;;  %v90_v40 = vld [vmem:[#allocation2 + $0x88] sm:$0xff] }
 0x1e8   :  { %v1144_v22 = vadd.f32 %v1143_v6, %v1142_v63  ;;  %v1231_v9 = vrot.slane %v1230_v30, 2  ;;  %2270 = vmatmul.mubr.msk.f32.vlgmr.msra.gmra.mrb[0].mxu1 %vm1373_vm10, %v4135_v37  ;;  %v2399_v15 = vpack.c.bf16 %v88_v5, %v87_v26  ;;  %v3927_v6 = vld [vmem:[#allocation2 + $0xc0] sm:$0xff]  ;;  %v103_v26 = vld [vmem:[#allocation2 + $0xf0] sm:$0xff]  ;;  %v104_v5 = vld [vmem:[#allocation2 + $0xf8] sm:$0xff] }
 0x1e9   :  { %v1043_v35 = vadd.f32 %v4126_v59, %v1028_v48  ;;  %2272 = vmatprep.mubr.msk.f32.mxu1 %vm1373_vm10, %v4136_v1  ;;  %v1321_v38 = vrot.slane %v1305_v23, 4  ;;  %v1271_v48 = vsub.f32 %v3884_v34, %v3887_v44  ;;  %v91_v23 = vld [vmem:[#allocation2 + $0x90] sm:$0xff] }
 0x1ea   :  { %v1145_v57 = vrot.slane %v1144_v22, 1  ;;  %v1232_v4 = vadd.f32 %v1231_v9, %v1230_v30  ;;  %v2480_v46 = vpop.eup %2479 }
 0x1eb   :  { %v1058_v43 = vadd.f32 %v4127_v39, %v1043_v35  ;;  %v3910_v56 = vadd.f32 %v1321_v38, %v1291_v61  ;;  %v2482_v52 = vpop.eup %2481  ;;  %v1253_v36 = vmul.f32 %v2518_v27, %v2480_v46 }
 0x1ec   :  { %v1146_v33 = vadd.f32 %v1145_v57, %v1144_v22  ;;  %v1233_v3 = vrot.slane %v1232_v4, 1  ;;  %2273 = vmatmul.mubr.msk.f32.gmra.mrb[2].mxu1 %vm1373_vm10, %v4137_v29  ;;  %v1261_v10 = vmul.f32 %v2518_v27, %v2482_v52  ;;  %v92_v22 = vld [vmem:[#allocation2 + $0x98] sm:$0xff] }
 0x1ed   :  { %v1073_v59 = vadd.f32 %v4128_v42, %v1058_v43  ;;  %2301 = vmatprep.mubr.msk.f32.mxu1 %vm1373_vm10, %v4138_v49  ;;  %v1276_v0 = vadd.f32 %v1268_v58, %v1253_v36  ;;  %v1353_v57 = vrot.slane %v3910_v56, 4  ;;  %v2403_v43 = vpack.c.bf16 %v90_v40, %v3900_v8  ;;  %v94_v56 = vld [vmem:[#allocation2 + $0xa8] sm:$0xff] }
 0x1ee   :  { %2483 = vtanh.f32 %v1146_v33  ;;  %v1234_v39 = vadd.f32 %v1233_v3, %v1232_v4  ;;  %v1303_v42 = vsub.f32 %v2518_v27, %v1261_v10  ;;  %v2407_v34 = vpack.c.bf16 %v92_v22, %v91_v23 }
 0x1ef   :  { %v1088_v19 = vadd.f32 %v4129_v50, %v1073_v59  ;;  %v1367_v2 = vsel %vm1364_vm9, %v1276_v0, %v1350_v18  ;;  %v1292_v8 = vrot.slane %v3894_v21, 4  ;;  %v2521_v0 = vld [vmem:[#allocation2 + $0xe0] sm:$0xff] }
 0x1f0   :  { %2485 = vtanh.f32 %v1234_v39  ;;  %v2387_v45 = vpack.c.bf16 %v82_v51, %v1367_v2  ;;  %v1319_v11 = vrot.slane %v1303_v42, 4  ;;  %v99_v2 = vld [vmem:[#allocation2 + $0xd0] sm:$0xff] }
 0x1f1   :  { %v1096_v14 = vadd.f32 %v3872_v55, %v1088_v19  ;;  %v1269_v55 = vsub.f32 %v2518_v27, %v1253_v36  ;;  %v95_v27 = vld [vmem:[#allocation2 + $0xb0] sm:$0xff]  ;;  %v96_v36 = vld [vmem:[#allocation2 + $0xb8] sm:$0xff] }
 0x1f2   :  { %2388 = vmatprep.subr.bf16.mxu0 %v2387_v45  ;;  %v1335_v54 = vadd.f32 %v1319_v11, %v1290_v47  ;;  %v2520_v19 = vld [vmem:[#allocation8] sm:$0xff]  ;;  %v2415_v21 = vpack.c.bf16 %v96_v36, %v95_v27  ;;  %v2522_v47 = vld [vmem:[#allocation8 + $0x8] sm:$0xff] }
 0x1f3   :  { %v1147_v12 = vsel %vm1097_vm8, %v1096_v14, 0.0  ;;  %v1177_v50 = vrot.slane %v1096_v14, 4  ;;  %2390 = vmatpush3.bf16.msra.mxu0 %v2387_v45  ;;  %v100_v45 = vld [vmem:[#allocation2 + $0xd8] sm:$0xff] }
 0x1f4   :  { %v1148_v7 = vrot.slane %v1147_v12, 4  ;;  %2392 = vmatprep.subr.bf16.mxu0 %v2391_v17  ;;  %v1351_v41 = vrot.slane %v1335_v54, 4 }
 0x1f5   :  { %v1235_v32 = vsel %vm1097_vm8, %v1177_v50, 0.0  ;;  %v2423_v50 = vpack.c.bf16 %v100_v45, %v99_v2 }
 0x1f6   :  { %v1236_v62 = vrot.slane %v1235_v32, 4  ;;  %v1149_v16 = vadd.f32 %v1148_v7, %v1147_v12  ;;  %v1368_v63 = vsel %vm1364_vm9, %v1269_v55, %v1351_v41 }
 0x1f7   :  { %2394 = vmatpush3.bf16.msra.mxu0 %v2391_v17  ;;  %v2395_v53 = vpack.c.bf16 %v86_v13, %v1368_v63  ;;  %v102_v13 = vld [vmem:[#allocation2 + $0xe8] sm:$0xff] }
 0x1f8   :  { %v2484_v60 = vpop.eup %2483  ;;  %v1237_v25 = vadd.f32 %v1236_v62, %v1235_v32  ;;  %v1150_v31 = vrot.slane %v1149_v16, 2  ;;  %2283 = vmatprep.subr.msk.mxu0 %vm1386_vm11, %v4134_v20  ;;  %v2524_v62 = vld [vmem:[#allocation8 + $0x18] sm:$0xff] }
 0x1f9   :  { %v3930_v30 = vmul.f32 %v3927_v6, %v2484_v60  ;;  %2396 = vmatprep.subr.bf16.mxu1 %v2395_v53 }
 0x1fa   :  { %v2486_v9 = vpop.eup %2485  ;;  %v1151_v35 = vadd.f32 %v1150_v31, %v1149_v16  ;;  %v1238_v61 = vrot.slane %v1237_v25, 2  ;;  %2398 = vmatpush3.bf16.msra.mxu1 %v2395_v53 }
 0x1fb   :  { %v1279_v38 = vadd.f32 %v1271_v48, %v3930_v30  ;;  %v3939_v4 = vmul.f32 %v3927_v6, %v2486_v9  ;;  %2284 = vmatpush3.msk.msra.mxu0 %vm1386_vm11, %v4134_v20  ;;  %2400 = vmatprep.subr.bf16.mxu1 %v2399_v15  ;;  %v1272_v24 = vsub.f32 %v3927_v6, %v3930_v30 }
 0x1fc   :  { %v1152_v44 = vrot.slane %v1151_v35, 1  ;;  %v1239_v46 = vadd.f32 %v1238_v61, %v1237_v25  ;;  %2404 = vmatprep.subr.bf16.mxu0 %v2403_v43  ;;  %2286 = vmatmul.mubr.msk.f32.vlgmr.msra.gmra.mrb[4].mxu0 %vm1373_vm10, %v4135_v37  ;;  %v2431_v25 = vpack.c.bf16 %v104_v5, %v103_v26 }
 0x1fd   :  { %v1370_v33 = vsel %vm1364_vm9, %v1279_v38, %v1353_v57  ;;  %v1306_v3 = vsub.f32 %v3927_v6, %v3939_v4  ;;  %2406 = vmatpush3.bf16.msra.mxu0 %v2403_v43  ;;  %2288 = vmatprep.mubr.msk.f32.mxu0 %vm1373_vm10, %v4136_v1  ;;  %v1293_v7 = vrot.slane %v3939_v4, 4 }
 0x1fe   :  { %v1153_v52 = vadd.f32 %v1152_v44, %v1151_v35  ;;  %v1240_v59 = vrot.slane %v1239_v46, 1  ;;  %2402 = vmatpush3.bf16.msra.mxu1 %v2399_v15  ;;  %2408 = vmatprep.subr.bf16.mxu0 %v2407_v34  ;;  %v2411_v39 = vpack.c.bf16 %v94_v56, %v1370_v33 }
 0x1ff   :  { %v1322_v58 = vrot.slane %v1306_v3, 4  ;;  %2299 = vmatprep.subr.msk.mxu1 %vm1386_vm11, %v4134_v20 }
 0x200   :  { %2487 = vtanh.f32 %v1153_v52  ;;  %v1241_v49 = vadd.f32 %v1240_v59, %v1239_v46  ;;  %2289 = vmatmul.mubr.msk.f32.gmra.mrb[6].mxu0 %vm1373_vm10, %v4137_v29 }
 0x201   :  { %v1338_v10 = vadd.f32 %v1322_v58, %v1292_v8  ;;  %2410 = vmatpush3.bf16.msra.mxu0 %v2407_v34  ;;  %2317 = vmatprep.mubr.msk.f32.mxu0 %vm1373_vm10, %v2520_v19 }
 0x202   :  { %2489 = vtanh.f32 %v1241_v49  ;;  %2300 = vmatpush3.msk.msra.mxu1 %vm1386_vm11, %v4134_v20  ;;  %2315 = vmatprep.subr.msk.mxu0 %vm1386_vm11, %v4134_v20 }
 0x203   :  { %2412 = vmatprep.subr.bf16.mxu1 %v2411_v39  ;;  %2302 = vmatmul.mubr.msk.f32.vlgmr.msra.gmra.mrb[4].mxu1 %vm1373_vm10, %v4135_v37  ;;  %v1354_v14 = vrot.slane %v1338_v10, 4 }
 0x204   :  { %2414 = vmatpush3.bf16.msra.mxu1 %v2411_v39  ;;  %2304 = vmatprep.mubr.msk.f32.mxu1 %vm1373_vm10, %v4136_v1 }
 0x205   :  { %2316 = vmatpush3.msk.msra.mxu0 %vm1386_vm11, %v4134_v20  ;;  %2416 = vmatprep.subr.bf16.mxu1 %v2415_v21 }
 0x206   :  { %2318 = vmatmul.mubr.msk.f32.vlgmr.msra.gmra.mrb[8].mxu0 %vm1373_vm10, %v4135_v37  ;;  %v98_v37 = vld [vmem:[#allocation2 + $0xc8] sm:$0xff] }
 0x207   :  { %2305 = vmatmul.mubr.msk.f32.gmra.mrb[6].mxu1 %vm1373_vm10, %v4137_v29  ;;  %2320 = vmatprep.mubr.msk.f32.mxu0 %vm1373_vm10, %v4136_v1 }
 0x208   :  { %2418 = vmatpush3.bf16.msra.mxu1 %v2415_v21  ;;  %2333 = vmatprep.mubr.msk.f32.mxu1 %vm1373_vm10, %v2520_v19 }
 0x209   :  { %2331 = vmatprep.subr.msk.mxu1 %vm1386_vm11, %v4134_v20 }
 0x20a   :  { %v2488_v51 = vpop.eup %2487  ;;  %2321 = vmatmul.mubr.msk.f32.gmra.mrb[10].mxu0 %vm1373_vm10, %v4137_v29  ;;  %v2523_v29 = vld [vmem:[#allocation8 + $0x10] sm:$0xff] }
 0x20b   :  { %v1257_v18 = vmul.f32 %v2521_v0, %v2488_v51  ;;  %2349 = vmatprep.mubr.msk.f32.mxu0 %vm1373_vm10, %v2520_v19 }
 0x20c   :  { %v2490_v28 = vpop.eup %2489  ;;  %2332 = vmatpush3.msk.msra.mxu1 %vm1386_vm11, %v4134_v20 }
 0x20d   :  { %v1280_v42 = vadd.f32 %v1272_v24, %v1257_v18  ;;  %v1265_v1 = vmul.f32 %v2521_v0, %v2490_v28  ;;  %2334 = vmatmul.mubr.msk.f32.vlgmr.msra.gmra.mrb[8].mxu1 %vm1373_vm10, %v2522_v47  ;;  %v1273_v55 = vsub.f32 %v2521_v0, %v1257_v18 }
 0x20e   :  { %2336 = vmatprep.mubr.msk.f32.mxu1 %vm1373_vm10, %v2523_v29 }
 0x20f   :  { %v1371_v17 = vsel %vm1364_vm9, %v1280_v42, %v1354_v14  ;;  %v1307_v11 = vsub.f32 %v2521_v0, %v1265_v1 }
 0x210   :  { %v2419_v12 = vpack.c.bf16 %v98_v37, %v1371_v17 }
 0x211   :  { %v1323_v54 = vrot.slane %v1307_v11, 4  ;;  %2337 = vmatmul.mubr.msk.f32.gmra.mrb[10].mxu1 %vm1373_vm10, %v2524_v62 }
 0x212   :  { %2420 = vmatprep.subr.bf16.mxu0 %v2419_v12  ;;  %2365 = vmatprep.mubr.msk.f32.mxu1 %vm1373_vm10, %v2520_v19 }
 0x213   :  { %2422 = vmatpush3.bf16.msra.mxu0 %v2419_v12  ;;  %v1339_v32 = vadd.f32 %v1323_v54, %v1293_v7 }
 0x214   :  { %2424 = vmatprep.subr.bf16.mxu0 %v2423_v50 }
 0x215   :  { %v1355_v41 = vrot.slane %v1339_v32, 4 }
 0x217   :  { %v1372_v16 = vsel %vm1364_vm9, %v1273_v55, %v1355_v41  ;;  %2426 = vmatpush3.bf16.msra.mxu0 %v2423_v50 }
 0x218   :  { %v2427_v60 = vpack.c.bf16 %v102_v13, %v1372_v16  ;;  %2347 = vmatprep.subr.msk.mxu0 %vm1386_vm11, %v4134_v20 }
 0x21a   :  { %2428 = vmatprep.subr.bf16.mxu1 %v2427_v60 }
 0x21b   :  { %2430 = vmatpush3.bf16.msra.mxu1 %v2427_v60  ;;  %2348 = vmatpush3.msk.msra.mxu0 %vm1386_vm11, %v4134_v20 }
 0x21c   :  { %2432 = vmatprep.subr.bf16.mxu1 %v2431_v25  ;;  %2350 = vmatmul.mubr.msk.f32.vlgmr.msra.gmra.mrb[12].mxu0 %vm1373_vm10, %v2522_v47 }
 0x21d   :  { %2352 = vmatprep.mubr.msk.f32.mxu0 %vm1373_vm10, %v2523_v29 }
 0x21f   :  { %2434 = vmatpush3.bf16.msra.mxu1 %v2431_v25 }
 0x220   :  { %2363 = vmatprep.subr.msk.mxu1 %vm1386_vm11, %v4134_v20  ;;  %2353 = vmatmul.mubr.msk.f32.gmra.mrb[14].mxu0 %vm1373_vm10, %v2524_v62 }
 0x223   :  { %2364 = vmatpush3.msk.msra.mxu1 %vm1386_vm11, %v4134_v20 }
 0x224   :  { %2366 = vmatmul.mubr.msk.f32.vlgmr.msra.gmra.mrb[12].mxu1 %vm1373_vm10, %v2522_v47 }
 0x225   :  { %2368 = vmatprep.mubr.msk.f32.mxu1 %vm1373_vm10, %v2523_v29 }
 0x228   :  { %2369 = vmatmul.mubr.msk.f32.gmra.mrb[14].mxu1 %vm1373_vm10, %v2524_v62 }
 0x256   :  { %v2255_v63 = vpop.f32.mrb[0].mxu0 }
 0x257   :  { %1477 = vst.msk [vmem:[#allocation10 + $0x8] sm:$0xff] %vm1475_vm12, %v2255_v63  ;;  %v1456_v31 = vpop.f32.mrb[1].mxu0 }
 0x258   :  { %1476 = vst.msk [vmem:[#allocation10] sm:$0xff] %vm1475_vm12, %v1456_v31 }
 0x25a   :  { %v2258_v53 = vpop.f32.mrb[2].mxu0 }
 0x25b   :  { %1479 = vst.msk [vmem:[#allocation10 + $0x18] sm:$0xff] %vm1475_vm12, %v2258_v53  ;;  %v1466_v40 = vpop.f32.mrb[3].mxu0 }
 0x25c   :  { %1478 = vst.msk [vmem:[#allocation10 + $0x10] sm:$0xff] %vm1475_vm12, %v1466_v40 }
 0x2bb   :  { %v2271_v20 = vpop.f32.mrb[0].mxu1 }
 0x2bc   :  { %1567 = vst.msk [vmem:[#allocation10 + $0x28] sm:$0xff] %vm1475_vm12, %v2271_v20  ;;  %v1546_v15 = vpop.f32.mrb[1].mxu1 }
 0x2bd   :  { %1566 = vst.msk [vmem:[#allocation10 + $0x20] sm:$0xff] %vm1475_vm12, %v1546_v15 }
 0x2bf   :  { %v2274_v6 = vpop.f32.mrb[2].mxu1 }
 0x2c0   :  { %1569 = vst.msk [vmem:[#allocation10 + $0x38] sm:$0xff] %vm1475_vm12, %v2274_v6  ;;  %v1556_v30 = vpop.f32.mrb[3].mxu1 }
 0x2c1   :  { %1568 = vst.msk [vmem:[#allocation10 + $0x30] sm:$0xff] %vm1475_vm12, %v1556_v30 }
 0x2cf   :  { %v2287_v48 = vpop.f32.mrb[4].mxu0 }
 0x2d0   :  { %1657 = vst.msk [vmem:[#allocation10 + $0x48] sm:$0xff] %vm1475_vm12, %v2287_v48  ;;  %v1636_v23 = vpop.f32.mrb[5].mxu0 }
 0x2d1   :  { %1656 = vst.msk [vmem:[#allocation10 + $0x40] sm:$0xff] %vm1475_vm12, %v1636_v23 }
 0x2d3   :  { %v2290_v22 = vpop.f32.mrb[6].mxu0 }
 0x2d4   :  { %1659 = vst.msk [vmem:[#allocation10 + $0x58] sm:$0xff] %vm1475_vm12, %v2290_v22  ;;  %v1646_v9 = vpop.f32.mrb[7].mxu0 }
 0x2d5   :  { %1658 = vst.msk [vmem:[#allocation10 + $0x50] sm:$0xff] %vm1475_vm12, %v1646_v9 }
 0x2d6   :  { %v2303_v35 = vpop.f32.mrb[4].mxu1 }
 0x2d7   :  { %1747 = vst.msk [vmem:[#allocation10 + $0x68] sm:$0xff] %vm1475_vm12, %v2303_v35  ;;  %v1726_v61 = vpop.f32.mrb[5].mxu1 }
 0x2d8   :  { %1746 = vst.msk [vmem:[#allocation10 + $0x60] sm:$0xff] %vm1475_vm12, %v1726_v61 }
 0x2d9   :  { %v2319_v38 = vpop.f32.mrb[8].mxu0 }
 0x2da   :  { %v2306_v57 = vpop.f32.mrb[6].mxu1  ;;  %1837 = vst.msk [vmem:[#allocation10 + $0x88] sm:$0xff] %vm1475_vm12, %v2319_v38  ;;  %v1816_v4 = vpop.f32.mrb[9].mxu0 }
 0x2db   :  { %1749 = vst.msk [vmem:[#allocation10 + $0x78] sm:$0xff] %vm1475_vm12, %v2306_v57  ;;  %v1736_v43 = vpop.f32.mrb[7].mxu1  ;;  %1836 = vst.msk [vmem:[#allocation10 + $0x80] sm:$0xff] %vm1475_vm12, %v1816_v4 }
 0x2dc   :  { %1748 = vst.msk [vmem:[#allocation10 + $0x70] sm:$0xff] %vm1475_vm12, %v1736_v43 }
 0x2dd   :  { %v2322_v34 = vpop.f32.mrb[10].mxu0 }
 0x2de   :  { %1839 = vst.msk [vmem:[#allocation10 + $0x98] sm:$0xff] %vm1475_vm12, %v2322_v34  ;;  %v1826_v44 = vpop.f32.mrb[11].mxu0 }
 0x2df   :  { %1838 = vst.msk [vmem:[#allocation10 + $0x90] sm:$0xff] %vm1475_vm12, %v1826_v44 }
 0x2e0   :  { %v2335_v46 = vpop.f32.mrb[8].mxu1 }
 0x2e1   :  { %1927 = vst.msk [vmem:[#allocation10 + $0xa8] sm:$0xff] %vm1475_vm12, %v2335_v46  ;;  %v1906_v33 = vpop.f32.mrb[9].mxu1 }
 0x2e2   :  { %1926 = vst.msk [vmem:[#allocation10 + $0xa0] sm:$0xff] %vm1475_vm12, %v1906_v33 }
 0x2e4   :  { %v2338_v3 = vpop.f32.mrb[10].mxu1 }
 0x2e5   :  { %1929 = vst.msk [vmem:[#allocation10 + $0xb8] sm:$0xff] %vm1475_vm12, %v2338_v3  ;;  %v1916_v56 = vpop.f32.mrb[11].mxu1 }
 0x2e6   :  { %1928 = vst.msk [vmem:[#allocation10 + $0xb0] sm:$0xff] %vm1475_vm12, %v1916_v56 }
 0x2ef   :  { %v2351_v52 = vpop.f32.mrb[12].mxu0 }
 0x2f0   :  { %2017 = vst.msk [vmem:[#allocation10 + $0xc8] sm:$0xff] %vm1475_vm12, %v2351_v52  ;;  %v1996_v59 = vpop.f32.mrb[13].mxu0 }
 0x2f1   :  { %2016 = vst.msk [vmem:[#allocation10 + $0xc0] sm:$0xff] %vm1475_vm12, %v1996_v59 }
 0x2f3   :  { %v2354_v8 = vpop.f32.mrb[14].mxu0 }
 0x2f4   :  { %2019 = vst.msk [vmem:[#allocation10 + $0xd8] sm:$0xff] %vm1475_vm12, %v2354_v8  ;;  %v2006_v58 = vpop.f32.mrb[15].mxu0 }
 0x2f5   :  { %2018 = vst.msk [vmem:[#allocation10 + $0xd0] sm:$0xff] %vm1475_vm12, %v2006_v58 }
 0x2f7   :  { %v2367_v27 = vpop.f32.mrb[12].mxu1 }
 0x2f8   :  { %2107 = vst.msk [vmem:[#allocation10 + $0xe8] sm:$0xff] %vm1475_vm12, %v2367_v27  ;;  %v2086_v36 = vpop.f32.mrb[13].mxu1 }
 0x2f9   :  { %2106 = vst.msk [vmem:[#allocation10 + $0xe0] sm:$0xff] %vm1475_vm12, %v2086_v36 }
 0x2fb   :  { %v2370_v49 = vpop.f32.mrb[14].mxu1 }
 0x2fc   :  { %2109 = vst.msk [vmem:[#allocation10 + $0xf8] sm:$0xff] %vm1475_vm12, %v2370_v49  ;;  %v2096_v39 = vpop.f32.mrb[15].mxu1 }
 0x2fd   :  { %2108 = vst.msk [vmem:[#allocation10 + $0xf0] sm:$0xff] %vm1475_vm12, %v2096_v39 }
 0x2fe   :  { %2624 = shalt.err (!%p2621_p8)
}
 0x2ff   :  { %s2625_s5 = scalar_lea.hbm %s4055_s4, 4096 }
 0x300   :  { %p2626_p9 = scmp.ne.s32.totalorder %s4055_s4, %s2625_s5  ;;  %p2629_p10 = scmp.lt.u32.totalorder %s2625_s5, %s4055_s4 }
 0x302   :  { %p2631_p11 = pnand %p2629_p10, %p2626_p9 }
 0x304   :  { %2634 = shalt.err (!%p2631_p11)
}
 0x305   :  { %2121 = dma.vmem_to_hbm [thread:$0]  %s2116_s18, 4096, %s4055_s4, [#allocation4], %s2645_s27, %s2645_s27, %s2646_s28  }
 0x306   :  { %2641 = dma.done.wait [#allocation4], 4096  }
 0x307   :  { %2642 = vsyncadd [#allocation4], 4294963200 }
 0x308   :  { %2125 = vsyncpa [#allocation3], 1 }
 0x309   :  { %2126 = vsyncpa [#allocation6], 1 }
 0x30a   :  { %2127 = vsyncpa [#allocation9], 1 }
 0x30b   :  { %2128 = vsyncpa [#allocation4], 1 }

</bundles_post_ra>
